<compile_context>
chip_gen: v5e
topology: v5e:2x2
jax: 0.10.0
libtpu: 0.0.40
codegen_flags: <defaults>
</compile_context>

<pallas_src>
import functools

import jax
import jax.numpy as jnp
import numpy as np
from jax.experimental import pallas as pl
from jax.experimental.pallas import tpu as pltpu

# ----------------------------- config ---------------------------------------
B, S = 2, 129                        # batch, synthetic prompt length
D, V = 128, 512                      # hidden dim, vocab (multiples of 128)
TN = 256                             # token tile: N = B*(S-1) = 256 -> 1 grid step
ASSISTANT_TAG_IDS = [5, 6]           # token ids standing in for 'ASSISTANT:'
IMAGE_TOKEN_ID = 7
MAX_CONTEXT_LENGTH = 1024
IGNORE_INDEX = -100


# ----------------------------- Pallas kernel --------------------------------
def _lm_loss_kernel(tok_ref, lab_ref, emb_tbl_ref, w1_ref, w2_ref, b2_ref,
                    *out_refs, with_hidden: bool):
    if with_hidden:
        loss_ref, hid_out_ref = out_refs
    else:
        (loss_ref,) = out_refs
        hid_out_ref = None

    i = pl.program_id(0)                       # token-tile index

    # SMEM accumulator output [loss_sum, valid_count] shared across token tiles.
    @pl.when(i == 0)
    def _():
        loss_ref[0, 0] = 0.0
        loss_ref[0, 1] = 0.0

    toks = tok_ref[...]                                         # (TN, 1) int32
    labels = lab_ref[...]                                       # (TN, 1) int32
    vocab_iota = jax.lax.broadcasted_iota(jnp.int32, (TN, V), 1)

    # Fused embedding gather: one-hot(tokens) @ table on the MXU.  Exact
    # row-gather (single 1.0 per row, f32 accumulate), avoids the separate
    # XLA jnp.take and its (N, D) HBM round trip.
    one_hot = (vocab_iota == toks).astype(emb_tbl_ref.dtype)    # (TN, V) bf16
    emb = jnp.dot(one_hot, emb_tbl_ref[...],
                  preferred_element_type=jnp.float32)           # (TN, D) f32

    # hidden = GELU(emb @ W1); bf16 MXU operands, f32 accumulation.
    h = jax.nn.gelu(jnp.dot(emb.astype(w1_ref.dtype), w1_ref[...],
                            preferred_element_type=jnp.float32))  # (TN, D) f32
    if with_hidden:
        hid_out_ref[...] = h.astype(hid_out_ref.dtype)          # bf16 writeback

    # Full-vocab logits in one pass (V=512 -> W2 is VMEM resident).
    # TODO(synk): for a realistic LM head (large V) stream W2 over a trailing
    # "arbitrary" vocab grid axis with online log-sum-exp instead.
    logits = jnp.dot(h.astype(w2_ref.dtype), w2_ref[...],
                     preferred_element_type=jnp.float32) + b2_ref[...]  # (TN, V)

    # plain (single-pass) log-sum-exp + target-logit gather + -100 masking
    m = jnp.max(logits, axis=-1, keepdims=True)                 # (TN, 1)
    lse = m + jnp.log(jnp.sum(jnp.exp(logits - m), axis=-1, keepdims=True))
    tgt = jnp.sum(jnp.where(vocab_iota == labels, logits, 0.0),
                  axis=-1, keepdims=True)                       # (TN, 1)

    valid = labels >= 0                                         # -100 / pad rows masked
    per_tok = jnp.where(valid, lse - tgt, 0.0)                  # (TN, 1)
    loss_ref[0, 0] += jnp.sum(per_tok)
    loss_ref[0, 1] += jnp.sum(valid.astype(jnp.float32))


def _masked_lm_loss(tokens, labels, emb_tbl, w1, w2, b2, *,
                    output_hidden_states=False):
    """tokens, labels: (N,) int32 (labels use -100 as ignore_index)."""
    n = tokens.shape[0]
    n_pad = ((n + TN - 1) // TN) * TN
    pad = n_pad - n
    tok_p = jnp.pad(tokens, ((0, pad),), constant_values=0).reshape(n_pad, 1)
    lab_p = jnp.pad(labels, ((0, pad),),
                    constant_values=IGNORE_INDEX).reshape(n_pad, 1)
    n_tiles = n_pad // TN

    out_shape = [jax.ShapeDtypeStruct((1, 2), jnp.float32)]      # [sum, count]
    out_specs = [pl.BlockSpec(memory_space=pltpu.MemorySpace.SMEM)]
    if output_hidden_states:
        out_shape.append(jax.ShapeDtypeStruct((n_pad, D), jnp.bfloat16))
        out_specs.append(pl.BlockSpec((TN, D), lambda i: (i, 0)))

    kernel = functools.partial(_lm_loss_kernel,
                               with_hidden=output_hidden_states)

    outs = pl.pallas_call(
        kernel,
        out_shape=tuple(out_shape),
        grid_spec=pltpu.PrefetchScalarGridSpec(
            num_scalar_prefetch=0,
            grid=(n_tiles,),
            in_specs=[
                pl.BlockSpec((TN, 1), lambda i: (i, 0)),   # token ids
                pl.BlockSpec((TN, 1), lambda i: (i, 0)),   # labels
                pl.BlockSpec((V, D), lambda i: (0, 0)),    # embedding table (resident)
                pl.BlockSpec((D, D), lambda i: (0, 0)),    # W1 (resident)
                pl.BlockSpec((D, V), lambda i: (0, 0)),    # W2 full vocab (resident)
                pl.BlockSpec((1, V), lambda i: (0, 0)),    # b2
            ],
            out_specs=tuple(out_specs)),
        # token axis is "arbitrary" because the SMEM loss accumulator is
        # shared (output-resident) across token tiles.
        compiler_params=pltpu.CompilerParams(
            dimension_semantics=("arbitrary",)),
    )(tok_p, lab_p, emb_tbl, w1, w2, b2)

    if output_hidden_states:
        loss_acc, hidden = outs
    else:
        loss_acc = outs[0] if isinstance(outs, (tuple, list)) else outs
        hidden = None

    loss = loss_acc[0, 0] / jnp.maximum(loss_acc[0, 1], 1.0)
    if output_hidden_states:
        return loss, hidden[:n]
    return loss, None


masked_lm_loss = jax.jit(_masked_lm_loss,
                         static_argnames=("output_hidden_states",))


# ----------------------------- glue (host-side, mirrors the module) ---------
def get_labels(input_ids_list, substring_ids):
    """Mirror of VQAModel.get_labels: -100 before (and including) the tag."""
    labels = []
    for prompt in input_ids_list:
        pos = None
        for i in range(len(prompt) - len(substring_ids) + 1):
            if prompt[i:i + len(substring_ids)] == substring_ids:
                pos = i + len(substring_ids)
                break
        if pos is None:
            raise ValueError("assistant tag not found in prompt")
        labels.append([IGNORE_INDEX] * pos + prompt[pos:])
    return np.asarray(labels, dtype=np.int32)


def truncate_around_image_token(input_ids, attention_mask, label_ids,
                                max_length, image_token_id):
    """Host-side preprocessing glue (same semantics as the module)."""
    bsz, cur = input_ids.shape
    if cur <= max_length:
        return input_ids, attention_mask, label_ids
    image_mask = input_ids[0] == image_token_id
    num_images = int(image_mask.sum())
    if num_images == 0:
        raise ValueError("No image tokens detected in input_ids")
    if (input_ids[0, :max_length] == image_token_id).sum() == num_images:
        sl = slice(0, max_length)
    elif (input_ids[0, -max_length:] == image_token_id).sum() == num_images:
        sl = slice(cur - max_length, cur)
    else:
        idx = np.where(image_mask)[0]
        text_space = (max_length - num_images) // 2
        lo = max(0, int(idx[0]) - text_space)
        hi = min(cur, int(idx[-1]) + text_space + 1)
        if hi - lo < max_length:
            lo = max(0, hi - max_length)
        sl = slice(lo, hi)
    return input_ids[:, sl], attention_mask[:, sl], label_ids[:, sl]


class PallasVQAModel:
    """Synthetic stand-in for VQAModel: forward() returns the masked causal-LM
    cross-entropy loss (and optionally hidden states), computed by one fused
    Pallas kernel (embedding gather + MLP + vocab projection + masked CE)."""

    assistant_tag_ids = ASSISTANT_TAG_IDS

    def __init__(self, key, max_context_length=MAX_CONTEXT_LENGTH):
        self.max_context_length = max_context_length
        k1, k2, k3 = jax.random.split(key, 3)
        # torch_dtype=float16 in the reference -> bf16 weights here (TPU-native),
        # accumulation in f32 inside the kernel.
        self.embed = (jax.random.normal(k1, (V, D), jnp.float32) * 0.02).astype(jnp.bfloat16)
        self.w1 = (jax.random.normal(k2, (D, D), jnp.float32) * 0.05).astype(jnp.bfloat16)
        self.w2 = (jax.random.normal(k3, (D, V), jnp.float32) * 0.05).astype(jnp.bfloat16)
        self.b2 = jnp.zeros((1, V), jnp.float32)

    def check_inputs(self, inputs, use_image=True, use_answer=True):
        assert "question" in inputs, "Question is not provided in inputs."
        if use_answer:
            assert "chosen" in inputs, "Chosen answer is not provided in inputs."
        if use_image:
            assert "image" in inputs, "Image is not provided in inputs."

    def get_formatted_prompt(self, inputs, use_image=True):
        # TODO(synk): real string formatting + HF tokenization have no Pallas
        # equivalent; synthetic token ids are passed through instead.
        return inputs["question"], inputs.get("image", None)

    def _forward(self, input_ids, output_hidden_states=False):
        input_ids = np.asarray(input_ids, dtype=np.int32)
        attention_mask = np.ones_like(input_ids)
        label_ids = get_labels([row.tolist() for row in input_ids],
                               self.assistant_tag_ids)
        input_ids, attention_mask, label_ids = truncate_around_image_token(
            input_ids, attention_mask, label_ids,
            self.max_context_length, IMAGE_TOKEN_ID)

        # HF causal-LM style shift: logits[:, :-1] vs labels[:, 1:], flattened.
        shift_tokens = jnp.asarray(input_ids[:, :-1]).reshape(-1)   # (B*(S-1),)
        shift_labels = jnp.asarray(label_ids[:, 1:]).reshape(-1)    # (B*(S-1),)

        loss, hidden = masked_lm_loss(shift_tokens, shift_labels, self.embed,
                                      self.w1, self.w2, self.b2,
                                      output_hidden_states=output_hidden_states)
        if output_hidden_states:
            return loss, hidden.reshape(input_ids.shape[0], -1, D)
        return loss

    def forward(self, inputs, use_image=True, output_hidden_states=False,
                use_answer=True):
        self.check_inputs(inputs, use_image, use_answer)
        if not use_answer and "chosen" in inputs:
            inputs.pop("chosen")
        formatted_prompt, _images = self.get_formatted_prompt(inputs, use_image)
        return self._forward(formatted_prompt,
                             output_hidden_states=output_hidden_states)


# ----------------------------- main ------------------------------------------
if __name__ == "__main__":
    key = jax.random.PRNGKey(0)
    k_model, k_tok = jax.random.split(key)

    # Deterministic synthetic "tokenized prompt": random content tokens in
    # [8, V), one image token, and the ASSISTANT tag so get_labels succeeds.
    toks = np.array(jax.random.randint(k_tok, (B, S), 8, V), dtype=np.int32)
    toks[:, 2] = IMAGE_TOKEN_ID
    toks[:, 6] = ASSISTANT_TAG_IDS[0]
    toks[:, 7] = ASSISTANT_TAG_IDS[1]

    model = PallasVQAModel(k_model)
    inputs = {"question": toks, "chosen": "dummy answer", "image": None}

    loss = model.forward(inputs, use_image=True, use_answer=True)
    loss2, hidden = model.forward(inputs, use_image=True,
                                  output_hidden_states=True)
    jax.block_until_ready((loss, loss2, hidden))
    assert np.isfinite(float(loss))
    assert np.isfinite(float(loss2))
    assert hidden.shape == (B, S - 1, D)
    print("KERNEL_OK")
</pallas_src>

<mosaic_0001>
module attributes {stable_mosaic.version = 11 : i64} {
  func.func @_lm_loss_kernel(%arg0: i32, %arg1: memref<256x1xi32, #tpu.memory_space<vmem>>, %arg2: memref<256x1xi32, #tpu.memory_space<vmem>>, %arg3: memref<512x128xbf16, #tpu.memory_space<vmem>>, %arg4: memref<128x128xbf16, #tpu.memory_space<vmem>>, %arg5: memref<128x512xbf16, #tpu.memory_space<vmem>>, %arg6: memref<1x512xf32, #tpu.memory_space<vmem>>, %arg7: memref<1x2xf32, #tpu.memory_space<smem>>) attributes {dimension_semantics = [#tpu.dimension_semantics<arbitrary>], iteration_bounds = array<i64: 1>, scalar_prefetch = 0 : i64, scratch_operands = 0 : i64, tpu.core_type = #tpu.core_type<tc>, window_params = [{transform_indices = @transform_0, window_bounds = array<i64: 256, 1>}, {transform_indices = @transform_1, window_bounds = array<i64: 256, 1>}, {pipeline_mode = #tpu.pipeline_mode<synchronous>, transform_indices = @transform_2, window_bounds = array<i64: 512, 128>}, {pipeline_mode = #tpu.pipeline_mode<synchronous>, transform_indices = @transform_3, window_bounds = array<i64: 128, 128>}, {pipeline_mode = #tpu.pipeline_mode<synchronous>, transform_indices = @transform_4, window_bounds = array<i64: 128, 512>}, {pipeline_mode = #tpu.pipeline_mode<synchronous>, transform_indices = @transform_5, window_bounds = array<i64: 1, 512>}, {transform_indices = @transform_6, window_bounds = array<i64: 1, 2>}]} {
    %c0_i32 = arith.constant 0 : i32
    %0 = arith.cmpi eq, %arg0, %c0_i32 : i32
    %1 = arith.extui %0 : i1 to i32
    %c0_i32_0 = arith.constant 0 : i32
    %2 = arith.cmpi ne, %1, %c0_i32_0 : i32
    scf.if %2 {
      %cst_33 = arith.constant 0.000000e+00 : f32
      %c0_34 = arith.constant 0 : index
      %c0_35 = arith.constant 0 : index
      %71 = memref.load %arg7[%c0_34, %c0_35] : memref<1x2xf32, #tpu.memory_space<smem>>
      memref.store %cst_33, %arg7[%c0_34, %c0_35] : memref<1x2xf32, #tpu.memory_space<smem>>
      %cst_36 = arith.constant 0.000000e+00 : f32
      %c0_37 = arith.constant 0 : index
      %c1_38 = arith.constant 1 : index
      %72 = memref.load %arg7[%c0_37, %c1_38] : memref<1x2xf32, #tpu.memory_space<smem>>
      memref.store %cst_36, %arg7[%c0_37, %c1_38] : memref<1x2xf32, #tpu.memory_space<smem>>
    } else {
    }
    %c0 = arith.constant 0 : index
    %c0_1 = arith.constant 0 : index
    %3 = vector.load %arg1[%c0, %c0_1] : memref<256x1xi32, #tpu.memory_space<vmem>>, vector<256x1xi32>
    %c0_2 = arith.constant 0 : index
    %c0_3 = arith.constant 0 : index
    %4 = vector.load %arg2[%c0_2, %c0_3] : memref<256x1xi32, #tpu.memory_space<vmem>>, vector<256x1xi32>
    %5 = tpu.iota {dimensions = array<i32: 1>} : vector<256x512xi32>
    %6 = vector.broadcast %3 : vector<256x1xi32> to vector<256x512xi32>
    %7 = arith.cmpi eq, %5, %6 : vector<256x512xi32>
    %8 = arith.extui %7 : vector<256x512xi1> to vector<256x512xi32>
    %9 = arith.sitofp %8 : vector<256x512xi32> to vector<256x512xf32>
    %10 = arith.truncf %9 : vector<256x512xf32> to vector<256x512xbf16>
    %c0_4 = arith.constant 0 : index
    %c0_5 = arith.constant 0 : index
    %11 = vector.load %arg3[%c0_4, %c0_5] : memref<512x128xbf16, #tpu.memory_space<vmem>>, vector<512x128xbf16>
    %cst = arith.constant dense<0.000000e+00> : vector<256x128xf32>
    %12 = tpu.matmul %10, %11, %cst {dimension_numbers = #tpu.dot_dimension_numbers<[1], [0], [0], [1], [0, 0, 1, 1], [], []>} : vector<256x512xbf16>, vector<512x128xbf16>, vector<256x128xf32> -> vector<256x128xf32>
    %13 = arith.truncf %12 : vector<256x128xf32> to vector<256x128xbf16>
    %c0_6 = arith.constant 0 : index
    %c0_7 = arith.constant 0 : index
    %14 = vector.load %arg4[%c0_6, %c0_7] : memref<128x128xbf16, #tpu.memory_space<vmem>>, vector<128x128xbf16>
    %cst_8 = arith.constant dense<0.000000e+00> : vector<256x128xf32>
    %15 = tpu.matmul %13, %14, %cst_8 {dimension_numbers = #tpu.dot_dimension_numbers<[1], [0], [0], [1], [0, 0, 1, 1], [], []>} : vector<256x128xbf16>, vector<128x128xbf16>, vector<256x128xf32> -> vector<256x128xf32>
    %16 = arith.mulf %15, %15 : vector<256x128xf32>
    %17 = arith.mulf %15, %16 : vector<256x128xf32>
    %cst_9 = arith.constant 4.471500e-02 : f32
    %18 = vector.broadcast %cst_9 : f32 to vector<256x128xf32>
    %19 = arith.mulf %18, %17 : vector<256x128xf32>
    %20 = arith.addf %15, %19 : vector<256x128xf32>
    %cst_10 = arith.constant 0.797884583 : f32
    %21 = vector.broadcast %cst_10 : f32 to vector<256x128xf32>
    %22 = arith.mulf %21, %20 : vector<256x128xf32>
    %23 = math.tanh %22 : vector<256x128xf32>
    %cst_11 = arith.constant 1.000000e+00 : f32
    %24 = vector.broadcast %cst_11 : f32 to vector<256x128xf32>
    %25 = arith.addf %24, %23 : vector<256x128xf32>
    %cst_12 = arith.constant 5.000000e-01 : f32
    %26 = vector.broadcast %cst_12 : f32 to vector<256x128xf32>
    %27 = arith.mulf %26, %25 : vector<256x128xf32>
    %28 = arith.mulf %15, %27 : vector<256x128xf32>
    %29 = arith.truncf %28 : vector<256x128xf32> to vector<256x128xbf16>
    %c0_13 = arith.constant 0 : index
    %c0_14 = arith.constant 0 : index
    %30 = vector.load %arg5[%c0_13, %c0_14] : memref<128x512xbf16, #tpu.memory_space<vmem>>, vector<128x512xbf16>
    %cst_15 = arith.constant dense<0.000000e+00> : vector<256x512xf32>
    %31 = tpu.matmul %29, %30, %cst_15 {dimension_numbers = #tpu.dot_dimension_numbers<[1], [0], [0], [1], [0, 0, 1, 1], [], []>} : vector<256x128xbf16>, vector<128x512xbf16>, vector<256x512xf32> -> vector<256x512xf32>
    %c0_16 = arith.constant 0 : index
    %c0_17 = arith.constant 0 : index
    %32 = vector.load %arg6[%c0_16, %c0_17] : memref<1x512xf32, #tpu.memory_space<vmem>>, vector<1x512xf32>
    %33 = vector.broadcast %32 : vector<1x512xf32> to vector<256x512xf32>
    %34 = arith.addf %31, %33 : vector<256x512xf32>
    %cst_18 = arith.constant dense<0xFF800000> : vector<256xf32>
    %35 = vector.multi_reduction <maximumf>, %34, %cst_18 [1] : vector<256x512xf32> to vector<256xf32>
    %36 = vector.shape_cast %35 : vector<256xf32> to vector<256x1xf32>
    %37 = vector.broadcast %36 : vector<256x1xf32> to vector<256x512xf32>
    %38 = arith.subf %34, %37 : vector<256x512xf32>
    %39 = math.exp %38 : vector<256x512xf32>
    %cst_19 = arith.constant dense<0.000000e+00> : vector<256xf32>
    %40 = vector.multi_reduction <add>, %39, %cst_19 [1] : vector<256x512xf32> to vector<256xf32>
    %41 = vector.shape_cast %40 : vector<256xf32> to vector<256x1xf32>
    %42 = math.log %41 : vector<256x1xf32>
    %43 = arith.addf %36, %42 : vector<256x1xf32>
    %44 = vector.broadcast %4 : vector<256x1xi32> to vector<256x512xi32>
    %45 = arith.cmpi eq, %5, %44 : vector<256x512xi32>
    %cst_20 = arith.constant 0.000000e+00 : f32
    %46 = vector.broadcast %cst_20 : f32 to vector<256x512xf32>
    %47 = arith.select %45, %34, %46 : vector<256x512xi1>, vector<256x512xf32>
    %cst_21 = arith.constant dense<0.000000e+00> : vector<256xf32>
    %48 = vector.multi_reduction <add>, %47, %cst_21 [1] : vector<256x512xf32> to vector<256xf32>
    %49 = vector.shape_cast %48 : vector<256xf32> to vector<256x1xf32>
    %c0_i32_22 = arith.constant 0 : i32
    %50 = vector.broadcast %c0_i32_22 : i32 to vector<256x1xi32>
    %51 = arith.cmpi sge, %4, %50 : vector<256x1xi32>
    %52 = arith.subf %43, %49 : vector<256x1xf32>
    %cst_23 = arith.constant 0.000000e+00 : f32
    %53 = vector.broadcast %cst_23 : f32 to vector<256x1xf32>
    %54 = arith.select %51, %52, %53 : vector<256x1xi1>, vector<256x1xf32>
    %c0_24 = arith.constant 0 : index
    %c0_25 = arith.constant 0 : index
    %55 = memref.load %arg7[%c0_24, %c0_25] : memref<1x2xf32, #tpu.memory_space<smem>>
    %56 = vector.shape_cast %54 : vector<256x1xf32> to vector<1x256x1xf32>
    %cst_26 = arith.constant dense<0.000000e+00> : vector<1xf32>
    %57 = vector.multi_reduction <add>, %56, %cst_26 [1, 2] : vector<1x256x1xf32> to vector<1xf32>
    %58 = vector.shape_cast %57 : vector<1xf32> to vector<1x1x1xf32>
    %59 = vector.extract %58[0, 0, 0] : f32 from vector<1x1x1xf32>
    %60 = arith.addf %55, %59 : f32
    %c0_27 = arith.constant 0 : index
    %c0_28 = arith.constant 0 : index
    %61 = memref.load %arg7[%c0_27, %c0_28] : memref<1x2xf32, #tpu.memory_space<smem>>
    memref.store %60, %arg7[%c0_27, %c0_28] : memref<1x2xf32, #tpu.memory_space<smem>>
    %c0_29 = arith.constant 0 : index
    %c1 = arith.constant 1 : index
    %62 = memref.load %arg7[%c0_29, %c1] : memref<1x2xf32, #tpu.memory_space<smem>>
    %63 = arith.extui %51 : vector<256x1xi1> to vector<256x1xi32>
    %64 = arith.sitofp %63 : vector<256x1xi32> to vector<256x1xf32>
    %65 = vector.shape_cast %64 : vector<256x1xf32> to vector<1x256x1xf32>
    %cst_30 = arith.constant dense<0.000000e+00> : vector<1xf32>
    %66 = vector.multi_reduction <add>, %65, %cst_30 [1, 2] : vector<1x256x1xf32> to vector<1xf32>
    %67 = vector.shape_cast %66 : vector<1xf32> to vector<1x1x1xf32>
    %68 = vector.extract %67[0, 0, 0] : f32 from vector<1x1x1xf32>
    %69 = arith.addf %62, %68 : f32
    %c0_31 = arith.constant 0 : index
    %c1_32 = arith.constant 1 : index
    %70 = memref.load %arg7[%c0_31, %c1_32] : memref<1x2xf32, #tpu.memory_space<smem>>
    memref.store %69, %arg7[%c0_31, %c1_32] : memref<1x2xf32, #tpu.memory_space<smem>>
    return
  }
  func.func @transform_0(%arg0: i32) -> (i32, i32) {
    %c0_i32 = arith.constant 0 : i32
    %c0_i32_0 = arith.constant 0 : i32
    return %arg0, %c0_i32 : i32, i32
  }
  func.func @transform_1(%arg0: i32) -> (i32, i32) {
    %c0_i32 = arith.constant 0 : i32
    %c0_i32_0 = arith.constant 0 : i32
    return %arg0, %c0_i32 : i32, i32
  }
  func.func @transform_2(%arg0: i32) -> (i32, i32) {
    %c0_i32 = arith.constant 0 : i32
    %c0_i32_0 = arith.constant 0 : i32
    %c0_i32_1 = arith.constant 0 : i32
    return %c0_i32, %c0_i32_0 : i32, i32
  }
  func.func @transform_3(%arg0: i32) -> (i32, i32) {
    %c0_i32 = arith.constant 0 : i32
    %c0_i32_0 = arith.constant 0 : i32
    %c0_i32_1 = arith.constant 0 : i32
    return %c0_i32, %c0_i32_0 : i32, i32
  }
  func.func @transform_4(%arg0: i32) -> (i32, i32) {
    %c0_i32 = arith.constant 0 : i32
    %c0_i32_0 = arith.constant 0 : i32
    %c0_i32_1 = arith.constant 0 : i32
    return %c0_i32, %c0_i32_0 : i32, i32
  }
  func.func @transform_5(%arg0: i32) -> (i32, i32) {
    %c0_i32 = arith.constant 0 : i32
    %c0_i32_0 = arith.constant 0 : i32
    %c0_i32_1 = arith.constant 0 : i32
    return %c0_i32, %c0_i32_0 : i32, i32
  }
  func.func @transform_6(%arg0: i32) -> (i32, i32) {
    %c0_i32 = arith.constant 0 : i32
    %c0_i32_0 = arith.constant 0 : i32
    %c0_i32_1 = arith.constant 0 : i32
    return %c0_i32, %c0_i32_0 : i32, i32
  }
}

</mosaic_0001>

<bundles_post_ra>
// kernel: _masked_lm_loss.1
= control target key start
LH: loop header
LB: loop body
LE: loop exit
PB: predicated region body
PF: predicated region fallthrough
CT: control target
= control target key end

     0   :  { %11 = vsyncpa [#allocation3], 0  ;;  %s8195_s0 = inlined_call_operand.vmem [shape: s32[256,1], index: 0, kind: input, shape index: {}]   ;;  %s8196_s1 = inlined_call_operand.vmem [shape: s32[256,1], index: 1, kind: input, shape index: {}]   ;;  %s8197_s2 = inlined_call_operand.vmem [shape: bf16[512,128], index: 2, kind: input, shape index: {}]   ;;  %s8198_s3 = inlined_call_operand.hbm [shape: bf16[128,128], index: 3, kind: input, shape index: {}]   ;;  %s8199_s4 = inlined_call_operand.vmem [shape: bf16[128,512], index: 4, kind: input, shape index: {}]   ;;  %s8200_s5 = inlined_call_operand.vmem [shape: f32[1,512], index: 5, kind: input, shape index: {}]   ;;  %s8201_s6 = inlined_call_operand.vmem [shape: f32[1,2], index: 6, kind: output, shape index: {}]  }
   0x1   :  { %12 = vsyncpa [#allocation4], 0  ;;  %s23_s23 = sshll.u32 %s8198_s3, 4  ;;  %s5059_s24 = smov [#allocation2]   ;;  %s24_s23 = int_to_ptr.hbm [resolvable:$true] %s23_s23 }
   0x2   :  { %s25_s25 = sshll.u32 %s5059_s24, 4  ;;  %s5060_s26 = smov 64   ;;  %s26_s25 = int_to_ptr.vmem [resolvable:$true] %s25_s25 }
   0x3   :  { %s5061_s27 = smov 4  }
   0x4   :  { %31 = dma.hbm_to_vmem [thread:$0]  %s24_s23, 1024, %s26_s25, [#allocation3], %s5060_s26, %s5060_s26, %s5061_s27  }
   0x5   :  { %5055 = dma.done.wait [#allocation3], 1024  }
   0x6   :  { %5056 = vsyncadd [#allocation3], 4294966272  ;;  %v5062_v0 = vmov 0   ;;  %v72_v1 = vld [vmem:[%s8195_s0 + $0xc0] sm:$0xff]  ;;  %v73_v4 = vld [vmem:[%s8195_s0 + $0xc8] sm:$0xff]  ;;  %v8229_v28 = vmov 0.0  }
   0x7   :  { %4632 = vset.pattern.permute.xlu2 %v5062_v0  ;;  %4631 = vset.pattern.permute.xlu1 %v5062_v0  ;;  %v64_v2 = vld [vmem:[%s8195_s0 + $0x80] sm:$0xff]  ;;  %v65_v5 = vld [vmem:[%s8195_s0 + $0x88] sm:$0xff]  ;;  %v67_v7 = vld [vmem:[%s8195_s0 + $0x98] sm:$0xff]  ;;  %vm8234_vm1 = vcmask 7168   ;;  %s5065_s16 = smov [#allocation5]  }
   0x8   :  { %4630 = vset.pattern.permute.xlu0 %v5062_v0  ;;  %v56_v3 = vld [vmem:[%s8195_s0 + $0x40] sm:$0xff]  ;;  %190 = vperm.xlu1 %4631, %v72_v1   ;;  %v57_v6 = vld [vmem:[%s8195_s0 + $0x48] sm:$0xff]  ;;  %v66_v8 = vld [vmem:[%s8195_s0 + $0x90] sm:$0xff] }
   0x9   :  { %166 = vperm.xlu0 %4630, %v64_v2   ;;  %142 = vperm.xlu2 %4632, %v56_v3   ;;  %v74_v9 = vld [vmem:[%s8195_s0 + $0xd0] sm:$0xff]  ;;  %v75_v10 = vld [vmem:[%s8195_s0 + $0xd8] sm:$0xff]  ;;  %v68_v13 = vld [vmem:[%s8195_s0 + $0xa0] sm:$0xff] }
   0xa   :  { %v58_v11 = vld [vmem:[%s8195_s0 + $0x50] sm:$0xff]  ;;  %v59_v12 = vld [vmem:[%s8195_s0 + $0x58] sm:$0xff]  ;;  %v69_v14 = vld [vmem:[%s8195_s0 + $0xa8] sm:$0xff] }
   0xb   :  { %v76_v15 = vld [vmem:[%s8195_s0 + $0xe0] sm:$0xff]  ;;  %v77_v16 = vld [vmem:[%s8195_s0 + $0xe8] sm:$0xff]  ;;  %v70_v19 = vld [vmem:[%s8195_s0 + $0xb0] sm:$0xff] }
   0xc   :  { %v60_v17 = vld [vmem:[%s8195_s0 + $0x60] sm:$0xff]  ;;  %v61_v18 = vld [vmem:[%s8195_s0 + $0x68] sm:$0xff]  ;;  %v71_v20 = vld [vmem:[%s8195_s0 + $0xb8] sm:$0xff] }
   0xd   :  { %v78_v21 = vld [vmem:[%s8195_s0 + $0xf0] sm:$0xff]  ;;  %v4529_v22 = vld [vmem:[%s8197_s2 + $0x38] sm:$0xff]  ;;  %v5176_v24 = vld [vmem:[%s8196_s1] sm:$0xff] }
   0xe   :  { %4594 = vmatpush.bf16.msra.mxu1 %v4529_v22  ;;  %v4528_v23 = vld [vmem:[%s8197_s2 + $0x30] sm:$0xff]  ;;  %4595 = vmatpush.bf16.msra.mxu2 %v4529_v22  ;;  %8386 = vst [vmem:[#allocation8_spill] sm:$0xff] %v5176_v24  ;;  %v79_v25 = vld [vmem:[%s8195_s0 + $0xf8] sm:$0xff]  ;;  %vm8235_vm0 = vcmp.ge.s32.totalorder %v5176_v24, 0  ;;  %v5194_v30 = vld [vmem:[%s8196_s1 + $0x8] sm:$0xff] }
   0xf   :  { %4596 = vmatpush.bf16.msra.mxu3 %v4529_v22  ;;  %917 = vmatpush.bf16.msra.mxu0 %v4529_v22  ;;  %v62_v26 = vld [vmem:[%s8195_s0 + $0x70] sm:$0xff]  ;;  %v63_v27 = vld [vmem:[%s8195_s0 + $0x78] sm:$0xff]  ;;  %v4490_v29 = vsel %vm8235_vm0, 1.0, %v8229_v28  ;;  %8387 = vst [vmem:[#allocation9_spill] sm:$0xff] %v5194_v30  ;;  %vm8232_vm2 = vcmp.ge.s32.totalorder %v5194_v30, 0  ;;  %v4527_v33 = vld [vmem:[%s8197_s2 + $0x28] sm:$0xff] }
  0x10   :  { %193 = vperm.xlu1 %4631, %v73_v4   ;;  %v3854_v31 = vsel %vm8234_vm1, %v4490_v29, 0.0  ;;  %v5200_v32 = vld [vmem:[%s8196_s1 + $0x10] sm:$0xff]  ;;  %v4491_v34 = vsel %vm8232_vm2, 1.0, %v8229_v28  ;;  %v4526_v37 = vld [vmem:[%s8197_s2 + $0x20] sm:$0xff]  ;;  %v49_v39 = vld [vmem:[%s8195_s0 + $0x8] sm:$0xff] }
  0x11   :  { %169 = vperm.xlu0 %4630, %v65_v5   ;;  %145 = vperm.xlu2 %4632, %v57_v6   ;;  %8388 = vst [vmem:[#allocation10_spill] sm:$0xff] %v5200_v32  ;;  %vm8231_vm3 = vcmp.ge.s32.totalorder %v5200_v32, 0  ;;  %v3855_v36 = vsel %vm8234_vm1, %v4491_v34, 0.0  ;;  %v48_v40 = vld [vmem:[%s8195_s0] sm:$0xff]  ;;  %v50_v41 = vld [vmem:[%s8195_s0 + $0x10] sm:$0xff]  ;;  %v5239_v45 = vld [vmem:[%s8196_s1 + $0x18] sm:$0xff] }
  0x12   :  { %4597 = vmatpush.bf16.msra.mxu1 %v4528_v23  ;;  %4598 = vmatpush.bf16.msra.mxu2 %v4528_v23  ;;  %v4492_v35 = vsel %vm8231_vm3, 1.0, %v8229_v28  ;;  %v3856_v38 = vadd.f32 %v3855_v36, %v3854_v31  ;;  %v5229_v42 = vld [vmem:[%s8196_s1 + $0x20] sm:$0xff]  ;;  %8390 = vst [vmem:[#allocation12_spill] sm:$0xff] %v5239_v45  ;;  %v5244_v46 = vld [vmem:[%s8196_s1 + $0x28] sm:$0xff]  ;;  %vm8228_vm5 = vcmp.ge.s32.totalorder %v5239_v45, 0  ;;  %v4525_v48 = vld [vmem:[%s8197_s2 + $0x18] sm:$0xff] }
  0x13   :  { %4599 = vmatpush.bf16.msra.mxu3 %v4528_v23  ;;  %918 = vmatpush.bf16.msra.mxu0 %v4528_v23  ;;  %8389 = vst [vmem:[#allocation11_spill] sm:$0xff] %v5229_v42  ;;  %v3857_v43 = vsel %vm8234_vm1, %v4492_v35, 0.0  ;;  %vm8227_vm4 = vcmp.ge.s32.totalorder %v5229_v42, 0  ;;  %vm8226_vm6 = vcmp.ge.s32.totalorder %v5244_v46, 0  ;;  %v4493_v49 = vsel %vm8228_vm5, 1.0, %v8229_v28  ;;  %v4524_v53 = vld [vmem:[%s8197_s2 + $0x10] sm:$0xff] }
  0x14   :  { %v4494_v44 = vsel %vm8227_vm4, 1.0, %v8229_v28  ;;  %8391 = vst [vmem:[#allocation13_spill] sm:$0xff] %v5244_v46  ;;  %v3858_v47 = vadd.f32 %v3857_v43, %v3856_v38  ;;  %v4495_v51 = vsel %vm8226_vm6, 1.0, %v8229_v28  ;;  %v3859_v52 = vsel %vm8234_vm1, %v4493_v49, 0.0  ;;  %v52_v55 = vld [vmem:[%s8195_s0 + $0x20] sm:$0xff]  ;;  %v51_v56 = vld [vmem:[%s8195_s0 + $0x18] sm:$0xff] }
  0x15   :  { %v3861_v50 = vsel %vm8234_vm1, %v4494_v44, 0.0  ;;  %v53_v57 = vld [vmem:[%s8195_s0 + $0x28] sm:$0xff]  ;;  %v5274_v58 = vld [vmem:[%s8196_s1 + $0x38] sm:$0xff]  ;;  %v3863_v59 = vsel %vm8234_vm1, %v4495_v51, 0.0  ;;  %v5284_v62 = vld [vmem:[%s8196_s1 + $0x30] sm:$0xff] }
  0x16   :  { %4600 = vmatpush.bf16.msra.mxu1 %v4527_v33  ;;  %4601 = vmatpush.bf16.msra.mxu2 %v4527_v33  ;;  %v3860_v54 = vadd.f32 %v3859_v52, %v3858_v47  ;;  %8392 = vst [vmem:[#allocation14_spill] sm:$0xff] %v5274_v58  ;;  %vm8223_vm7 = vcmp.ge.s32.totalorder %v5274_v58, 0  ;;  %v5289_v63 = vld [vmem:[%s8196_s1 + $0x40] sm:$0xff]  ;;  %vm8224_vm8 = vcmp.ge.s32.totalorder %v5284_v62, 0  ;;  %v4523_v1 = vld [vmem:[%s8197_s2 + $0x8] sm:$0xff]  ;;  %v5365_v29 = vld [vmem:[%s8196_s1 + $0x70] sm:$0xff] }
  0x17   :  { %4602 = vmatpush.bf16.msra.mxu3 %v4527_v33  ;;  %919 = vmatpush.bf16.msra.mxu0 %v4527_v33  ;;  %v4497_v61 = vsel %vm8223_vm7, 1.0, %v8229_v28  ;;  %8393 = vst [vmem:[#allocation15_spill] sm:$0xff] %v5284_v62  ;;  %vm8222_vm9 = vcmp.ge.s32.totalorder %v5289_v63, 0  ;;  %v4496_v2 = vsel %vm8224_vm8, 1.0, %v8229_v28  ;;  %v4522_v6 = vld [vmem:[%s8197_s2] sm:$0xff]  ;;  %v5347_v22 = vld [vmem:[%s8196_s1 + $0x68] sm:$0xff]  ;;  %v112_v33 = vlaneseq }
  0x18   :  { %175 = vperm.xlu1 %4631, %v67_v7   ;;  %v3862_v60 = vadd.f32 %v3861_v50, %v3860_v54  ;;  %8394 = vst [vmem:[#allocation16_spill] sm:$0xff] %v5289_v63  ;;  %v3867_v3 = vsel %vm8234_vm1, %v4497_v61, 0.0  ;;  %v4498_v4 = vsel %vm8222_vm9, 1.0, %v8229_v28  ;;  %v3865_v5 = vsel %vm8234_vm1, %v4496_v2, 0.0  ;;  %v4545_v47 = vld [vmem:[%s8197_s2 + $0xb8] sm:$0xff]  ;;  %v5408_v51 = vld [vmem:[%s8196_s1 + $0x88] sm:$0xff] }
  0x19   :  { %172 = vperm.xlu0 %4630, %v66_v8   ;;  %196 = vperm.xlu2 %4632, %v74_v9   ;;  %v55_v8 = vld [vmem:[%s8195_s0 + $0x38] sm:$0xff]  ;;  %v54_v9 = vld [vmem:[%s8195_s0 + $0x30] sm:$0xff]  ;;  %8398 = vst [vmem:[#allocation20_spill] sm:$0xff] %v5347_v22  ;;  %vm8203_vm13 = vcmp.ge.s32.totalorder %v5347_v22, 0  ;;  %vm8202_vm15 = vcmp.ge.s32.totalorder %v5365_v29, 0 }
  0x1a   :  { %4603 = vmatpush.bf16.msra.mxu1 %v4526_v37  ;;  %4604 = vmatpush.bf16.msra.mxu2 %v4526_v37  ;;  %v3864_v0 = vadd.f32 %v3863_v59, %v3862_v60  ;;  %8400 = vst [vmem:[#allocation22_spill] sm:$0xff] %v5365_v29  ;;  %v5402_v50 = vld [vmem:[%s8196_s1 + $0x78] sm:$0xff]  ;;  %v4544_v60 = vld [vmem:[%s8197_s2 + $0xb0] sm:$0xff] }
  0x1b   :  { %4605 = vmatpush.bf16.msra.mxu3 %v4526_v37  ;;  %920 = vmatpush.bf16.msra.mxu0 %v4526_v37  ;;  %v4504_v37 = vsel %vm8202_vm15, 1.0, %v8229_v28  ;;  %8402 = vst [vmem:[#allocation24_spill] sm:$0xff] %v5402_v50  ;;  %v4552_v61 = vld [vmem:[%s8197_s2 + $0xf0] sm:$0xff]  ;;  %v5439_v2 = vld [vmem:[%s8196_s1 + $0x98] sm:$0xff] }
  0x1c   :  { %v3866_v7 = vadd.f32 %v3865_v5, %v3864_v0  ;;  %v3881_v43 = vsel %vm8234_vm1, %v4504_v37, 0.0  ;;  %8403 = vst [vmem:[#allocation25_spill] sm:$0xff] %v5408_v51 }
  0x1d   :  { %8404 = vst [vmem:[#allocation26_spill] sm:$0xff] %v5439_v2 }
  0x1e   :  { %4606 = vmatpush.bf16.msra.mxu1 %v4525_v48  ;;  %4607 = vmatpush.bf16.msra.mxu2 %v4525_v48 }
  0x1f   :  { %4608 = vmatpush.bf16.msra.mxu3 %v4525_v48  ;;  %921 = vmatpush.bf16.msra.mxu0 %v4525_v48  ;;  %v4553_v48 = vld [vmem:[%s8197_s2 + $0xf8] sm:$0xff] }
  0x20   :  { %148 = vperm.xlu1 %4631, %v58_v11   ;;  %v3869_v11 = vsel %vm8234_vm1, %v4498_v4, 0.0 }
  0x21   :  { %199 = vperm.xlu0 %4630, %v75_v10   ;;  %151 = vperm.xlu2 %4632, %v59_v12   ;;  %v5316_v10 = vld [vmem:[%s8196_s1 + $0x50] sm:$0xff]  ;;  %v3868_v12 = vadd.f32 %v3867_v3, %v3866_v7  ;;  %v5457_v7 = vld [vmem:[%s8196_s1 + $0xa0] sm:$0xff] }
  0x22   :  { %4609 = vmatpush.bf16.msra.mxu1 %v4524_v53  ;;  %4610 = vmatpush.bf16.msra.mxu2 %v4524_v53  ;;  %8395 = vst [vmem:[#allocation17_spill] sm:$0xff] %v5316_v10  ;;  %vm8215_vm10 = vcmp.ge.s32.totalorder %v5316_v10, 0 }
  0x23   :  { %4611 = vmatpush.bf16.msra.mxu3 %v4524_v53  ;;  %922 = vmatpush.bf16.msra.mxu0 %v4524_v53  ;;  %v4537_v53 = vld [vmem:[%s8197_s2 + $0x78] sm:$0xff]  ;;  %8406 = vst [vmem:[#allocation28_spill] sm:$0xff] %v5457_v7 }
  0x26   :  { %4612 = vmatpush.bf16.msra.mxu1 %v4523_v1  ;;  %4613 = vmatpush.bf16.msra.mxu2 %v4523_v1 }
  0x27   :  { %4614 = vmatpush.bf16.msra.mxu3 %v4523_v1  ;;  %923 = vmatpush.bf16.msra.mxu0 %v4523_v1  ;;  %v8238_v1 = vmov 1.0|1.0  }
  0x28   :  { %181 = vperm.xlu1 %4631, %v69_v14   ;;  %v5326_v14 = vld [vmem:[%s8196_s1 + $0x48] sm:$0xff] }
  0x29   :  { %178 = vperm.xlu0 %4630, %v68_v13   ;;  %202 = vperm.xlu2 %4632, %v76_v15   ;;  %v4500_v13 = vsel %vm8215_vm10, 1.0, %v8229_v28  ;;  %8396 = vst [vmem:[#allocation18_spill] sm:$0xff] %v5326_v14  ;;  %v5332_v15 = vld [vmem:[%s8196_s1 + $0x58] sm:$0xff]  ;;  %vm8216_vm11 = vcmp.ge.s32.totalorder %v5326_v14, 0 }
  0x2a   :  { %4615 = vmatpush.bf16.msra.mxu1 %v4522_v6  ;;  %4616 = vmatpush.bf16.msra.mxu2 %v4522_v6  ;;  %8397 = vst [vmem:[#allocation19_spill] sm:$0xff] %v5332_v15  ;;  %vm8207_vm12 = vcmp.ge.s32.totalorder %v5332_v15, 0 }
  0x2b   :  { %4617 = vmatpush.bf16.msra.mxu3 %v4522_v6  ;;  %924 = vmatpush.bf16.msra.mxu0 %v4522_v6  ;;  %v5451_v6 = vld [vmem:[%s8196_s1 + $0x90] sm:$0xff] }
  0x2c   :  { %8405 = vst [vmem:[#allocation27_spill] sm:$0xff] %v5451_v6 }
  0x2e   :  { %1095 = vmatpush.bf16.msrb.mxu2 %v4545_v47  ;;  %1006 = vmatpush.bf16.msrb.mxu1 %v4537_v53  ;;  %v4542_v47 = vld [vmem:[%s8197_s2 + $0xa0] sm:$0xff] }
  0x2f   :  { %1184 = vmatpush.bf16.msrb.mxu3 %v4553_v48  ;;  %v4550_v48 = vld [vmem:[%s8197_s2 + $0xe0] sm:$0xff] }
  0x30   :  { %154 = vperm.xlu1 %4631, %v60_v17   ;;  %v4499_v17 = vsel %vm8216_vm11, 1.0, %v8229_v28 }
  0x31   :  { %205 = vperm.xlu0 %4630, %v77_v16   ;;  %157 = vperm.xlu2 %4632, %v61_v18   ;;  %v3870_v16 = vadd.f32 %v3869_v11, %v3868_v12  ;;  %v3873_v18 = vsel %vm8234_vm1, %v4500_v13, 0.0 }
  0x32   :  { %1096 = vmatpush.bf16.msrb.mxu2 %v4544_v60 }
  0x33   :  { %1185 = vmatpush.bf16.msrb.mxu3 %v4552_v61 }
  0x38   :  { %187 = vperm.xlu1 %4631, %v71_v20   ;;  %v3871_v20 = vsel %vm8234_vm1, %v4499_v17, 0.0 }
  0x39   :  { %184 = vperm.xlu0 %4630, %v70_v19   ;;  %208 = vperm.xlu2 %4632, %v78_v21   ;;  %v4501_v19 = vsel %vm8207_vm12, 1.0, %v8229_v28  ;;  %v3872_v21 = vadd.f32 %v3871_v20, %v3870_v16 }
  0x3a   :  { %v3875_v23 = vsel %vm8234_vm1, %v4501_v19, 0.0 }
  0x40   :  { %160 = vperm.xlu1 %4631, %v62_v26   ;;  %v4503_v26 = vsel %vm8203_vm13, 1.0, %v8229_v28  ;;  %vm8206_vm13 = vcmp.ge.s32.totalorder %v5402_v50, 0 }
  0x41   :  { %211 = vperm.xlu0 %4630, %v79_v25   ;;  %163 = vperm.xlu2 %4632, %v63_v27   ;;  %v3874_v25 = vadd.f32 %v3873_v18, %v3872_v21  ;;  %v5359_v27 = vld [vmem:[%s8196_s1 + $0x60] sm:$0xff]  ;;  %v3879_v36 = vsel %vm8234_vm1, %v4503_v26, 0.0  ;;  %v4505_v54 = vsel %vm8206_vm13, 1.0, %v8229_v28  ;;  %v5475_v18 = vld [vmem:[%s8196_s1 + $0xb0] sm:$0xff]  ;;  %v4543_v21 = vld [vmem:[%s8197_s2 + $0xa8] sm:$0xff] }
  0x42   :  { %8399 = vst [vmem:[#allocation21_spill] sm:$0xff] %v5359_v27  ;;  %vm8205_vm14 = vcmp.ge.s32.totalorder %v5359_v27, 0  ;;  %v3883_v59 = vsel %vm8234_vm1, %v4505_v54, 0.0  ;;  %v5493_v26 = vld [vmem:[%s8196_s1 + $0xa8] sm:$0xff]  ;;  %1097 = vmatpush.bf16.msrb.mxu2 %v4543_v21 }
  0x43   :  { %v3876_v31 = vadd.f32 %v3875_v23, %v3874_v25  ;;  %v4502_v34 = vsel %vm8205_vm14, 1.0, %v8229_v28  ;;  %vm8208_vm14 = vcmp.ge.s32.totalorder %v5408_v51, 0  ;;  %8407 = vst [vmem:[#allocation29_spill] sm:$0xff] %v5475_v18  ;;  %v4551_v23 = vld [vmem:[%s8197_s2 + $0xe8] sm:$0xff] }
  0x44   :  { %v3877_v38 = vsel %vm8234_vm1, %v4502_v34, 0.0  ;;  %8408 = vst [vmem:[#allocation30_spill] sm:$0xff] %v5493_v26  ;;  %v4535_v34 = vld [vmem:[%s8197_s2 + $0x68] sm:$0xff]  ;;  %1186 = vmatpush.bf16.msrb.mxu3 %v4551_v23 }
  0x46   :  { %1098 = vmatpush.bf16.msrb.mxu2 %v4542_v47 }
  0x48   :  { %121 = vperm.xlu1 %4631, %v49_v39   ;;  %v3878_v39 = vadd.f32 %v3877_v38, %v3876_v31  ;;  %v5499_v31 = vld [vmem:[%s8196_s1 + $0xb8] sm:$0xff]  ;;  %1187 = vmatpush.bf16.msrb.mxu3 %v4550_v48 }
  0x49   :  { %118 = vperm.xlu0 %4630, %v48_v40   ;;  %124 = vperm.xlu2 %4632, %v50_v41   ;;  %v5379_v40 = vand.u32 127, %v112_v33  ;;  %v5384_v41 = vld [vmem:[%s8196_s1 + $0x80] sm:$0xff]  ;;  %8409 = vst [vmem:[#allocation31_spill] sm:$0xff] %v5499_v31 }
  0x4a   :  { %8401 = vst [vmem:[#allocation23_spill] sm:$0xff] %v5384_v41  ;;  %v3880_v44 = vadd.f32 %v3879_v36, %v3878_v39  ;;  %vm8204_vm15 = vcmp.ge.s32.totalorder %v5384_v41, 0 }
  0x4b   :  { %v4506_v49 = vsel %vm8204_vm15, 1.0, %v8229_v28 }
  0x4c   :  { %v3882_v52 = vadd.f32 %v3881_v43, %v3880_v44 }
  0x4e   :  { %v3884_v0 = vadd.f32 %v3883_v59, %v3882_v52  ;;  %v4534_v59 = vld [vmem:[%s8197_s2 + $0x60] sm:$0xff] }
  0x50   :  { %130 = vperm.xlu1 %4631, %v52_v55  }
  0x51   :  { %127 = vperm.xlu0 %4630, %v51_v56   ;;  %133 = vperm.xlu2 %4632, %v53_v57   ;;  %v3885_v56 = vsel %vm8234_vm1, %v4506_v49, 0.0  ;;  %v4507_v57 = vsel %vm8208_vm14, 1.0, %v8229_v28  ;;  %vm8213_vm14 = vcmp.ge.s32.totalorder %v5439_v2, 0 }
  0x52   :  { %v3887_v3 = vsel %vm8234_vm1, %v4507_v57, 0.0  ;;  %v3886_v4 = vadd.f32 %v3885_v56, %v3884_v0  ;;  %v4509_v5 = vsel %vm8213_vm14, 1.0, %v8229_v28  ;;  %v5532_v56 = vld [vmem:[%s8196_s1 + $0xc0] sm:$0xff] }
  0x53   :  { %v3891_v12 = vsel %vm8234_vm1, %v4509_v5, 0.0  ;;  %8410 = vst [vmem:[#allocation32_spill] sm:$0xff] %v5532_v56  ;;  %v5560_v5 = vld [vmem:[%s8196_s1 + $0xd0] sm:$0xff] }
  0x54   :  { %8411 = vst [vmem:[#allocation33_spill] sm:$0xff] %v5560_v5 }
  0x58   :  { %139 = vperm.xlu1 %4631, %v55_v8   ;;  %v3888_v8 = vadd.f32 %v3887_v3, %v3886_v4 }
  0x59   :  { %136 = vperm.xlu0 %4630, %v54_v9   ;;  %3105 = vperm.xlu2 %4632, %v5176_v24   ;;  %v4536_v9 = vld [vmem:[%s8197_s2 + $0x70] sm:$0xff] }
  0x5a   :  { %1007 = vmatpush.bf16.msrb.mxu1 %v4536_v9  ;;  %v4549_v9 = vld [vmem:[%s8197_s2 + $0xd8] sm:$0xff] }
  0x5b   :  { %1188 = vmatpush.bf16.msrb.mxu3 %v4549_v9 }
  0x5e   :  { %1008 = vmatpush.bf16.msrb.mxu1 %v4535_v34  ;;  %v4540_v34 = vld [vmem:[%s8197_s2 + $0x90] sm:$0xff] }
  0x60   :  { %3111 = vperm.xlu1 %4631, %v5200_v32  }
  0x61   :  { %3108 = vperm.xlu0 %4630, %v5194_v30   ;;  %3117 = vperm.xlu2 %4632, %v5229_v42  }
  0x62   :  { %1009 = vmatpush.bf16.msrb.mxu1 %v4534_v59 }
  0x63   :  { %v5372_v35 = vpop.permute.xlu2 %142 }
  0x64   :  { %vm245_vm15 = vcmp.eq.s32.totalorder %v5379_v40, %v5372_v35 }
  0x68   :  { %3120 = vperm.xlu1 %4631, %v5244_v46  }
  0x69   :  { %3114 = vperm.xlu0 %4630, %v5239_v45   ;;  %3126 = vperm.xlu2 %4632, %v5274_v58  }
  0x6b   :  { %v5420_v55 = vpop.permute.xlu2 %145 }
  0x6c   :  { %vm249_vm13 = vcmp.eq.s32.totalorder %v5379_v40, %v5420_v55 }
  0x6d   :  { %vm4209_vm12 = vmpackc.low %vm249_vm13, %vm245_vm15  ;;  %vm8209_vm13 = vcmp.ge.s32.totalorder %v5457_v7, 0  ;;  %vm8210_vm15 = vcmp.ge.s32.totalorder %v5475_v18, 0 }
  0x6e   :  { %4210 = vmatmul.msk.bf16.vlgmr.msra.gmra.mxu1 %vm4209_vm12, %v8238_v1  ;;  %vm8214_vm12 = vcmp.ge.s32.totalorder %v5451_v6, 0  ;;  %v4510_v13 = vsel %vm8209_vm13, 1.0, %v8229_v28  ;;  %v4512_v25 = vsel %vm8210_vm15, 1.0, %v8229_v28  ;;  %vm8212_vm13 = vcmp.ge.s32.totalorder %v5493_v26, 0 }
  0x6f   :  { %v4508_v11 = vsel %vm8214_vm12, 1.0, %v8229_v28  ;;  %v3893_v19 = vsel %vm8234_vm1, %v4510_v13, 0.0  ;;  %vm8211_vm15 = vcmp.ge.s32.totalorder %v5499_v31, 0  ;;  %v4511_v38 = vsel %vm8212_vm13, 1.0, %v8229_v28  ;;  %v5579_v13 = vld [vmem:[%s8196_s1 + $0xd8] sm:$0xff] }
  0x70   :  { %3129 = vperm.xlu1 %4631, %v5289_v63   ;;  %v3889_v16 = vsel %vm8234_vm1, %v4508_v11, 0.0  ;;  %v3897_v39 = vsel %vm8234_vm1, %v4512_v25, 0.0  ;;  %v4513_v43 = vsel %vm8211_vm15, 1.0, %v8229_v28  ;;  %v3895_v44 = vsel %vm8234_vm1, %v4511_v38, 0.0  ;;  %8412 = vst [vmem:[#allocation34_spill] sm:$0xff] %v5579_v13  ;;  %v4548_v38 = vld [vmem:[%s8197_s2 + $0xd0] sm:$0xff] }
  0x71   :  { %3123 = vperm.xlu0 %4630, %v5284_v62   ;;  %3135 = vperm.xlu2 %4632, %v5316_v10   ;;  %v3890_v17 = vadd.f32 %v3889_v16, %v3888_v8  ;;  %v3899_v53 = vsel %vm8234_vm1, %v4513_v43, 0.0  ;;  %vm8217_vm15 = vcmp.ge.s32.totalorder %v5532_v56, 0  ;;  %v4541_v8 = vld [vmem:[%s8197_s2 + $0x98] sm:$0xff]  ;;  %v5584_v16 = vld [vmem:[%s8196_s1 + $0xc8] sm:$0xff] }
  0x72   :  { %v4514_v0 = vsel %vm8217_vm15, 1.0, %v8229_v28  ;;  %8413 = vst [vmem:[#allocation35_spill] sm:$0xff] %v5584_v16  ;;  %1099 = vmatpush.bf16.msrb.mxu2 %v4541_v8  ;;  %1189 = vmatpush.bf16.msrb.mxu3 %v4548_v38  ;;  %v4538_v38 = vld [vmem:[%s8197_s2 + $0x80] sm:$0xff] }
  0x73   :  { %v3892_v20 = vadd.f32 %v3891_v12, %v3890_v17  ;;  %v5524_v52 = vpop.permute.xlu2 %196  ;;  %v3901_v3 = vsel %vm8234_vm1, %v4514_v0, 0.0  ;;  %v4533_v17 = vld [vmem:[%s8197_s2 + $0x58] sm:$0xff] }
  0x74   :  { %1010 = vmatpush.bf16.msrb.mxu1 %v4533_v17  ;;  %vm317_vm8 = vcmp.eq.s32.totalorder %v5379_v40, %v5524_v52  ;;  %v4539_v17 = vld [vmem:[%s8197_s2 + $0x88] sm:$0xff] }
  0x75   :  { %v3894_v33 = vadd.f32 %v3893_v19, %v3892_v20 }
  0x76   :  { %1100 = vmatpush.bf16.msrb.mxu2 %v4540_v34 }
  0x77   :  { %v3896_v49 = vadd.f32 %v3895_v44, %v3894_v33  ;;  %v5614_v44 = vld [vmem:[%s8196_s1 + $0xe8] sm:$0xff] }
  0x78   :  { %3138 = vperm.xlu1 %4631, %v5332_v15   ;;  %8414 = vst [vmem:[#allocation36_spill] sm:$0xff] %v5614_v44 }
  0x79   :  { %3132 = vperm.xlu0 %4630, %v5326_v14   ;;  %3144 = vperm.xlu2 %4632, %v5347_v22   ;;  %v3898_v54 = vadd.f32 %v3897_v39, %v3896_v49  ;;  %v5629_v49 = vld [vmem:[%s8196_s1 + $0xe0] sm:$0xff]  ;;  %v4589_v14 = vld [vmem:[%s8199_s4 + $0xd4] sm:$0xf0] }
  0x7a   :  { %v5505_v36 = vpop.permute.xlu1 %190  ;;  %8415 = vst [vmem:[#allocation37_spill] sm:$0xff] %v5629_v49  ;;  %1101 = vmatpush.bf16.msrb.mxu2 %v4539_v17  ;;  %v5731_v17 = vadd.s32 128, %v5379_v40 }
  0x7b   :  { %v5507_v37 = vpop.permute.xlu0 %166  ;;  %v3900_v57 = vadd.f32 %v3899_v53, %v3898_v54  ;;  %vm309_vm11 = vcmp.eq.s32.totalorder %v5379_v40, %v5505_v36  ;;  %v5568_v11 = vpop.permute.xlu2 %151  ;;  %v4532_v54 = vld [vmem:[%s8197_s2 + $0x50] sm:$0xff] }
  0x7c   :  { %vm277_vm13 = vcmp.eq.s32.totalorder %v5379_v40, %v5507_v37  ;;  %1011 = vmatpush.bf16.msrb.mxu1 %v4532_v54 }
  0x7d   :  { %v3902_v4 = vadd.f32 %v3901_v3, %v3900_v57 }
  0x7e   :  { %1102 = vmatpush.bf16.msrb.mxu2 %v4538_v38  ;;  %v5736_v38 = vadd.s32 256, %v5379_v40 }
  0x80   :  { %3147 = vperm.xlu1 %4631, %v5365_v29  }
  0x81   :  { %3141 = vperm.xlu0 %4630, %v5359_v27   ;;  %3153 = vperm.xlu2 %4632, %v5384_v41  }
  0x82   :  { %v5539_v60 = vpop.permute.xlu1 %193 }
  0x83   :  { %v5541_v61 = vpop.permute.xlu0 %169  ;;  %vm313_vm12 = vcmp.eq.s32.totalorder %v5379_v40, %v5539_v60  ;;  %v5634_v57 = vpop.permute.xlu2 %202 }
  0x84   :  { %vm281_vm14 = vcmp.eq.s32.totalorder %v5379_v40, %v5541_v61  ;;  %vm4225_vm15 = vmpackc.low %vm313_vm12, %vm309_vm11  ;;  %vm8218_vm11 = vcmp.ge.s32.totalorder %v5579_v13, 0  ;;  %vm8219_vm12 = vcmp.ge.s32.totalorder %v5614_v44, 0 }
  0x85   :  { %vm4217_vm10 = vmpackc.low %vm281_vm14, %vm277_vm13  ;;  %4226 = vmatmul.msk.bf16.vlgmr.msra.gmra.mxu3 %vm4225_vm15, %v8238_v1  ;;  %vm8221_vm14 = vcmp.ge.s32.totalorder %v5584_v16, 0  ;;  %v4517_v21 = vsel %vm8218_vm11, 1.0, %v8229_v28  ;;  %v4519_v48 = vsel %vm8219_vm12, 1.0, %v8229_v28  ;;  %vm8225_vm11 = vcmp.ge.s32.totalorder %v5629_v49, 0 }
  0x86   :  { %4218 = vmatmul.msk.bf16.vlgmr.msra.gmra.mxu2 %vm4217_vm10, %v8238_v1  ;;  %vm8220_vm10 = vcmp.ge.s32.totalorder %v5560_v5, 0  ;;  %v4515_v23 = vsel %vm8221_vm14, 1.0, %v8229_v28  ;;  %v3907_v43 = vsel %vm8234_vm1, %v4517_v21, 0.0  ;;  %vm257_vm12 = vcmp.eq.s32.totalorder %v5379_v40, %v5568_v11  ;;  %v4547_v21 = vld [vmem:[%s8197_s2 + $0xc8] sm:$0xff] }
  0x87   :  { %v4516_v12 = vsel %vm8220_vm10, 1.0, %v8229_v28  ;;  %v3903_v33 = vsel %vm8234_vm1, %v4515_v23, 0.0  ;;  %v4518_v3 = vsel %vm8225_vm11, 1.0, %v8229_v28  ;;  %v4531_v23 = vld [vmem:[%s8197_s2 + $0x48] sm:$0xff]  ;;  %1190 = vmatpush.bf16.msrb.mxu3 %v4547_v21 }
  0x88   :  { %3156 = vperm.xlu1 %4631, %v5408_v51   ;;  %v3905_v25 = vsel %vm8234_vm1, %v4516_v12, 0.0  ;;  %v3904_v39 = vadd.f32 %v3903_v33, %v3902_v4  ;;  %v3911_v4 = vsel %vm8234_vm1, %v4519_v48, 0.0  ;;  %v3909_v8 = vsel %vm8234_vm1, %v4518_v3, 0.0  ;;  %1012 = vmatpush.bf16.msrb.mxu1 %v4531_v23 }
  0x89   :  { %3150 = vperm.xlu0 %4630, %v5402_v50   ;;  %3162 = vperm.xlu2 %4632, %v5439_v2  }
  0x8a   :  { %v5592_v19 = vpop.permute.xlu1 %175  ;;  %v3906_v47 = vadd.f32 %v3905_v25, %v3904_v39  ;;  %v4546_v39 = vld [vmem:[%s8197_s2 + $0xc0] sm:$0xff] }
  0x8b   :  { %v5594_v20 = vpop.permute.xlu0 %172  ;;  %vm289_vm15 = vcmp.eq.s32.totalorder %v5379_v40, %v5592_v19  ;;  %v5679_v34 = vpop.permute.xlu2 %157  ;;  %1191 = vmatpush.bf16.msrb.mxu3 %v4546_v39  ;;  %v5739_v39 = vadd.s32 384, %v5379_v40 }
  0x8c   :  { %vm285_vm13 = vcmp.eq.s32.totalorder %v5379_v40, %v5594_v20  ;;  %v3908_v53 = vadd.f32 %v3907_v43, %v3906_v47  ;;  %v4530_v43 = vld [vmem:[%s8197_s2 + $0x40] sm:$0xff]  ;;  %v111_v47 = vld [vmem:[%s8196_s1 + $0xf8] sm:$0xff]  ;;  %s3934_s2 = sshll.u32 %s8201_s6, 4  ;;  %s3935_s2 = int_to_ptr.vmem [resolvable:$true] %s3934_s2 }
  0x8d   :  { %vm4219_vm14 = vmpackc.low %vm289_vm15, %vm285_vm13  ;;  %1013 = vmatpush.bf16.msrb.mxu1 %v4530_v43  ;;  %vm325_vm13 = vcmp.eq.s32.totalorder %v5379_v40, %v5634_v57 }
  0x8e   :  { %v3910_v9 = vadd.f32 %v3909_v8, %v3908_v53  ;;  %v110_v8 = vld [vmem:[%s8196_s1 + $0xf0] sm:$0xff] }
  0x90   :  { %3165 = vperm.xlu1 %4631, %v5457_v7   ;;  %v5661_v12 = vadd.f32 %v3911_v4, %v3910_v9  ;;  %v4554_v7 = vld [vmem:[#allocation2] sm:$0xff] }
  0x91   :  { %3159 = vperm.xlu0 %4630, %v5451_v6   ;;  %3171 = vperm.xlu2 %4632, %v5475_v18   ;;  %v4483_v6 = vld [vmem:[%s8199_s4 + $0xe8] sm:$0xf] }
  0x92   :  { %v5640_v0 = vpop.permute.xlu1 %148  ;;  %8416 = vst [vmem:[#allocation38_spill] sm:$0xff] %v5661_v12 }
  0x93   :  { %v5638_v59 = vpop.permute.xlu0 %199  ;;  %vm253_vm10 = vcmp.eq.s32.totalorder %v5379_v40, %v5640_v0  ;;  %v5713_v54 = vpop.permute.xlu2 %208 }
  0x94   :  { %vm321_vm9 = vcmp.eq.s32.totalorder %v5379_v40, %v5638_v59  ;;  %vm4211_vm7 = vmpackc.low %vm257_vm12, %vm253_vm10  ;;  %vm265_vm10 = vcmp.eq.s32.totalorder %v5379_v40, %v5679_v34 }
  0x95   :  { %4212 = vmatmul.msk.bf16.gmra.mxu1 %vm4211_vm7, %v8238_v1  ;;  %vm4227_vm11 = vmpackc.low %vm321_vm9, %vm317_vm8 }
  0x96   :  { %4220 = vmatmul.msk.bf16.gmra.mxu2 %vm4219_vm14, %v8238_v1  ;;  %4228 = vmatmul.msk.bf16.gmra.mxu3 %vm4227_vm11, %v8238_v1 }
  0x98   :  { %3174 = vperm.xlu1 %4631, %v5499_v31  }
  0x99   :  { %3168 = vperm.xlu0 %4630, %v5493_v26   ;;  %3183 = vperm.xlu2 %4632, %v5560_v5   ;;  %v4590_v26 = vld [vmem:[%s8199_s4 + $0xe4] sm:$0xf] }
  0x9a   :  { %v5677_v33 = vpop.permute.xlu1 %181 }
  0x9b   :  { %v5675_v25 = vpop.permute.xlu0 %178  ;;  %vm297_vm8 = vcmp.eq.s32.totalorder %v5379_v40, %v5677_v33  ;;  %v164_v9 = vpop.permute.xlu2 %163 }
  0x9c   :  { %vm293_vm7 = vcmp.eq.s32.totalorder %v5379_v40, %v5675_v25  ;;  %vm274_vm5 = vcmp.eq.s32.totalorder %v5731_v17, %v164_v9 }
  0x9d   :  { %vm4221_vm11 = vmpackc.low %vm297_vm8, %vm293_vm7 }
  0xa0   :  { %3186 = vperm.xlu1 %4631, %v5579_v13  }
  0xa1   :  { %3177 = vperm.xlu0 %4630, %v5532_v56   ;;  %3198 = vperm.xlu2 %4632, %v111_v47  }
  0xa2   :  { %v5701_v53 = vpop.permute.xlu1 %154 }
  0xa3   :  { %v5699_v48 = vpop.permute.xlu0 %205  ;;  %vm261_vm9 = vcmp.eq.s32.totalorder %v5379_v40, %v5701_v53 }
  0xa4   :  { %vm329_vm14 = vcmp.eq.s32.totalorder %v5379_v40, %v5699_v48  ;;  %vm4213_vm12 = vmpackc.low %vm265_vm10, %vm261_vm9  ;;  %vm273_vm10 = vcmp.eq.s32.totalorder %v5379_v40, %v164_v9 }
  0xa5   :  { %4214 = vmatmul.msk.bf16.gmra.mxu1 %vm4213_vm12, %v8238_v1  ;;  %vm4229_vm15 = vmpackc.low %vm329_vm14, %vm325_vm13 }
  0xa6   :  { %4222 = vmatmul.msk.bf16.gmra.mxu2 %vm4221_vm11, %v8238_v1  ;;  %4230 = vmatmul.msk.bf16.gmra.mxu3 %vm4229_vm15, %v8238_v1  ;;  %vm333_vm15 = vcmp.eq.s32.totalorder %v5379_v40, %v5713_v54 }
  0xa8   :  { %3192 = vperm.xlu1 %4631, %v5614_v44  }
  0xa9   :  { %3180 = vperm.xlu0 %4630, %v5584_v16   ;;  %v4556_v16 = vld [vmem:[#allocation2 + $0x10] sm:$0xff] }
  0xaa   :  { %v5720_v4 = vpop.permute.xlu1 %187 }
  0xab   :  { %v5718_v3 = vpop.permute.xlu0 %184  ;;  %vm305_vm8 = vcmp.eq.s32.totalorder %v5379_v40, %v5720_v4 }
  0xac   :  { %vm301_vm7 = vcmp.eq.s32.totalorder %v5379_v40, %v5718_v3 }
  0xad   :  { %vm4223_vm11 = vmpackc.low %vm305_vm8, %vm301_vm7 }
  0xb0   :  { %3195 = vperm.xlu1 %4631, %v110_v8  }
  0xb1   :  { %3189 = vperm.xlu0 %4630, %v5629_v49   ;;  %v125_v49 = vpop.permute.xlu2 %124 }
  0xb2   :  { %v161_v23 = vpop.permute.xlu1 %160 }
  0xb3   :  { %v5733_v21 = vpop.permute.xlu0 %211  ;;  %vm269_vm9 = vcmp.eq.s32.totalorder %v5379_v40, %v161_v23  ;;  %vm270_vm12 = vcmp.eq.s32.totalorder %v5731_v17, %v161_v23  ;;  %vm271_vm6 = vcmp.eq.s32.totalorder %v5736_v38, %v161_v23  ;;  %vm272_vm7 = vcmp.eq.s32.totalorder %v5739_v39, %v161_v23 }
  0xb4   :  { %vm337_vm14 = vcmp.eq.s32.totalorder %v5379_v40, %v5733_v21  ;;  %vm4215_vm13 = vmpackc.low %vm273_vm10, %vm269_vm9  ;;  %vm275_vm9 = vcmp.eq.s32.totalorder %v5736_v38, %v164_v9 }
  0xb5   :  { %4216 = vmatmul.msk.bf16.gmra.mxu1 %vm4215_vm13, %v8238_v1  ;;  %vm4231_vm4 = vmpackc.low %vm337_vm14, %vm333_vm15  ;;  %vm276_vm13 = vcmp.eq.s32.totalorder %v5739_v39, %v164_v9 }
  0xb6   :  { %4224 = vmatmul.msk.bf16.gmra.mxu2 %vm4223_vm11, %v8238_v1  ;;  %4232 = vmatmul.msk.bf16.gmra.mxu3 %vm4231_vm4, %v8238_v1  ;;  %vm5754_vm8 = vmpackc.low %vm274_vm5, %vm270_vm12 }
  0xb7   :  { %vm5759_vm10 = vmpackc.low %vm275_vm9, %vm271_vm6 }
  0xb8   :  { %vm5764_vm11 = vmpackc.low %vm276_vm13, %vm272_vm7 }
  0xba   :  { %v122_v28 = vpop.permute.xlu1 %121 }
  0xbb   :  { %v119_v23 = vpop.permute.xlu0 %118  ;;  %vm217_vm5 = vcmp.eq.s32.totalorder %v5379_v40, %v122_v28  ;;  %vm218_vm12 = vcmp.eq.s32.totalorder %v5731_v17, %v122_v28  ;;  %vm219_vm7 = vcmp.eq.s32.totalorder %v5736_v38, %v122_v28  ;;  %vm220_vm13 = vcmp.eq.s32.totalorder %v5739_v39, %v122_v28 }
  0xbc   :  { %vm213_vm4 = vcmp.eq.s32.totalorder %v5379_v40, %v119_v23  ;;  %vm214_vm6 = vcmp.eq.s32.totalorder %v5731_v17, %v119_v23  ;;  %vm215_vm15 = vcmp.eq.s32.totalorder %v5736_v38, %v119_v23  ;;  %vm216_vm9 = vcmp.eq.s32.totalorder %v5739_v39, %v119_v23  ;;  %v134_v23 = vpop.permute.xlu2 %133 }
  0xbd   :  { %vm4201_vm14 = vmpackc.low %vm217_vm5, %vm213_vm4 }
  0xbe   :  { %4202 = vmatmul.msk.bf16.vlgmr.msra.gmra.mxu0 %vm4201_vm14, %v8238_v1  ;;  %vm4233_vm3 = vmpackc.low %vm218_vm12, %vm214_vm6  ;;  %vm221_vm14 = vcmp.eq.s32.totalorder %v5379_v40, %v125_v49 }
  0xbf   :  { %vm4265_vm2 = vmpackc.low %vm219_vm7, %vm215_vm15  ;;  %vm223_vm15 = vcmp.eq.s32.totalorder %v5736_v38, %v125_v49 }
  0xc0   :  { %vm4297_vm4 = vmpackc.low %vm220_vm13, %vm216_vm9  ;;  %vm224_vm9 = vcmp.eq.s32.totalorder %v5739_v39, %v125_v49 }
  0xc2   :  { %v131_v28 = vpop.permute.xlu1 %130 }
  0xc3   :  { %v128_v9 = vpop.permute.xlu0 %127 }
  0xc4   :  { %vm225_vm5 = vcmp.eq.s32.totalorder %v5379_v40, %v128_v9  ;;  %vm226_vm0 = vcmp.eq.s32.totalorder %v5731_v17, %v128_v9  ;;  %vm227_vm6 = vcmp.eq.s32.totalorder %v5736_v38, %v128_v9 }
  0xc5   :  { %4234 = vmatmul.msk.bf16.vlgmr.msrb.gmra.mxu1 %vm4233_vm3, %v8238_v1  ;;  %vm4203_vm1 = vmpackc.low %vm225_vm5, %vm221_vm14  ;;  %vm222_vm3 = vcmp.eq.s32.totalorder %v5731_v17, %v125_v49  ;;  %vm231_vm14 = vcmp.eq.s32.totalorder %v5736_v38, %v131_v28 }
  0xc6   :  { %4266 = vmatmul.msk.bf16.vlgmr.msrb.gmra.mxu2 %vm4265_vm2, %v8238_v1  ;;  %4298 = vmatmul.msk.bf16.vlgmr.msrb.gmra.mxu3 %vm4297_vm4, %v8238_v1  ;;  %vm228_vm2 = vcmp.eq.s32.totalorder %v5739_v39, %v128_v9  ;;  %vm4235_vm12 = vmpackc.low %vm226_vm0, %vm222_vm3  ;;  %vm233_vm4 = vcmp.eq.s32.totalorder %v5379_v40, %v134_v23  ;;  %vm230_vm0 = vcmp.eq.s32.totalorder %v5731_v17, %v131_v28 }
  0xc7   :  { %vm4267_vm7 = vmpackc.low %vm227_vm6, %vm223_vm15  ;;  %vm234_vm6 = vcmp.eq.s32.totalorder %v5731_v17, %v134_v23  ;;  %vm232_vm3 = vcmp.eq.s32.totalorder %v5739_v39, %v131_v28 }
  0xc8   :  { %vm4299_vm13 = vmpackc.low %vm228_vm2, %vm224_vm9 }
  0xc9   :  { %vm4237_vm2 = vmpackc.low %vm234_vm6, %vm230_vm0 }
  0xca   :  { %v140_v49 = vpop.permute.xlu1 %139 }
  0xcb   :  { %v137_v9 = vpop.permute.xlu0 %136  ;;  %vm242_vm0 = vcmp.eq.s32.totalorder %v5731_v17, %v140_v49  ;;  %vm243_vm6 = vcmp.eq.s32.totalorder %v5736_v38, %v140_v49 }
  0xce   :  { %4204 = vmatmul.msk.bf16.gmra.mxu0 %vm4203_vm1, %v8238_v1  ;;  %vm229_vm1 = vcmp.eq.s32.totalorder %v5379_v40, %v131_v28  ;;  %v4561_v28 = vld [vmem:[#allocation2 + $0x38] sm:$0xff] }
  0xcf   :  { %vm4205_vm5 = vmpackc.low %vm233_vm4, %vm229_vm1  ;;  %vm241_vm1 = vcmp.eq.s32.totalorder %v5379_v40, %v140_v49  ;;  %1353 = vmatpush.bf16.msrb.mxu0 %v4561_v28 }
  0xd5   :  { %4236 = vmatmul.msk.bf16.gmra.mxu1 %vm4235_vm12, %v8238_v1  ;;  %vm235_vm12 = vcmp.eq.s32.totalorder %v5736_v38, %v134_v23 }
  0xd6   :  { %4268 = vmatmul.msk.bf16.gmra.mxu2 %vm4267_vm7, %v8238_v1  ;;  %4300 = vmatmul.msk.bf16.gmra.mxu3 %vm4299_vm13, %v8238_v1  ;;  %vm4269_vm15 = vmpackc.low %vm235_vm12, %vm231_vm14  ;;  %vm236_vm7 = vcmp.eq.s32.totalorder %v5739_v39, %v134_v23  ;;  %vm237_vm13 = vcmp.eq.s32.totalorder %v5379_v40, %v137_v9  ;;  %vm239_vm14 = vcmp.eq.s32.totalorder %v5736_v38, %v137_v9  ;;  %v4560_v23 = vld [vmem:[#allocation2 + $0x30] sm:$0xff] }
  0xd7   :  { %vm4301_vm9 = vmpackc.low %vm236_vm7, %vm232_vm3  ;;  %vm240_vm3 = vcmp.eq.s32.totalorder %v5739_v39, %v137_v9  ;;  %1354 = vmatpush.bf16.msrb.mxu0 %v4560_v23 }
  0xd8   :  { %vm4207_vm4 = vmpackc.low %vm241_vm1, %vm237_vm13  ;;  %vm250_vm13 = vcmp.eq.s32.totalorder %v5731_v17, %v5420_v55  ;;  %vm247_vm1 = vcmp.eq.s32.totalorder %v5736_v38, %v5372_v35 }
  0xde   :  { %4206 = vmatmul.msk.bf16.gmra.mxu0 %vm4205_vm5, %v8238_v1  ;;  %vm238_vm5 = vcmp.eq.s32.totalorder %v5731_v17, %v137_v9 }
  0xdf   :  { %vm4239_vm12 = vmpackc.low %vm242_vm0, %vm238_vm5  ;;  %vm248_vm5 = vcmp.eq.s32.totalorder %v5739_v39, %v5372_v35  ;;  %vm252_vm0 = vcmp.eq.s32.totalorder %v5739_v39, %v5420_v55 }
  0xe5   :  { %4238 = vmatmul.msk.bf16.gmra.mxu1 %vm4237_vm2, %v8238_v1  ;;  %vm244_vm2 = vcmp.eq.s32.totalorder %v5739_v39, %v140_v49  ;;  %v4559_v49 = vld [vmem:[#allocation2 + $0x28] sm:$0xff] }
  0xe6   :  { %4270 = vmatmul.msk.bf16.gmra.mxu2 %vm4269_vm15, %v8238_v1  ;;  %4302 = vmatmul.msk.bf16.gmra.mxu3 %vm4301_vm9, %v8238_v1  ;;  %vm4271_vm15 = vmpackc.low %vm243_vm6, %vm239_vm14  ;;  %vm246_vm9 = vcmp.eq.s32.totalorder %v5731_v17, %v5372_v35  ;;  %v4558_v35 = vld [vmem:[#allocation2 + $0x20] sm:$0xff] }
  0xe7   :  { %vm4303_vm7 = vmpackc.low %vm244_vm2, %vm240_vm3  ;;  %1355 = vmatpush.bf16.msrb.mxu0 %v4559_v49  ;;  %vm254_vm2 = vcmp.eq.s32.totalorder %v5731_v17, %v5640_v0  ;;  %v8423_v49 = vmov 1.0|1.0  }
  0xe8   :  { %vm4241_vm14 = vmpackc.low %vm250_vm13, %vm246_vm9  ;;  %vm259_vm13 = vcmp.eq.s32.totalorder %v5736_v38, %v5568_v11 }
  0xe9   :  { %vm4305_vm3 = vmpackc.low %vm252_vm0, %vm248_vm5  ;;  %vm262_vm0 = vcmp.eq.s32.totalorder %v5731_v17, %v5701_v53 }
  0xeb   :  { %v5816_v44 = vpop.f32.mrf.mxu1  ;;  %1356 = vmatpush.bf16.msrb.mxu0 %v4558_v35  ;;  %v4557_v35 = vld [vmem:[#allocation2 + $0x18] sm:$0xff] }
  0xee   :  { %4208 = vmatmul.msk.bf16.gmra.mxu0 %vm4207_vm4, %v8238_v1  ;;  %vm251_vm4 = vcmp.eq.s32.totalorder %v5736_v38, %v5420_v55 }
  0xef   :  { %vm4273_vm6 = vmpackc.low %vm251_vm4, %vm247_vm1  ;;  %vm260_vm4 = vcmp.eq.s32.totalorder %v5739_v39, %v5568_v11  ;;  %1357 = vmatpush.bf16.msrb.mxu0 %v4557_v35 }
  0xf3   :  { %v5837_v23 = vpop.f32.mrf.mxu1  ;;  %1358 = vmatpush.bf16.msrb.mxu0 %v4556_v16  ;;  %v4555_v16 = vld [vmem:[#allocation2 + $0x8] sm:$0xff] }
  0xf5   :  { %4240 = vmatmul.msk.bf16.gmra.mxu1 %vm4239_vm12, %v8238_v1  ;;  %vm255_vm12 = vcmp.eq.s32.totalorder %v5736_v38, %v5640_v0 }
  0xf6   :  { %4272 = vmatmul.msk.bf16.gmra.mxu2 %vm4271_vm15, %v8238_v1  ;;  %4304 = vmatmul.msk.bf16.gmra.mxu3 %vm4303_vm7, %v8238_v1  ;;  %vm258_vm15 = vcmp.eq.s32.totalorder %v5731_v17, %v5568_v11  ;;  %vm256_vm7 = vcmp.eq.s32.totalorder %v5739_v39, %v5640_v0  ;;  %vm4275_vm1 = vmpackc.low %vm259_vm13, %vm255_vm12  ;;  %vm267_vm12 = vcmp.eq.s32.totalorder %v5736_v38, %v5679_v34 }
  0xf7   :  { %vm4243_vm9 = vmpackc.low %vm258_vm15, %vm254_vm2  ;;  %1359 = vmatpush.bf16.msrb.mxu0 %v4555_v16  ;;  %v4593_v16 = vld [vmem:[%s8199_s4 + $0xf4] sm:$0xf0]  ;;  %vm284_vm13 = vcmp.eq.s32.totalorder %v5739_v39, %v5541_v61 }
  0xf8   :  { %vm4307_vm5 = vmpackc.low %vm260_vm4, %vm256_vm7  ;;  %vm268_vm7 = vcmp.eq.s32.totalorder %v5739_v39, %v5679_v34  ;;  %v4484_v51 = vor.u32 %v4593_v16, %v4483_v6  ;;  %v4475_v6 = vld [vmem:[%s8199_s4 + $0xe0] sm:$0xf]  ;;  %vm279_vm4 = vcmp.eq.s32.totalorder %v5736_v38, %v5507_v37 }
  0xfa   :  { %2126 = vmatpush.bf16.msra.mxu3 %v4484_v51  ;;  %v4592_v51 = vld [vmem:[%s8199_s4 + $0xec] sm:$0xf0] }
  0xfb   :  { %1360 = vmatpush.bf16.msrb.mxu0 %v4554_v7  ;;  %v4591_v7 = vld [vmem:[%s8199_s4 + $0xec] sm:$0xf] }
 0x105   :  { %4242 = vmatmul.msk.bf16.gmra.mxu1 %vm4241_vm14, %v8238_v1  ;;  %vm263_vm14 = vcmp.eq.s32.totalorder %v5736_v38, %v5701_v53 }
 0x106   :  { %4274 = vmatmul.msk.bf16.gmra.mxu2 %vm4273_vm6, %v8238_v1  ;;  %4306 = vmatmul.msk.bf16.gmra.mxu3 %vm4305_vm3, %v8238_v1  ;;  %vm266_vm6 = vcmp.eq.s32.totalorder %v5731_v17, %v5679_v34  ;;  %vm264_vm3 = vcmp.eq.s32.totalorder %v5739_v39, %v5701_v53  ;;  %vm4277_vm15 = vmpackc.low %vm267_vm12, %vm263_vm14  ;;  %v4477_v34 = vld [vmem:[%s8199_s4 + $0xf0] sm:$0xf0]  ;;  %vm291_vm12 = vcmp.eq.s32.totalorder %v5736_v38, %v5592_v19 }
 0x107   :  { %vm4245_vm2 = vmpackc.low %vm266_vm6, %vm262_vm0  ;;  %v4480_v2 = vor.u32 %v4590_v26, %v4477_v34  ;;  %v4485_v26 = vld [vmem:[%s8199_s4 + $0xf8] sm:$0xf0]  ;;  %vm280_vm0 = vcmp.eq.s32.totalorder %v5739_v39, %v5507_v37  ;;  %vm286_vm6 = vcmp.eq.s32.totalorder %v5731_v17, %v5594_v20 }
 0x108   :  { %v5835_v28 = vpop.f32.mrf.mxu3  ;;  %v4488_v47 = vor.u32 %v4591_v7, %v4485_v26  ;;  %vm4313_vm14 = vmpackc.low %vm284_vm13, %vm280_vm0  ;;  %vm298_vm13 = vcmp.eq.s32.totalorder %v5731_v17, %v5677_v33  ;;  %vm300_vm0 = vcmp.eq.s32.totalorder %v5739_v39, %v5677_v33 }
 0x109   :  { %v5833_v9 = vpop.f32.mrf.mxu2  ;;  %2037 = vmatpush.bf16.msra.mxu2 %v4480_v2  ;;  %v4476_v2 = vor.u32 %v4592_v51, %v4475_v6 }
 0x10a   :  { %2215 = vmatpush.bf16.msra.mxu0 %v4488_v47  ;;  %v4461_v47 = vld [vmem:[%s8199_s4 + $0xd0] sm:$0xf0] }
 0x10b   :  { %1948 = vmatpush.bf16.msra.mxu1 %v4476_v2 }
 0x110   :  { %v5843_v13 = vpop.f32.mrf.mxu3 }
 0x111   :  { %v5839_v55 = vpop.f32.mrf.mxu2 }
 0x112   :  { %v5847_v1 = vpop.f32.mrf.mxu1 }
 0x115   :  { %4244 = vmatmul.msk.bf16.gmra.mxu1 %vm4243_vm9, %v8423_v49  ;;  %vm4309_vm9 = vmpackc.low %vm268_vm7, %vm264_vm3  ;;  %vm290_vm3 = vcmp.eq.s32.totalorder %v5731_v17, %v5592_v19  ;;  %vm292_vm7 = vcmp.eq.s32.totalorder %v5739_v39, %v5592_v19 }
 0x116   :  { %4276 = vmatmul.msk.bf16.gmra.mxu2 %vm4275_vm1, %v8423_v49  ;;  %4308 = vmatmul.msk.bf16.gmra.mxu3 %vm4307_vm5, %v8423_v49 }
 0x119   :  { %v5860_v5 = vpop.f32.mrf.mxu2  ;;  %v5862_v0 = vpop.f32.mrf.mxu3 }
 0x11a   :  { %v5864_v12 = vpop.f32.mrf.mxu1 }
 0x121   :  { %v5866_v56 = vpop.f32.mrf.mxu2  ;;  %v5870_v11 = vpop.f32.mrf.mxu3 }
 0x122   :  { %v5874_v31 = vpop.f32.mrf.mxu1 }
 0x125   :  { %4246 = vmatmul.msk.bf16.gmra.mxu1 %vm4245_vm2, %v8423_v49  ;;  %vm287_vm2 = vcmp.eq.s32.totalorder %v5736_v38, %v5594_v20 }
 0x126   :  { %4278 = vmatmul.msk.bf16.gmra.mxu2 %vm4277_vm15, %v8423_v49  ;;  %4310 = vmatmul.msk.bf16.gmra.mxu3 %vm4309_vm9, %v8423_v49  ;;  %vm288_vm15 = vcmp.eq.s32.totalorder %v5739_v39, %v5594_v20  ;;  %vm4251_vm9 = vmpackc.low %vm290_vm3, %vm286_vm6 }
 0x129   :  { %v5887_v35 = vpop.f32.mrf.mxu2  ;;  %v5889_v53 = vpop.f32.mrf.mxu3 }
 0x12a   :  { %v5891_v18 = vpop.f32.mrf.mxu1 }
 0x131   :  { %v5905_v41 = vpop.f32.mrf.mxu2  ;;  %v5907_v50 = vpop.f32.mrf.mxu3 }
 0x132   :  { %v5909_v29 = vpop.f32.mrf.mxu1 }
 0x135   :  { %4248 = vmatmul.msk.bf16.gmra.mxu1 %vm5754_vm8, %v8423_v49  ;;  %vm282_vm8 = vcmp.eq.s32.totalorder %v5731_v17, %v5541_v61 }
 0x136   :  { %4280 = vmatmul.msk.bf16.gmra.mxu2 %vm5759_vm10, %v8423_v49  ;;  %4312 = vmatmul.msk.bf16.gmra.mxu3 %vm5764_vm11, %v8423_v49  ;;  %vm283_vm10 = vcmp.eq.s32.totalorder %v5736_v38, %v5541_v61  ;;  %vm278_vm11 = vcmp.eq.s32.totalorder %v5731_v17, %v5507_v37  ;;  %v4586_v61 = vld [vmem:[%s8199_s4 + $0xc4] sm:$0xf]  ;;  %v4467_v37 = vld [vmem:[%s8199_s4 + $0xc8] sm:$0xf] }
 0x137   :  { %vm4249_vm1 = vmpackc.low %vm282_vm8, %vm278_vm11  ;;  %v4464_v10 = vor.u32 %v4586_v61, %v4461_v47  ;;  %v4468_v58 = vor.u32 %v4589_v14, %v4467_v37  ;;  %vm294_vm11 = vcmp.eq.s32.totalorder %v5731_v17, %v5675_v25 }
 0x138   :  { %vm4281_vm5 = vmpackc.low %vm283_vm10, %vm279_vm4  ;;  %vm299_vm4 = vcmp.eq.s32.totalorder %v5736_v38, %v5677_v33  ;;  %v4582_v33 = vld [vmem:[%s8199_s4 + $0xa4] sm:$0xf] }
 0x139   :  { %v5932_v43 = vpop.f32.mrf.mxu2  ;;  %v5934_v34 = vpop.f32.mrf.mxu3  ;;  %2038 = vmatpush.bf16.msra.mxu2 %v4464_v10  ;;  %2127 = vmatpush.bf16.msra.mxu3 %v4468_v58  ;;  %vm4283_vm8 = vmpackc.low %vm291_vm12, %vm287_vm2  ;;  %vm302_vm2 = vcmp.eq.s32.totalorder %v5731_v17, %v5718_v3  ;;  %vm306_vm12 = vcmp.eq.s32.totalorder %v5731_v17, %v5720_v4 }
 0x13a   :  { %v5936_v22 = vpop.f32.mrf.mxu1  ;;  %vm4315_vm10 = vmpackc.low %vm292_vm7, %vm288_vm15  ;;  %vm303_vm15 = vcmp.eq.s32.totalorder %v5736_v38, %v5718_v3  ;;  %vm307_vm7 = vcmp.eq.s32.totalorder %v5736_v38, %v5720_v4 }
 0x13b   :  { %v926_v16 = vpop.f32.mrf.mxu0 }
 0x141   :  { %v5938_v8 = vpop.f32.mrf.mxu2  ;;  %v5942_v6 = vpop.f32.mrf.mxu3 }
 0x142   :  { %v1015_v27 = vpop.f32.mrf.mxu1 }
 0x143   :  { %v928_v51 = vpop.f32.mrf.mxu0  ;;  %v1016_v63 = vadd.f32 %v1015_v27, %v926_v16 }
 0x145   :  { %4250 = vmatmul.msk.bf16.gmra.mxu1 %vm4249_vm1, %v8423_v49  ;;  %vm295_vm1 = vcmp.eq.s32.totalorder %v5736_v38, %v5675_v25 }
 0x146   :  { %4282 = vmatmul.msk.bf16.gmra.mxu2 %vm4281_vm5, %v8423_v49  ;;  %4314 = vmatmul.msk.bf16.gmra.mxu3 %vm4313_vm14, %v8423_v49  ;;  %vm296_vm5 = vcmp.eq.s32.totalorder %v5739_v39, %v5675_v25  ;;  %vm4253_vm14 = vmpackc.low %vm298_vm13, %vm294_vm11 }
 0x147   :  { %vm4285_vm6 = vmpackc.low %vm299_vm4, %vm295_vm1  ;;  %vm314_vm1 = vcmp.eq.s32.totalorder %v5731_v17, %v5539_v60  ;;  %vm315_vm4 = vcmp.eq.s32.totalorder %v5736_v38, %v5539_v60 }
 0x148   :  { %vm4317_vm3 = vmpackc.low %vm300_vm0, %vm296_vm5  ;;  %vm310_vm5 = vcmp.eq.s32.totalorder %v5731_v17, %v5505_v36  ;;  %vm316_vm0 = vcmp.eq.s32.totalorder %v5739_v39, %v5539_v60 }
 0x149   :  { %v1104_v2 = vpop.f32.mrf.mxu2  ;;  %v1193_v7 = vpop.f32.mrf.mxu3  ;;  %vm4287_vm11 = vmpackc.low %vm307_vm7, %vm303_vm15  ;;  %vm322_vm15 = vcmp.eq.s32.totalorder %v5731_v17, %v5638_v59  ;;  %vm323_vm7 = vcmp.eq.s32.totalorder %v5736_v38, %v5638_v59 }
 0x14a   :  { %v1017_v26 = vpop.f32.mrf.mxu1  ;;  %v1105_v62 = vadd.f32 %v1104_v2, %v1016_v63 }
 0x14b   :  { %v931_v15 = vpop.f32.mrf.mxu0  ;;  %v1018_v46 = vadd.f32 %v1017_v26, %v928_v51 }
 0x14c   :  { %v1194_v58 = vadd.f32 %v1193_v7, %v1105_v62 }
 0x151   :  { %v1106_v42 = vpop.f32.mrf.mxu2  ;;  %v1195_v32 = vpop.f32.mrf.mxu3 }
 0x152   :  { %v1107_v45 = vadd.f32 %v1106_v42, %v1018_v46  ;;  %v1020_v14 = vpop.f32.mrf.mxu1  ;;  %v4459_v42 = vld [vmem:[%s8199_s4 + $0xc0] sm:$0xf]  ;;  %v4588_v46 = vld [vmem:[%s8199_s4 + $0xcc] sm:$0xf0] }
 0x153   :  { %v4460_v10 = vor.u32 %v4588_v46, %v4459_v42  ;;  %v933_v19 = vpop.f32.mrf.mxu0  ;;  %v1021_v2 = vadd.f32 %v1020_v14, %v931_v15 }
 0x154   :  { %v1196_v63 = vadd.f32 %v1195_v32, %v1107_v45  ;;  %v4587_v32 = vld [vmem:[%s8199_s4 + $0xcc] sm:$0xf]  ;;  %v4469_v45 = vld [vmem:[%s8199_s4 + $0xd8] sm:$0xf0] }
 0x155   :  { %4252 = vmatmul.msk.bf16.gmra.mxu1 %vm4251_vm9, %v8423_v49  ;;  %v4472_v20 = vor.u32 %v4587_v32, %v4469_v45  ;;  %v4451_v32 = vld [vmem:[%s8199_s4 + $0xa8] sm:$0xf]  ;;  %vm304_vm9 = vcmp.eq.s32.totalorder %v5739_v39, %v5718_v3 }
 0x156   :  { %v1273_v27 = vpack.c.bf16 %v1196_v63, %v1194_v58  ;;  %4284 = vmatmul.msk.bf16.gmra.mxu2 %vm4283_vm8, %v8423_v49  ;;  %4316 = vmatmul.msk.bf16.gmra.mxu3 %vm4315_vm10, %v8423_v49  ;;  %vm308_vm8 = vcmp.eq.s32.totalorder %v5739_v39, %v5720_v4  ;;  %vm4255_vm10 = vmpackc.low %vm306_vm12, %vm302_vm2  ;;  %v4583_v4 = vld [vmem:[%s8199_s4 + $0xac] sm:$0xf]  ;;  %vm312_vm2 = vcmp.eq.s32.totalorder %v5739_v39, %v5505_v36 }
 0x157   :  { %1949 = vmatpush.bf16.msra.mxu1 %v4460_v10  ;;  %2216 = vmatpush.bf16.msra.mxu0 %v4472_v20  ;;  %vm4319_vm13 = vmpackc.low %vm308_vm8, %vm304_vm9  ;;  %vm318_vm9 = vcmp.eq.s32.totalorder %v5731_v17, %v5524_v52  ;;  %vm324_vm8 = vcmp.eq.s32.totalorder %v5739_v39, %v5638_v59 }
 0x158   :  { %1361 = vmatmul.bf16.vlgmr.msrb.gmra.mxu0 %v1273_v27  ;;  %vm4321_vm12 = vmpackc.low %vm316_vm0, %vm312_vm2  ;;  %vm331_vm0 = vcmp.eq.s32.totalorder %v5736_v38, %v5699_v48  ;;  %vm327_vm2 = vcmp.eq.s32.totalorder %v5736_v38, %v5634_v57 }
 0x159   :  { %v1109_v62 = vpop.f32.mrf.mxu2  ;;  %v1198_v16 = vpop.f32.mrf.mxu3 }
 0x15a   :  { %v1022_v51 = vpop.f32.mrf.mxu1  ;;  %v1110_v7 = vadd.f32 %v1109_v62, %v1021_v2  ;;  %v4585_v62 = vld [vmem:[%s8199_s4 + $0xb4] sm:$0xf0] }
 0x15b   :  { %v1023_v26 = vadd.f32 %v1022_v51, %v933_v19  ;;  %v936_v61 = vpop.f32.mrf.mxu0  ;;  %v4445_v19 = vld [vmem:[%s8199_s4 + $0xb0] sm:$0xf0] }
 0x15c   :  { %v1199_v15 = vadd.f32 %v1198_v16, %v1110_v7  ;;  %v4448_v45 = vor.u32 %v4582_v33, %v4445_v19  ;;  %v4452_v16 = vor.u32 %v4585_v62, %v4451_v32 }
 0x15e   :  { %2039 = vmatpush.bf16.msra.mxu2 %v4448_v45  ;;  %2128 = vmatpush.bf16.msra.mxu3 %v4452_v16 }
 0x161   :  { %v1111_v47 = vpop.f32.mrf.mxu2  ;;  %v1200_v58 = vpop.f32.mrf.mxu3 }
 0x162   :  { %v1112_v37 = vadd.f32 %v1111_v47, %v1023_v26  ;;  %v1025_v63 = vpop.f32.mrf.mxu1 }
 0x163   :  { %v938_v27 = vpop.f32.mrf.mxu0  ;;  %v1026_v20 = vadd.f32 %v1025_v63, %v936_v61  ;;  %v4443_v63 = vld [vmem:[%s8199_s4 + $0xa0] sm:$0xf] }
 0x164   :  { %v1201_v14 = vadd.f32 %v1200_v58, %v1112_v37 }
 0x165   :  { %4254 = vmatmul.msk.bf16.gmra.mxu1 %vm4253_vm14, %v8423_v49  ;;  %vm4257_vm14 = vmpackc.low %vm314_vm1, %vm310_vm5  ;;  %vm320_vm1 = vcmp.eq.s32.totalorder %v5739_v39, %v5524_v52  ;;  %vm330_vm5 = vcmp.eq.s32.totalorder %v5731_v17, %v5699_v48 }
 0x166   :  { %4286 = vmatmul.msk.bf16.gmra.mxu2 %vm4285_vm6, %v8423_v49  ;;  %v1274_v42 = vpack.c.bf16 %v1201_v14, %v1199_v15  ;;  %4318 = vmatmul.msk.bf16.gmra.mxu3 %vm4317_vm3, %v8423_v49  ;;  %v4584_v15 = vld [vmem:[%s8199_s4 + $0xac] sm:$0xf0]  ;;  %vm311_vm6 = vcmp.eq.s32.totalorder %v5736_v38, %v5505_v36  ;;  %v4429_v36 = vld [vmem:[%s8199_s4 + $0x90] sm:$0xf0] }
 0x167   :  { %vm4289_vm3 = vmpackc.low %vm315_vm4, %vm311_vm6  ;;  %vm332_vm6 = vcmp.eq.s32.totalorder %v5739_v39, %v5699_v48 }
 0x168   :  { %1366 = vmatmul.bf16.gmra.mxu0 %v1274_v42  ;;  %v4444_v42 = vor.u32 %v4584_v15, %v4443_v63  ;;  %v4435_v63 = vld [vmem:[%s8199_s4 + $0x88] sm:$0xf]  ;;  %vm4323_vm4 = vmpackc.low %vm324_vm8, %vm320_vm1  ;;  %vm339_vm8 = vcmp.eq.s32.totalorder %v5736_v38, %v5733_v21  ;;  %vm335_vm1 = vcmp.eq.s32.totalorder %v5736_v38, %v5713_v54 }
 0x169   :  { %v1114_v46 = vpop.f32.mrf.mxu2  ;;  %v1203_v10 = vpop.f32.mrf.mxu3 }
 0x16a   :  { %v1027_v25 = vpop.f32.mrf.mxu1  ;;  %v1115_v51 = vadd.f32 %v1114_v46, %v1026_v20  ;;  %1950 = vmatpush.bf16.msra.mxu1 %v4444_v42  ;;  %v4453_v46 = vld [vmem:[%s8199_s4 + $0xb8] sm:$0xf0] }
 0x16b   :  { %v1028_v2 = vadd.f32 %v1027_v25, %v938_v27  ;;  %v941_v14 = vpop.f32.mrf.mxu0  ;;  %v4456_v27 = vor.u32 %v4583_v4, %v4453_v46 }
 0x16c   :  { %v1204_v37 = vadd.f32 %v1203_v10, %v1115_v51 }
 0x16d   :  { %2217 = vmatpush.bf16.msra.mxu0 %v4456_v27 }
 0x171   :  { %v1116_v7 = vpop.f32.mrf.mxu2  ;;  %v1205_v47 = vpop.f32.mrf.mxu3 }
 0x172   :  { %v1117_v26 = vadd.f32 %v1116_v7, %v1028_v2  ;;  %v1030_v61 = vpop.f32.mrf.mxu1 }
 0x173   :  { %v1031_v19 = vadd.f32 %v1030_v61, %v941_v14  ;;  %v943_v32 = vpop.f32.mrf.mxu0  ;;  %v4581_v14 = vld [vmem:[%s8199_s4 + $0x94] sm:$0xf0] }
 0x174   :  { %v1206_v58 = vadd.f32 %v1205_v47, %v1117_v26 }
 0x175   :  { %4256 = vmatmul.msk.bf16.gmra.mxu1 %vm4255_vm10, %v8423_v49  ;;  %vm4259_vm10 = vmpackc.low %vm322_vm15, %vm318_vm9  ;;  %vm328_vm15 = vcmp.eq.s32.totalorder %v5739_v39, %v5634_v57  ;;  %vm338_vm9 = vcmp.eq.s32.totalorder %v5731_v17, %v5733_v21 }
 0x176   :  { %4288 = vmatmul.msk.bf16.gmra.mxu2 %vm4287_vm11, %v8423_v49  ;;  %v1275_v3 = vpack.c.bf16 %v1206_v58, %v1204_v37  ;;  %4320 = vmatmul.msk.bf16.gmra.mxu3 %vm4319_vm13, %v8423_v49  ;;  %v4578_v58 = vld [vmem:[%s8199_s4 + $0x84] sm:$0xf]  ;;  %vm319_vm11 = vcmp.eq.s32.totalorder %v5736_v38, %v5524_v52 }
 0x177   :  { %v4432_v15 = vor.u32 %v4578_v58, %v4429_v36  ;;  %vm4291_vm13 = vmpackc.low %vm323_vm7, %vm319_vm11  ;;  %vm340_vm11 = vcmp.eq.s32.totalorder %v5739_v39, %v5733_v21  ;;  %v4411_v21 = vld [vmem:[%s8199_s4 + $0x60] sm:$0xf] }
 0x178   :  { %1371 = vmatmul.bf16.gmra.mxu0 %v1275_v3  ;;  %v4436_v3 = vor.u32 %v4581_v14, %v4435_v63  ;;  %vm4325_vm7 = vmpackc.low %vm332_vm6, %vm328_vm15  ;;  %v4574_v14 = vld [vmem:[%s8199_s4 + $0x64] sm:$0xf] }
 0x179   :  { %v1119_v10 = vpop.f32.mrf.mxu2  ;;  %v1208_v25 = vpop.f32.mrf.mxu3  ;;  %2040 = vmatpush.bf16.msra.mxu2 %v4432_v15 }
 0x17a   :  { %v1032_v33 = vpop.f32.mrf.mxu1  ;;  %v1120_v45 = vadd.f32 %v1119_v10, %v1031_v19  ;;  %2129 = vmatpush.bf16.msra.mxu3 %v4436_v3 }
 0x17b   :  { %v1033_v62 = vadd.f32 %v1032_v33, %v943_v32  ;;  %v4580_v32 = vld [vmem:[%s8199_s4 + $0x8c] sm:$0xf0] }
 0x17c   :  { %v1209_v7 = vadd.f32 %v1208_v25, %v1120_v45 }
 0x181   :  { %v1121_v20 = vpop.f32.mrf.mxu2  ;;  %v1210_v51 = vpop.f32.mrf.mxu3 }
 0x182   :  { %v1122_v16 = vadd.f32 %v1121_v20, %v1033_v62  ;;  %v1035_v2 = vpop.f32.mrf.mxu1  ;;  %v4579_v62 = vld [vmem:[%s8199_s4 + $0x8c] sm:$0xf]  ;;  %v4437_v20 = vld [vmem:[%s8199_s4 + $0x98] sm:$0xf0] }
 0x183   :  { %v1036_v42 = vadd.f32 %v1035_v2, %v5816_v44 }
 0x184   :  { %v1211_v26 = vadd.f32 %v1210_v51, %v1122_v16  ;;  %v4440_v16 = vor.u32 %v4579_v62, %v4437_v20 }
 0x185   :  { %4258 = vmatmul.msk.bf16.gmra.mxu1 %vm4257_vm14, %v8423_v49  ;;  %vm326_vm14 = vcmp.eq.s32.totalorder %v5731_v17, %v5634_v57  ;;  %v4413_v57 = vld [vmem:[%s8199_s4 + $0x70] sm:$0xf0] }
 0x186   :  { %4290 = vmatmul.msk.bf16.gmra.mxu2 %vm4289_vm3, %v8423_v49  ;;  %v1276_v47 = vpack.c.bf16 %v1211_v26, %v1209_v7  ;;  %4322 = vmatmul.msk.bf16.gmra.mxu3 %vm4321_vm12, %v8423_v49  ;;  %vm4261_vm3 = vmpackc.low %vm330_vm5, %vm326_vm14  ;;  %v4416_v3 = vor.u32 %v4574_v14, %v4413_v57  ;;  %vm336_vm5 = vcmp.eq.s32.totalorder %v5739_v39, %v5713_v54 }
 0x187   :  { %2218 = vmatpush.bf16.msra.mxu0 %v4440_v16  ;;  %vm4293_vm12 = vmpackc.low %vm331_vm0, %vm327_vm2 }
 0x188   :  { %1376 = vmatmul.bf16.gmra.mxu0 %v1276_v47  ;;  %2041 = vmatpush.bf16.msra.mxu2 %v4416_v3  ;;  %vm4327_vm0 = vmpackc.low %vm340_vm11, %vm336_vm5 }
 0x189   :  { %v1124_v60 = vpop.f32.mrf.mxu2  ;;  %v1213_v61 = vpop.f32.mrf.mxu3 }
 0x18a   :  { %v1037_v37 = vpop.f32.mrf.mxu1  ;;  %v1125_v4 = vadd.f32 %v1124_v60, %v1036_v42  ;;  %v4419_v42 = vld [vmem:[%s8199_s4 + $0x68] sm:$0xf] }
 0x18b   :  { %v1038_v46 = vadd.f32 %v1037_v37, %v5837_v23  ;;  %v4427_v23 = vld [vmem:[%s8199_s4 + $0x80] sm:$0xf] }
 0x18c   :  { %v1214_v44 = vadd.f32 %v1213_v61, %v1125_v4  ;;  %v4428_v45 = vor.u32 %v4580_v32, %v4427_v23  ;;  %v4577_v4 = vld [vmem:[%s8199_s4 + $0x74] sm:$0xf0] }
 0x18e   :  { %1951 = vmatpush.bf16.msra.mxu1 %v4428_v45  ;;  %v4576_v45 = vld [vmem:[%s8199_s4 + $0x6c] sm:$0xf0] }
 0x191   :  { %v1126_v10 = vpop.f32.mrf.mxu2  ;;  %v1215_v25 = vpop.f32.mrf.mxu3 }
 0x192   :  { %v1127_v27 = vadd.f32 %v1126_v10, %v1038_v46  ;;  %v1040_v33 = vpop.f32.mrf.mxu1  ;;  %v4420_v10 = vor.u32 %v4577_v4, %v4419_v42 }
 0x193   :  { %v1041_v7 = vadd.f32 %v1040_v33, %v5847_v1 }
 0x194   :  { %v1216_v19 = vadd.f32 %v1215_v25, %v1127_v27  ;;  %2130 = vmatpush.bf16.msra.mxu3 %v4420_v10 }
 0x195   :  { %4260 = vmatmul.msk.bf16.gmra.mxu1 %vm4259_vm10, %v8423_v49  ;;  %vm334_vm10 = vcmp.eq.s32.totalorder %v5731_v17, %v5713_v54 }
 0x196   :  { %4292 = vmatmul.msk.bf16.gmra.mxu2 %vm4291_vm13, %v8423_v49  ;;  %v1277_v59 = vpack.c.bf16 %v1216_v19, %v1214_v44  ;;  %4324 = vmatmul.msk.bf16.gmra.mxu3 %vm4323_vm4, %v8423_v49  ;;  %vm4263_vm13 = vmpackc.low %vm338_vm9, %vm334_vm10 }
 0x197   :  { %vm4295_vm4 = vmpackc.low %vm339_vm8, %vm335_vm1 }
 0x198   :  { %1381 = vmatmul.bf16.gmra.mxu0 %v1277_v59  ;;  %v4412_v59 = vor.u32 %v4576_v45, %v4411_v21 }
 0x199   :  { %v1129_v52 = vpop.f32.mrf.mxu2  ;;  %v1218_v51 = vpop.f32.mrf.mxu3 }
 0x19a   :  { %v1042_v2 = vpop.f32.mrf.mxu1  ;;  %v1130_v26 = vadd.f32 %v1129_v52, %v1041_v7  ;;  %1952 = vmatpush.bf16.msra.mxu1 %v4412_v59 }
 0x19b   :  { %v1043_v47 = vadd.f32 %v1042_v2, %v5864_v12 }
 0x19c   :  { %v1219_v1 = vadd.f32 %v1218_v51, %v1130_v26 }
 0x1a1   :  { %v1131_v60 = vpop.f32.mrf.mxu2  ;;  %v1220_v37 = vpop.f32.mrf.mxu3 }
 0x1a2   :  { %v1132_v61 = vadd.f32 %v1131_v60, %v1043_v47  ;;  %v1045_v58 = vpop.f32.mrf.mxu1 }
 0x1a3   :  { %v1046_v46 = vadd.f32 %v1045_v58, %v5874_v31 }
 0x1a4   :  { %v1221_v36 = vadd.f32 %v1220_v37, %v1132_v61 }
 0x1a5   :  { %4262 = vmatmul.msk.bf16.gmra.mxu1 %vm4261_vm3, %v8423_v49 }
 0x1a6   :  { %4294 = vmatmul.msk.bf16.gmra.mxu2 %vm4293_vm12, %v8423_v49  ;;  %v1278_v12 = vpack.c.bf16 %v1221_v36, %v1219_v1  ;;  %4326 = vmatmul.msk.bf16.gmra.mxu3 %vm4325_vm7, %v8423_v49  ;;  %v4575_v36 = vld [vmem:[%s8199_s4 + $0x6c] sm:$0xf] }
 0x1a8   :  { %1386 = vmatmul.bf16.gmra.mxu0 %v1278_v12 }
 0x1a9   :  { %v1134_v48 = vpop.f32.mrf.mxu2  ;;  %v1223_v63 = vpop.f32.mrf.mxu3 }
 0x1aa   :  { %v1047_v15 = vpop.f32.mrf.mxu1  ;;  %v1135_v27 = vadd.f32 %v1134_v48, %v1046_v46 }
 0x1ab   :  { %v1048_v25 = vadd.f32 %v1047_v15, %v5891_v18 }
 0x1ac   :  { %v1224_v31 = vadd.f32 %v1223_v63, %v1135_v27 }
 0x1b1   :  { %v1136_v33 = vpop.f32.mrf.mxu2  ;;  %v1225_v19 = vpop.f32.mrf.mxu3 }
 0x1b2   :  { %v1137_v44 = vadd.f32 %v1136_v33, %v1048_v25  ;;  %v1050_v23 = vpop.f32.mrf.mxu1  ;;  %v4570_v25 = vld [vmem:[%s8199_s4 + $0x44] sm:$0xf] }
 0x1b3   :  { %v1051_v52 = vadd.f32 %v1050_v23, %v5909_v29  ;;  %v4421_v29 = vld [vmem:[%s8199_s4 + $0x78] sm:$0xf0]  ;;  %v4573_v23 = vld [vmem:[%s8199_s4 + $0x54] sm:$0xf0] }
 0x1b4   :  { %v1226_v32 = vadd.f32 %v1225_v19, %v1137_v44  ;;  %v4397_v44 = vld [vmem:[%s8199_s4 + $0x50] sm:$0xf0]  ;;  %v4403_v19 = vld [vmem:[%s8199_s4 + $0x48] sm:$0xf] }
 0x1b5   :  { %4264 = vmatmul.msk.bf16.gmra.mxu1 %vm4263_vm13, %v8423_v49 }
 0x1b6   :  { %4296 = vmatmul.msk.bf16.gmra.mxu2 %vm4295_vm4, %v8423_v49  ;;  %v1279_v18 = vpack.c.bf16 %v1226_v32, %v1224_v31  ;;  %4328 = vmatmul.msk.bf16.gmra.mxu3 %vm4327_vm0, %v8423_v49  ;;  %v4400_v32 = vor.u32 %v4570_v25, %v4397_v44 }
 0x1b8   :  { %1391 = vmatmul.bf16.gmra.mxu0 %v1279_v18  ;;  %v4404_v18 = vor.u32 %v4573_v23, %v4403_v19  ;;  %2042 = vmatpush.bf16.msra.mxu2 %v4400_v32 }
 0x1b9   :  { %v1139_v62 = vpop.f32.mrf.mxu2  ;;  %v1228_v54 = vpop.f32.mrf.mxu3 }
 0x1ba   :  { %v1052_v20 = vpop.f32.mrf.mxu1  ;;  %v1140_v16 = vadd.f32 %v1139_v62, %v1051_v52  ;;  %2131 = vmatpush.bf16.msra.mxu3 %v4404_v18  ;;  %v4379_v62 = vld [vmem:[%s8199_s4 + $0x20] sm:$0xf] }
 0x1bb   :  { %v1053_v51 = vadd.f32 %v1052_v20, %v5936_v22  ;;  %v4424_v22 = vor.u32 %v4575_v36, %v4421_v29  ;;  %v4564_v36 = vld [vmem:[%s8199_s4 + $0xc] sm:$0xf0] }
 0x1bc   :  { %v1229_v60 = vadd.f32 %v1228_v54, %v1140_v16  ;;  %v4568_v54 = vld [vmem:[%s8199_s4 + $0x2c] sm:$0xf0]  ;;  %v4566_v16 = vld [vmem:[%s8199_s4 + $0x24] sm:$0xf] }
 0x1bd   :  { %2219 = vmatpush.bf16.msra.mxu0 %v4424_v22  ;;  %v4380_v52 = vor.u32 %v4568_v54, %v4379_v62  ;;  %v4562_v22 = vld [vmem:[%s8199_s4 + $0x4] sm:$0xf]  ;;  %v4571_v54 = vld [vmem:[%s8199_s4 + $0x4c] sm:$0xf] }
 0x1c1   :  { %v1141_v2 = vpop.f32.mrf.mxu2  ;;  %v1230_v26 = vpop.f32.mrf.mxu3 }
 0x1c2   :  { %v1142_v7 = vadd.f32 %v1141_v2, %v1053_v51  ;;  %v1055_v47 = vpop.f32.mrf.mxu1  ;;  %v4381_v51 = vld [vmem:[%s8199_s4 + $0x30] sm:$0xf0]  ;;  %v4387_v2 = vld [vmem:[%s8199_s4 + $0x28] sm:$0xf] }
 0x1c3   :  { %v1056_v12 = vadd.f32 %v1055_v47, %v5833_v9  ;;  %v4395_v9 = vld [vmem:[%s8199_s4 + $0x40] sm:$0xf]  ;;  %v4569_v47 = vld [vmem:[%s8199_s4 + $0x34] sm:$0xf0] }
 0x1c4   :  { %v1231_v61 = vadd.f32 %v1230_v26, %v1142_v7  ;;  %v4384_v26 = vor.u32 %v4566_v16, %v4381_v51 }
 0x1c6   :  { %v1280_v37 = vpack.c.bf16 %v1231_v61, %v1229_v60  ;;  %v4388_v61 = vor.u32 %v4569_v47, %v4387_v2  ;;  %2043 = vmatpush.bf16.msra.mxu2 %v4384_v26 }
 0x1c8   :  { %1396 = vmatmul.bf16.gmra.mxu0 %v1280_v37  ;;  %2132 = vmatpush.bf16.msra.mxu3 %v4388_v61 }
 0x1c9   :  { %v1144_v49 = vpop.f32.mrf.mxu2  ;;  %v1233_v58 = vpop.f32.mrf.mxu3 }
 0x1ca   :  { %v1057_v1 = vpop.f32.mrf.mxu1  ;;  %v1145_v48 = vadd.f32 %v1144_v49, %v1056_v12  ;;  %v4371_v12 = vld [vmem:[%s8199_s4 + $0x8] sm:$0xf] }
 0x1cb   :  { %v1058_v63 = vadd.f32 %v1057_v1, %v5839_v55  ;;  %v4572_v55 = vld [vmem:[%s8199_s4 + $0x4c] sm:$0xf0]  ;;  %v4363_v1 = vld [vmem:[%s8199_s4] sm:$0xf] }
 0x1cc   :  { %v1234_v3 = vadd.f32 %v1233_v58, %v1145_v48  ;;  %v4396_v33 = vor.u32 %v4572_v55, %v4395_v9  ;;  %v4364_v29 = vor.u32 %v4564_v36, %v4363_v1 }
 0x1ce   :  { %1953 = vmatpush.bf16.msra.mxu1 %v4396_v33 }
 0x1d1   :  { %v1146_v15 = vpop.f32.mrf.mxu2  ;;  %v1235_v57 = vpop.f32.mrf.mxu3 }
 0x1d2   :  { %v1147_v14 = vadd.f32 %v1146_v15, %v1058_v63  ;;  %v1060_v42 = vpop.f32.mrf.mxu1  ;;  %1954 = vmatpush.bf16.msra.mxu1 %v4380_v52 }
 0x1d3   :  { %v1061_v37 = vadd.f32 %v1060_v42, %v5860_v5  ;;  %v4365_v5 = vld [vmem:[%s8199_s4 + $0x10] sm:$0xf0] }
 0x1d4   :  { %v1236_v4 = vadd.f32 %v1235_v57, %v1147_v14  ;;  %v4368_v14 = vor.u32 %v4562_v22, %v4365_v5  ;;  %v4565_v57 = vld [vmem:[%s8199_s4 + $0x14] sm:$0xf0] }
 0x1d5   :  { %v6168_v46 = vpop.f32.mrf.mxu0 }
 0x1d6   :  { %v1281_v10 = vpack.c.bf16 %v1236_v4, %v1234_v3  ;;  %v1442_v27 = vmul.f32 %v6168_v46, %v6168_v46  ;;  %1955 = vmatpush.bf16.msra.mxu1 %v4364_v29  ;;  %v4372_v3 = vor.u32 %v4565_v57, %v4371_v12  ;;  %2044 = vmatpush.bf16.msra.mxu2 %v4368_v14 }
 0x1d8   :  { %v1474_v31 = vmul.f32 %v1442_v27, %v6168_v46  ;;  %1401 = vmatmul.bf16.gmra.mxu0 %v1281_v10  ;;  %2133 = vmatpush.bf16.msra.mxu3 %v4372_v3 }
 0x1d9   :  { %v1149_v21 = vpop.f32.mrf.mxu2  ;;  %v1238_v59 = vpop.f32.mrf.mxu3 }
 0x1da   :  { %v1506_v45 = vmul.f32 0.044715, %v1474_v31  ;;  %v1062_v20 = vpop.f32.mrf.mxu1  ;;  %v1150_v48 = vadd.f32 %v1149_v21, %v1061_v37 }
 0x1db   :  { %v1063_v63 = vadd.f32 %v1062_v20, %v5866_v56  ;;  %v4405_v20 = vld [vmem:[%s8199_s4 + $0x58] sm:$0xf0] }
 0x1dc   :  { %v1538_v7 = vadd.f32 %v1506_v45, %v6168_v46  ;;  %v1239_v55 = vadd.f32 %v1238_v59, %v1150_v48  ;;  %v4408_v16 = vor.u32 %v4571_v54, %v4405_v20 }
 0x1dd   :  { %v6210_v60 = vpop.f32.mrf.mxu0 }
 0x1de   :  { %v1570_v49 = vmul.f32 0.7978846, %v1538_v7  ;;  %v1443_v58 = vmul.f32 %v6210_v60, %v6210_v60  ;;  %2220 = vmatpush.bf16.msra.mxu0 %v4408_v16 }
 0x1e0   :  { %v1475_v15 = vmul.f32 %v1443_v58, %v6210_v60  ;;  %4633 = vtanh.f32 %v1570_v49 }
 0x1e1   :  { %v1151_v42 = vpop.f32.mrf.mxu2  ;;  %v1240_v27 = vpop.f32.mrf.mxu3 }
 0x1e2   :  { %v1507_v4 = vmul.f32 0.044715, %v1475_v15  ;;  %v1152_v10 = vadd.f32 %v1151_v42, %v1063_v63  ;;  %v1065_v9 = vpop.f32.mrf.mxu1 }
 0x1e3   :  { %v1066_v7 = vadd.f32 %v1065_v9, %v5887_v35 }
 0x1e4   :  { %v1539_v56 = vadd.f32 %v1507_v4, %v6210_v60  ;;  %v1241_v25 = vadd.f32 %v1240_v27, %v1152_v10 }
 0x1e5   :  { %v6236_v33 = vpop.f32.mrf.mxu0 }
 0x1e6   :  { %v1571_v44 = vmul.f32 0.7978846, %v1539_v56  ;;  %v1282_v19 = vpack.c.bf16 %v1241_v25, %v1239_v55  ;;  %v1444_v23 = vmul.f32 %v6236_v33, %v6236_v33  ;;  %v4634_v31 = vpop.eup %4633 }
 0x1e7   :  { %v1634_v62 = vadd.f32 1.0, %v4634_v31 }
 0x1e8   :  { %4635 = vtanh.f32 %v1571_v44  ;;  %v1476_v32 = vmul.f32 %v1444_v23, %v6236_v33  ;;  %1406 = vmatmul.bf16.gmra.mxu0 %v1282_v19 }
 0x1e9   :  { %v1154_v18 = vpop.f32.mrf.mxu2  ;;  %v1243_v45 = vpop.f32.mrf.mxu3  ;;  %v1666_v61 = vmul.f32 0.5, %v1634_v62 }
 0x1ea   :  { %v1508_v21 = vmul.f32 0.044715, %v1476_v32  ;;  %v1067_v59 = vpop.f32.mrf.mxu1  ;;  %v1155_v49 = vadd.f32 %v1154_v18, %v1066_v7 }
 0x1eb   :  { %v1068_v58 = vadd.f32 %v1067_v59, %v5905_v41  ;;  %v1698_v48 = vmul.f32 %v1666_v61, %v6168_v46 }
 0x1ec   :  { %v1540_v52 = vadd.f32 %v1508_v21, %v6236_v33  ;;  %v1244_v15 = vadd.f32 %v1243_v45, %v1155_v49 }
 0x1ed   :  { %v1369_v51 = vpop.f32.mrf.mxu0 }
 0x1ee   :  { %v4636_v2 = vpop.eup %4635  ;;  %v1572_v26 = vmul.f32 0.7978846, %v1540_v52  ;;  %v1445_v47 = vmul.f32 %v1369_v51, %v1369_v51 }
 0x1ef   :  { %v1635_v37 = vadd.f32 1.0, %v4636_v2 }
 0x1f0   :  { %v1477_v1 = vmul.f32 %v1445_v47, %v1369_v51  ;;  %4637 = vtanh.f32 %v1572_v26 }
 0x1f1   :  { %v1667_v36 = vmul.f32 0.5, %v1635_v37  ;;  %v1156_v29 = vpop.f32.mrf.mxu2  ;;  %v1245_v12 = vpop.f32.mrf.mxu3 }
 0x1f2   :  { %v1509_v22 = vmul.f32 0.044715, %v1477_v1  ;;  %v1157_v5 = vadd.f32 %v1156_v29, %v1068_v58  ;;  %v1070_v35 = vpop.f32.mrf.mxu1 }
 0x1f3   :  { %v1699_v63 = vmul.f32 %v1667_v36, %v6210_v60  ;;  %v1071_v31 = vadd.f32 %v1070_v35, %v5932_v43  ;;  %v4567_v35 = vld [vmem:[%s8199_s4 + $0x2c] sm:$0xf] }
 0x1f4   :  { %v1541_v14 = vadd.f32 %v1509_v22, %v1369_v51  ;;  %v1246_v57 = vadd.f32 %v1245_v12, %v1157_v5 }
 0x1f5   :  { %v6252_v42 = vpack.c.bf16 %v1699_v63, %v1698_v48  ;;  %v6254_v3 = vpop.f32.mrf.mxu0 }
 0x1f6   :  { %v1573_v41 = vmul.f32 0.7978846, %v1541_v14  ;;  %v1283_v4 = vpack.c.bf16 %v1246_v57, %v1244_v15  ;;  %v1446_v10 = vmul.f32 %v6254_v3, %v6254_v3  ;;  %v4638_v46 = vpop.eup %4637  ;;  %v4389_v15 = vld [vmem:[%s8199_s4 + $0x38] sm:$0xf0] }
 0x1f7   :  { %1956 = vmatmul.bf16.vlgmr.msra.gmra.mxu1 %v6252_v42  ;;  %2045 = vmatmul.bf16.vlgmr.msra.gmra.mxu2 %v6252_v42  ;;  %v1636_v56 = vadd.f32 1.0, %v4638_v46  ;;  %v4392_v57 = vor.u32 %v4567_v35, %v4389_v15 }
 0x1f8   :  { %4639 = vtanh.f32 %v1573_v41  ;;  %v1478_v60 = vmul.f32 %v1446_v10, %v6254_v3  ;;  %2134 = vmatmul.bf16.vlgmr.msra.gmra.mxu3 %v6252_v42  ;;  %1411 = vmatmul.bf16.gmra.mxu0 %v1283_v4 }
 0x1f9   :  { %v1159_v27 = vpop.f32.mrf.mxu2  ;;  %v1248_v55 = vpop.f32.mrf.mxu3  ;;  %v1668_v21 = vmul.f32 0.5, %v1636_v56  ;;  %2221 = vmatpush.bf16.msra.mxu0 %v4392_v57 }
 0x1fa   :  { %v1510_v9 = vmul.f32 0.044715, %v1478_v60  ;;  %v1072_v25 = vpop.f32.mrf.mxu1  ;;  %v1160_v62 = vadd.f32 %v1159_v27, %v1071_v31 }
 0x1fb   :  { %v1073_v59 = vadd.f32 %v1072_v25, %v5938_v8  ;;  %v1700_v26 = vmul.f32 %v1668_v21, %v6236_v33 }
 0x1fc   :  { %v1542_v44 = vadd.f32 %v1510_v9, %v6254_v3  ;;  %v1249_v37 = vadd.f32 %v1248_v55, %v1160_v62 }
 0x1fd   :  { %v1374_v19 = vpop.f32.mrf.mxu0 }
 0x1fe   :  { %v4640_v23 = vpop.eup %4639  ;;  %v1574_v32 = vmul.f32 0.7978846, %v1542_v44  ;;  %v1447_v18 = vmul.f32 %v1374_v19, %v1374_v19 }
 0x1ff   :  { %v1637_v45 = vadd.f32 1.0, %v4640_v23 }
 0x200   :  { %v1479_v54 = vmul.f32 %v1447_v18, %v1374_v19  ;;  %4641 = vtanh.f32 %v1574_v32 }
 0x201   :  { %v1669_v20 = vmul.f32 0.5, %v1637_v45  ;;  %v1161_v52 = vpop.f32.mrf.mxu2  ;;  %v1250_v7 = vpop.f32.mrf.mxu3 }
 0x202   :  { %v1511_v16 = vmul.f32 0.044715, %v1479_v54  ;;  %v1162_v2 = vadd.f32 %v1161_v52, %v1073_v59  ;;  %v1075_v61 = vpop.f32.mrf.mxu1 }
 0x203   :  { %v1701_v47 = vmul.f32 %v1669_v20, %v1369_v51  ;;  %v1076_v10 = vadd.f32 %v1075_v61, %v5835_v28 }
 0x204   :  { %v1543_v43 = vadd.f32 %v1511_v16, %v1374_v19  ;;  %v1251_v49 = vadd.f32 %v1250_v7, %v1162_v2 }
 0x205   :  { %v6266_v58 = vpop.f32.mrf.mxu0  ;;  %v6268_v1 = vpack.c.bf16 %v1701_v47, %v1700_v26 }
 0x206   :  { %v1575_v36 = vmul.f32 0.7978846, %v1543_v43  ;;  %v1284_v8 = vpack.c.bf16 %v1251_v49, %v1249_v37  ;;  %v1448_v29 = vmul.f32 %v6266_v58, %v6266_v58  ;;  %v4642_v22 = vpop.eup %4641 }
 0x207   :  { %1961 = vmatmul.bf16.gmra.mxu1 %v6268_v1  ;;  %2050 = vmatmul.bf16.gmra.mxu2 %v6268_v1  ;;  %v1638_v48 = vadd.f32 1.0, %v4642_v22 }
 0x208   :  { %4643 = vtanh.f32 %v1575_v36  ;;  %v1480_v33 = vmul.f32 %v1448_v29, %v6266_v58  ;;  %2139 = vmatmul.bf16.gmra.mxu3 %v6268_v1  ;;  %1416 = vmatmul.bf16.gmra.mxu0 %v1284_v8 }
 0x209   :  { %v1164_v51 = vpop.f32.mrf.mxu2  ;;  %v1253_v12 = vpop.f32.mrf.mxu3  ;;  %v1670_v27 = vmul.f32 0.5, %v1638_v48 }
 0x20a   :  { %v1512_v5 = vmul.f32 0.044715, %v1480_v33  ;;  %v1077_v63 = vpop.f32.mrf.mxu1  ;;  %v1165_v55 = vadd.f32 %v1164_v51, %v1076_v10 }
 0x20b   :  { %v1078_v56 = vadd.f32 %v1077_v63, %v5843_v13  ;;  %v1702_v21 = vmul.f32 %v1670_v27, %v6254_v3 }
 0x20c   :  { %v1544_v14 = vadd.f32 %v1512_v5, %v6266_v58  ;;  %v1254_v28 = vadd.f32 %v1253_v12, %v1165_v55 }
 0x20d   :  { %v1379_v41 = vpop.f32.mrf.mxu0 }
 0x20e   :  { %v4644_v4 = vpop.eup %4643  ;;  %v1576_v46 = vmul.f32 0.7978846, %v1544_v14  ;;  %v1449_v60 = vmul.f32 %v1379_v41, %v1379_v41 }
 0x20f   :  { %v1639_v9 = vadd.f32 1.0, %v4644_v4 }
 0x210   :  { %v1481_v25 = vmul.f32 %v1449_v60, %v1379_v41  ;;  %4645 = vtanh.f32 %v1576_v46 }
 0x211   :  { %v1671_v44 = vmul.f32 0.5, %v1639_v9  ;;  %v1166_v23 = vpop.f32.mrf.mxu2  ;;  %v1255_v18 = vpop.f32.mrf.mxu3 }
 0x212   :  { %v1513_v31 = vmul.f32 0.044715, %v1481_v25  ;;  %v1167_v32 = vadd.f32 %v1166_v23, %v1078_v56  ;;  %v1080_v62 = vpop.f32.mrf.mxu1 }
 0x213   :  { %v1703_v45 = vmul.f32 %v1671_v44, %v1374_v19  ;;  %v1081_v8 = vadd.f32 %v1080_v62, %v5862_v0 }
 0x214   :  { %v1545_v59 = vadd.f32 %v1513_v31, %v1379_v41  ;;  %v1256_v54 = vadd.f32 %v1255_v18, %v1167_v32 }
 0x215   :  { %v6286_v20 = vpop.f32.mrf.mxu0  ;;  %v6288_v52 = vpack.c.bf16 %v1703_v45, %v1702_v21  ;;  %v4563_v21 = vld [vmem:[%s8199_s4 + $0xc] sm:$0xf]  ;;  %v4373_v45 = vld [vmem:[%s8199_s4 + $0x18] sm:$0xf0] }
 0x216   :  { %v1577_v16 = vmul.f32 0.7978846, %v1545_v59  ;;  %v1285_v13 = vpack.c.bf16 %v1256_v54, %v1254_v28  ;;  %v1450_v2 = vmul.f32 %v6286_v20, %v6286_v20  ;;  %v4646_v7 = vpop.eup %4645  ;;  %v4376_v28 = vor.u32 %v4563_v21, %v4373_v45 }
 0x217   :  { %1966 = vmatmul.bf16.gmra.mxu1 %v6288_v52  ;;  %2055 = vmatmul.bf16.gmra.mxu2 %v6288_v52  ;;  %v1640_v61 = vadd.f32 1.0, %v4646_v7 }
 0x218   :  { %4647 = vtanh.f32 %v1577_v16  ;;  %v1482_v3 = vmul.f32 %v1450_v2, %v6286_v20  ;;  %2144 = vmatmul.bf16.gmra.mxu3 %v6288_v52  ;;  %1421 = vmatmul.bf16.gmra.mxu0 %v1285_v13 }
 0x219   :  { %v1169_v19 = vpop.f32.mrf.mxu2  ;;  %v1258_v47 = vpop.f32.mrf.mxu3  ;;  %v1672_v33 = vmul.f32 0.5, %v1640_v61  ;;  %2222 = vmatpush.bf16.msra.mxu0 %v4376_v28 }
 0x21a   :  { %v1514_v26 = vmul.f32 0.044715, %v1482_v3  ;;  %v1082_v37 = vpop.f32.mrf.mxu1  ;;  %v1170_v5 = vadd.f32 %v1169_v19, %v1081_v8 }
 0x21b   :  { %v1083_v12 = vadd.f32 %v1082_v37, %v5870_v11  ;;  %v1704_v4 = vmul.f32 %v1672_v33, %v6266_v58 }
 0x21c   :  { %v1546_v43 = vadd.f32 %v1514_v26, %v6286_v20  ;;  %v1259_v60 = vadd.f32 %v1258_v47, %v1170_v5 }
 0x21d   :  { %v1384_v49 = vpop.f32.mrf.mxu0 }
 0x21e   :  { %v4648_v36 = vpop.eup %4647  ;;  %v1578_v29 = vmul.f32 0.7978846, %v1546_v43  ;;  %v1451_v22 = vmul.f32 %v1384_v49, %v1384_v49 }
 0x21f   :  { %v1641_v51 = vadd.f32 1.0, %v4648_v36 }
 0x220   :  { %v1483_v48 = vmul.f32 %v1451_v22, %v1384_v49  ;;  %4649 = vtanh.f32 %v1578_v29 }
 0x221   :  { %v1673_v63 = vmul.f32 0.5, %v1641_v51  ;;  %v1171_v35 = vpop.f32.mrf.mxu2  ;;  %v1260_v57 = vpop.f32.mrf.mxu3 }
 0x222   :  { %v1515_v15 = vmul.f32 0.044715, %v1483_v48  ;;  %v1172_v14 = vadd.f32 %v1171_v35, %v1083_v12  ;;  %v1085_v46 = vpop.f32.mrf.mxu1 }
 0x223   :  { %v1705_v10 = vmul.f32 %v1673_v63, %v1379_v41  ;;  %v1086_v16 = vadd.f32 %v1085_v46, %v5889_v53 }
 0x224   :  { %v1547_v0 = vadd.f32 %v1515_v15, %v1384_v49  ;;  %v1261_v27 = vadd.f32 %v1260_v57, %v1172_v14 }
 0x225   :  { %v6300_v9 = vpop.f32.mrf.mxu0  ;;  %v6302_v55 = vpack.c.bf16 %v1705_v10, %v1704_v4 }
 0x226   :  { %v1579_v56 = vmul.f32 0.7978846, %v1547_v0  ;;  %v1286_v11 = vpack.c.bf16 %v1261_v27, %v1259_v60  ;;  %v1452_v25 = vmul.f32 %v6300_v9, %v6300_v9  ;;  %v4650_v44 = vpop.eup %4649 }
 0x227   :  { %1971 = vmatmul.bf16.gmra.mxu1 %v6302_v55  ;;  %2060 = vmatmul.bf16.gmra.mxu2 %v6302_v55  ;;  %v1642_v32 = vadd.f32 1.0, %v4650_v44 }
 0x228   :  { %4651 = vtanh.f32 %v1579_v56  ;;  %v1484_v58 = vmul.f32 %v1452_v25, %v6300_v9  ;;  %2149 = vmatmul.bf16.gmra.mxu3 %v6302_v55  ;;  %1426 = vmatmul.bf16.gmra.mxu0 %v1286_v11 }
 0x229   :  { %v1174_v41 = vpop.f32.mrf.mxu2  ;;  %v1263_v31 = vpop.f32.mrf.mxu3  ;;  %v1674_v7 = vmul.f32 0.5, %v1642_v32 }
 0x22a   :  { %v1516_v23 = vmul.f32 0.044715, %v1484_v58  ;;  %v1087_v18 = vpop.f32.mrf.mxu1  ;;  %v1175_v19 = vadd.f32 %v1174_v41, %v1086_v16 }
 0x22b   :  { %v1088_v26 = vadd.f32 %v1087_v18, %v5907_v50  ;;  %v1706_v29 = vmul.f32 %v1674_v7, %v6286_v20 }
 0x22c   :  { %v1548_v62 = vadd.f32 %v1516_v23, %v6300_v9  ;;  %v1264_v53 = vadd.f32 %v1263_v31, %v1175_v19 }
 0x22d   :  { %v1389_v59 = vpop.f32.mrf.mxu0 }
 0x22e   :  { %v4652_v54 = vpop.eup %4651  ;;  %v1580_v13 = vmul.f32 0.7978846, %v1548_v62  ;;  %v1453_v2 = vmul.f32 %v1389_v59, %v1389_v59 }
 0x22f   :  { %v1643_v3 = vadd.f32 1.0, %v4652_v54 }
 0x230   :  { %v1485_v47 = vmul.f32 %v1453_v2, %v1389_v59  ;;  %4653 = vtanh.f32 %v1580_v13 }
 0x231   :  { %v1675_v61 = vmul.f32 0.5, %v1643_v3  ;;  %v1176_v37 = vpop.f32.mrf.mxu2  ;;  %v1265_v8 = vpop.f32.mrf.mxu3 }
 0x232   :  { %v1517_v43 = vmul.f32 0.044715, %v1485_v47  ;;  %v1177_v36 = vadd.f32 %v1176_v37, %v1088_v26  ;;  %v1090_v33 = vpop.f32.mrf.mxu1 }
 0x233   :  { %v1707_v22 = vmul.f32 %v1675_v61, %v1384_v49  ;;  %v1091_v27 = vadd.f32 %v1090_v33, %v5934_v34 }
 0x234   :  { %v1549_v51 = vadd.f32 %v1517_v43, %v1389_v59  ;;  %v1266_v5 = vadd.f32 %v1265_v8, %v1177_v36 }
 0x235   :  { %v6320_v12 = vpop.f32.mrf.mxu0  ;;  %v6322_v48 = vpack.c.bf16 %v1707_v22, %v1706_v29 }
 0x236   :  { %v1581_v63 = vmul.f32 0.7978846, %v1549_v51  ;;  %v1287_v50 = vpack.c.bf16 %v1266_v5, %v1264_v53  ;;  %v1454_v35 = vmul.f32 %v6320_v12, %v6320_v12  ;;  %v4654_v15 = vpop.eup %4653 }
 0x237   :  { %1976 = vmatmul.bf16.gmra.mxu1 %v6322_v48  ;;  %2065 = vmatmul.bf16.gmra.mxu2 %v6322_v48  ;;  %v1644_v4 = vadd.f32 1.0, %v4654_v15 }
 0x238   :  { %4655 = vtanh.f32 %v1581_v63  ;;  %v1486_v20 = vmul.f32 %v1454_v35, %v6320_v12  ;;  %2154 = vmatmul.bf16.gmra.mxu3 %v6322_v48  ;;  %1431 = vmatmul.bf16.gmra.mxu0 %v1287_v50 }
 0x239   :  { %v1179_v49 = vpop.f32.mrf.mxu2  ;;  %v1268_v57 = vpop.f32.mrf.mxu3  ;;  %v1676_v25 = vmul.f32 0.5, %v1644_v4 }
 0x23a   :  { %v1518_v14 = vmul.f32 0.044715, %v1486_v20  ;;  %v1092_v46 = vpop.f32.mrf.mxu1  ;;  %v1180_v58 = vadd.f32 %v1179_v49, %v1091_v27 }
 0x23b   :  { %v1093_v41 = vadd.f32 %v1092_v46, %v5942_v6  ;;  %v1708_v45 = vmul.f32 %v1676_v25, %v6300_v9 }
 0x23c   :  { %v1550_v10 = vadd.f32 %v1518_v14, %v6320_v12  ;;  %v1269_v54 = vadd.f32 %v1268_v57, %v1180_v58 }
 0x23d   :  { %v1394_v60 = vpop.f32.mrf.mxu0 }
 0x23e   :  { %v4656_v0 = vpop.eup %4655  ;;  %v1582_v56 = vmul.f32 0.7978846, %v1550_v10  ;;  %v1455_v11 = vmul.f32 %v1394_v60, %v1394_v60 }
 0x23f   :  { %v1645_v44 = vadd.f32 1.0, %v4656_v0 }
 0x240   :  { %v1487_v23 = vmul.f32 %v1455_v11, %v1394_v60  ;;  %4657 = vtanh.f32 %v1582_v56 }
 0x241   :  { %v1677_v31 = vmul.f32 0.5, %v1645_v44  ;;  %v1181_v32 = vpop.f32.mrf.mxu2  ;;  %v1270_v28 = vpop.f32.mrf.mxu3 }
 0x242   :  { %v1519_v18 = vmul.f32 0.044715, %v1487_v23  ;;  %v1182_v21 = vadd.f32 %v1181_v32, %v1093_v41 }
 0x243   :  { %v1709_v62 = vmul.f32 %v1677_v31, %v1389_v59 }
 0x244   :  { %v1551_v16 = vadd.f32 %v1519_v18, %v1394_v60  ;;  %v1271_v34 = vadd.f32 %v1270_v28, %v1182_v21 }
 0x245   :  { %v1397_v13 = vpop.f32.mrf.mxu0  ;;  %v6334_v2 = vpack.c.bf16 %v1709_v62, %v1708_v45 }
 0x246   :  { %v1583_v7 = vmul.f32 0.7978846, %v1551_v16  ;;  %v1288_v3 = vpack.c.bf16 %v1271_v34, %v1269_v54  ;;  %v1456_v19 = vmul.f32 %v1397_v13, %v1397_v13  ;;  %v4658_v6 = vpop.eup %4657 }
 0x247   :  { %1981 = vmatmul.bf16.gmra.mxu1 %v6334_v2  ;;  %2070 = vmatmul.bf16.gmra.mxu2 %v6334_v2  ;;  %v1646_v59 = vadd.f32 1.0, %v4658_v6 }
 0x248   :  { %4659 = vtanh.f32 %v1583_v7  ;;  %v1488_v26 = vmul.f32 %v1456_v19, %v1397_v13  ;;  %2159 = vmatmul.bf16.gmra.mxu3 %v6334_v2  ;;  %1436 = vmatmul.bf16.gmra.mxu0 %v1288_v3 }
 0x249   :  { %v1678_v8 = vmul.f32 0.5, %v1646_v59 }
 0x24a   :  { %v1520_v9 = vmul.f32 0.044715, %v1488_v26 }
 0x24b   :  { %v1710_v51 = vmul.f32 %v1678_v8, %v6320_v12 }
 0x24c   :  { %v1552_v47 = vadd.f32 %v1520_v9, %v1397_v13 }
 0x24d   :  { %v1399_v61 = vpop.f32.mrf.mxu0 }
 0x24e   :  { %v4660_v37 = vpop.eup %4659  ;;  %v1584_v43 = vmul.f32 0.7978846, %v1552_v47  ;;  %v1457_v36 = vmul.f32 %v1399_v61, %v1399_v61 }
 0x24f   :  { %v1647_v29 = vadd.f32 1.0, %v4660_v37 }
 0x250   :  { %v1489_v22 = vmul.f32 %v1457_v36, %v1399_v61  ;;  %4661 = vtanh.f32 %v1584_v43 }
 0x251   :  { %v1679_v33 = vmul.f32 0.5, %v1647_v29 }
 0x252   :  { %v1521_v53 = vmul.f32 0.044715, %v1489_v22 }
 0x253   :  { %v1711_v5 = vmul.f32 %v1679_v33, %v1394_v60 }
 0x254   :  { %v1553_v63 = vadd.f32 %v1521_v53, %v1399_v61 }
 0x255   :  { %v1402_v50 = vpop.f32.mrf.mxu0  ;;  %v6340_v35 = vpack.c.bf16 %v1711_v5, %v1710_v51 }
 0x256   :  { %v1585_v15 = vmul.f32 0.7978846, %v1553_v63  ;;  %v1458_v20 = vmul.f32 %v1402_v50, %v1402_v50  ;;  %v4662_v49 = vpop.eup %4661 }
 0x257   :  { %1986 = vmatmul.bf16.gmra.mxu1 %v6340_v35  ;;  %2075 = vmatmul.bf16.gmra.mxu2 %v6340_v35  ;;  %v1648_v12 = vadd.f32 1.0, %v4662_v49 }
 0x258   :  { %4663 = vtanh.f32 %v1585_v15  ;;  %v1490_v14 = vmul.f32 %v1458_v20, %v1402_v50  ;;  %2164 = vmatmul.bf16.gmra.mxu3 %v6340_v35  ;;  %2223 = vmatmul.bf16.vlgmr.msra.gmra.mxu0 %v6252_v42 }
 0x259   :  { %v1680_v27 = vmul.f32 0.5, %v1648_v12 }
 0x25a   :  { %v1522_v57 = vmul.f32 0.044715, %v1490_v14 }
 0x25b   :  { %v1712_v58 = vmul.f32 %v1680_v27, %v1397_v13 }
 0x25c   :  { %v1554_v4 = vadd.f32 %v1522_v57, %v1402_v50 }
 0x25d   :  { %v1404_v10 = vpop.f32.mrf.mxu0 }
 0x25e   :  { %v4664_v46 = vpop.eup %4663  ;;  %v1586_v60 = vmul.f32 0.7978846, %v1554_v4  ;;  %v1459_v0 = vmul.f32 %v1404_v10, %v1404_v10 }
 0x25f   :  { %v1649_v56 = vadd.f32 1.0, %v4664_v46 }
 0x260   :  { %v1491_v11 = vmul.f32 %v1459_v0, %v1404_v10  ;;  %4665 = vtanh.f32 %v1586_v60 }
 0x261   :  { %v1681_v25 = vmul.f32 0.5, %v1649_v56 }
 0x262   :  { %v1523_v44 = vmul.f32 0.044715, %v1491_v11 }
 0x263   :  { %v1713_v41 = vmul.f32 %v1681_v25, %v1399_v61 }
 0x264   :  { %v1555_v23 = vadd.f32 %v1523_v44, %v1404_v10 }
 0x265   :  { %v1407_v31 = vpop.f32.mrf.mxu0  ;;  %v6346_v32 = vpack.c.bf16 %v1713_v41, %v1712_v58 }
 0x266   :  { %v1587_v42 = vmul.f32 0.7978846, %v1555_v23  ;;  %v1460_v18 = vmul.f32 %v1407_v31, %v1407_v31  ;;  %v4666_v21 = vpop.eup %4665 }
 0x267   :  { %1991 = vmatmul.bf16.gmra.mxu1 %v6346_v32  ;;  %2080 = vmatmul.bf16.gmra.mxu2 %v6346_v32  ;;  %v1650_v28 = vadd.f32 1.0, %v4666_v21 }
 0x268   :  { %4667 = vtanh.f32 %v1587_v42  ;;  %v1492_v45 = vmul.f32 %v1460_v18, %v1407_v31  ;;  %2169 = vmatmul.bf16.gmra.mxu3 %v6346_v32  ;;  %2228 = vmatmul.bf16.gmra.mxu0 %v6268_v1 }
 0x269   :  { %v1682_v3 = vmul.f32 0.5, %v1650_v28 }
 0x26a   :  { %v1524_v62 = vmul.f32 0.044715, %v1492_v45 }
 0x26b   :  { %v1714_v59 = vmul.f32 %v1682_v3, %v1402_v50 }
 0x26c   :  { %v1556_v54 = vadd.f32 %v1524_v62, %v1407_v31 }
 0x26d   :  { %v1409_v16 = vpop.f32.mrf.mxu0 }
 0x26e   :  { %v4668_v34 = vpop.eup %4667  ;;  %v1588_v13 = vmul.f32 0.7978846, %v1556_v54  ;;  %v1461_v7 = vmul.f32 %v1409_v16, %v1409_v16 }
 0x26f   :  { %v1651_v19 = vadd.f32 1.0, %v4668_v34 }
 0x270   :  { %v1493_v6 = vmul.f32 %v1461_v7, %v1409_v16  ;;  %4669 = vtanh.f32 %v1588_v13 }
 0x271   :  { %v1683_v26 = vmul.f32 0.5, %v1651_v19 }
 0x272   :  { %v1525_v9 = vmul.f32 0.044715, %v1493_v6 }
 0x273   :  { %v1715_v47 = vmul.f32 %v1683_v26, %v1404_v10 }
 0x274   :  { %v1557_v61 = vadd.f32 %v1525_v9, %v1409_v16  ;;  %v6364_v62 = vpop.f32.mrf.mxu1 }
 0x275   :  { %v1412_v37 = vpop.f32.mrf.mxu0  ;;  %v6352_v43 = vpack.c.bf16 %v1715_v47, %v1714_v59 }
 0x276   :  { %v1589_v1 = vmul.f32 0.7978846, %v1557_v61  ;;  %v1462_v36 = vmul.f32 %v1412_v37, %v1412_v37  ;;  %v4670_v8 = vpop.eup %4669 }
 0x277   :  { %1996 = vmatmul.bf16.gmra.mxu1 %v6352_v43  ;;  %2085 = vmatmul.bf16.gmra.mxu2 %v6352_v43  ;;  %v1652_v33 = vadd.f32 1.0, %v4670_v8 }
 0x278   :  { %4671 = vtanh.f32 %v1589_v1  ;;  %v1494_v29 = vmul.f32 %v1462_v36, %v1412_v37  ;;  %2174 = vmatmul.bf16.gmra.mxu3 %v6352_v43  ;;  %2233 = vmatmul.bf16.gmra.mxu0 %v6288_v52 }
 0x279   :  { %v1684_v15 = vmul.f32 0.5, %v1652_v33 }
 0x27a   :  { %v1526_v22 = vmul.f32 0.044715, %v1494_v29  ;;  %v6366_v34 = vpop.f32.mrf.mxu2 }
 0x27b   :  { %v1716_v12 = vmul.f32 %v1684_v15, %v1407_v31  ;;  %v6370_v6 = vpop.f32.mrf.mxu3 }
 0x27c   :  { %v1558_v53 = vadd.f32 %v1526_v22, %v1412_v37  ;;  %v6376_v61 = vpop.f32.mrf.mxu1 }
 0x27d   :  { %v1414_v51 = vpop.f32.mrf.mxu0 }
 0x27e   :  { %v4672_v5 = vpop.eup %4671  ;;  %v1590_v63 = vmul.f32 0.7978846, %v1558_v53  ;;  %v1463_v50 = vmul.f32 %v1414_v51, %v1414_v51 }
 0x27f   :  { %v1653_v20 = vadd.f32 1.0, %v4672_v5 }
 0x280   :  { %v1495_v49 = vmul.f32 %v1463_v50, %v1414_v51  ;;  %4673 = vtanh.f32 %v1590_v63 }
 0x281   :  { %v1685_v14 = vmul.f32 0.5, %v1653_v20 }
 0x282   :  { %v1527_v57 = vmul.f32 0.044715, %v1495_v49  ;;  %v6378_v8 = vpop.f32.mrf.mxu2 }
 0x283   :  { %v1717_v4 = vmul.f32 %v1685_v14, %v1409_v16  ;;  %v6380_v5 = vpop.f32.mrf.mxu3 }
 0x284   :  { %v1559_v10 = vadd.f32 %v1527_v57, %v1414_v51  ;;  %v6384_v57 = vpop.f32.mrf.mxu1 }
 0x285   :  { %v1417_v46 = vpop.f32.mrf.mxu0  ;;  %v6358_v60 = vpack.c.bf16 %v1717_v4, %v1716_v12 }
 0x286   :  { %v1591_v52 = vmul.f32 0.7978846, %v1559_v10  ;;  %v1464_v0 = vmul.f32 %v1417_v46, %v1417_v46  ;;  %v4674_v27 = vpop.eup %4673 }
 0x287   :  { %2001 = vmatmul.bf16.gmra.mxu1 %v6358_v60  ;;  %2090 = vmatmul.bf16.gmra.mxu2 %v6358_v60  ;;  %v1654_v25 = vadd.f32 1.0, %v4674_v27 }
 0x288   :  { %4675 = vtanh.f32 %v1591_v52  ;;  %v1496_v56 = vmul.f32 %v1464_v0, %v1417_v46  ;;  %2179 = vmatmul.bf16.gmra.mxu3 %v6358_v60  ;;  %2238 = vmatmul.bf16.gmra.mxu0 %v6302_v55 }
 0x289   :  { %v1686_v42 = vmul.f32 0.5, %v1654_v25 }
 0x28a   :  { %v1528_v11 = vmul.f32 0.044715, %v1496_v56  ;;  %v6388_v52 = vpop.f32.mrf.mxu2 }
 0x28b   :  { %v1718_v54 = vmul.f32 %v1686_v42, %v1412_v37  ;;  %v6392_v27 = vpop.f32.mrf.mxu3 }
 0x28c   :  { %v1560_v44 = vadd.f32 %v1528_v11, %v1417_v46  ;;  %v6394_v42 = vpop.f32.mrf.mxu1 }
 0x28d   :  { %v1419_v58 = vpop.f32.mrf.mxu0 }
 0x28e   :  { %v4676_v41 = vpop.eup %4675  ;;  %v1592_v23 = vmul.f32 0.7978846, %v1560_v44  ;;  %v1465_v31 = vmul.f32 %v1419_v58, %v1419_v58 }
 0x28f   :  { %v1655_v18 = vadd.f32 1.0, %v4676_v41 }
 0x290   :  { %v1497_v21 = vmul.f32 %v1465_v31, %v1419_v58  ;;  %4677 = vtanh.f32 %v1592_v23 }
 0x291   :  { %v1687_v45 = vmul.f32 0.5, %v1655_v18 }
 0x292   :  { %v1529_v28 = vmul.f32 0.044715, %v1497_v21 }
 0x293   :  { %v1719_v16 = vmul.f32 %v1687_v45, %v1414_v51  ;;  %v6396_v45 = vpop.f32.mrf.mxu2 }
 0x294   :  { %v1561_v55 = vadd.f32 %v1529_v28, %v1419_v58 }
 0x295   :  { %v1422_v13 = vpop.f32.mrf.mxu0  ;;  %v6368_v7 = vpack.c.bf16 %v1719_v16, %v1718_v54 }
 0x296   :  { %v1593_v3 = vmul.f32 0.7978846, %v1561_v55  ;;  %v1466_v19 = vmul.f32 %v1422_v13, %v1422_v13  ;;  %v4678_v26 = vpop.eup %4677  ;;  %v6398_v55 = vpop.f32.mrf.mxu3 }
 0x297   :  { %2006 = vmatmul.bf16.gmra.mxu1 %v6368_v7  ;;  %2095 = vmatmul.bf16.gmra.mxu2 %v6368_v7  ;;  %v1656_v47 = vadd.f32 1.0, %v4678_v26 }
 0x298   :  { %4679 = vtanh.f32 %v1593_v3  ;;  %v1498_v9 = vmul.f32 %v1466_v19, %v1422_v13  ;;  %2184 = vmatmul.bf16.gmra.mxu3 %v6368_v7  ;;  %2243 = vmatmul.bf16.gmra.mxu0 %v6322_v48 }
 0x299   :  { %v1688_v33 = vmul.f32 0.5, %v1656_v47  ;;  %v6411_v47 = vpop.f32.mrf.mxu1 }
 0x29a   :  { %v1530_v59 = vmul.f32 0.044715, %v1498_v9 }
 0x29b   :  { %v1720_v48 = vmul.f32 %v1688_v33, %v1417_v46 }
 0x29c   :  { %v1562_v37 = vadd.f32 %v1530_v59, %v1422_v13 }
 0x29d   :  { %v1424_v1 = vpop.f32.mrf.mxu0 }
 0x29e   :  { %v4680_v36 = vpop.eup %4679  ;;  %v1594_v29 = vmul.f32 0.7978846, %v1562_v37  ;;  %v1467_v22 = vmul.f32 %v1424_v1, %v1424_v1 }
 0x29f   :  { %v1657_v53 = vadd.f32 1.0, %v4680_v36  ;;  %v6413_v36 = vpop.f32.mrf.mxu2 }
 0x2a0   :  { %v1499_v51 = vmul.f32 %v1467_v22, %v1424_v1  ;;  %4681 = vtanh.f32 %v1594_v29 }
 0x2a1   :  { %v1689_v63 = vmul.f32 0.5, %v1657_v53 }
 0x2a2   :  { %v1531_v50 = vmul.f32 0.044715, %v1499_v51 }
 0x2a3   :  { %v1721_v15 = vmul.f32 %v1689_v63, %v1419_v58  ;;  %v6416_v63 = vpop.f32.mrf.mxu3 }
 0x2a4   :  { %v1563_v20 = vadd.f32 %v1531_v50, %v1424_v1 }
 0x2a5   :  { %v1427_v49 = vpop.f32.mrf.mxu0  ;;  %v6382_v14 = vpack.c.bf16 %v1721_v15, %v1720_v48 }
 0x2a6   :  { %v1595_v12 = vmul.f32 0.7978846, %v1563_v20  ;;  %v1468_v4 = vmul.f32 %v1427_v49, %v1427_v49  ;;  %v4682_v10 = vpop.eup %4681 }
 0x2a7   :  { %2011 = vmatmul.bf16.gmra.mxu1 %v6382_v14  ;;  %2100 = vmatmul.bf16.gmra.mxu2 %v6382_v14  ;;  %v1658_v56 = vadd.f32 1.0, %v4682_v10  ;;  %v6418_v10 = vpop.f32.mrf.mxu1 }
 0x2a8   :  { %4683 = vtanh.f32 %v1595_v12  ;;  %v1500_v0 = vmul.f32 %v1468_v4, %v1427_v49  ;;  %2189 = vmatmul.bf16.gmra.mxu3 %v6382_v14  ;;  %2248 = vmatmul.bf16.gmra.mxu0 %v6334_v2 }
 0x2a9   :  { %v1690_v23 = vmul.f32 0.5, %v1658_v56 }
 0x2aa   :  { %v1532_v46 = vmul.f32 0.044715, %v1500_v0 }
 0x2ab   :  { %v1722_v2 = vmul.f32 %v1690_v23, %v1422_v13  ;;  %v6436_v23 = vpop.f32.mrf.mxu3 }
 0x2ac   :  { %v1564_v11 = vadd.f32 %v1532_v46, %v1427_v49 }
 0x2ad   :  { %v1429_v25 = vpop.f32.mrf.mxu0 }
 0x2ae   :  { %v4684_v44 = vpop.eup %4683  ;;  %v1596_v58 = vmul.f32 0.7978846, %v1564_v11  ;;  %v1469_v41 = vmul.f32 %v1429_v25, %v1429_v25  ;;  %v6424_v11 = vpop.f32.mrf.mxu2 }
 0x2af   :  { %v1659_v31 = vadd.f32 1.0, %v4684_v44 }
 0x2b0   :  { %v1501_v18 = vmul.f32 %v1469_v41, %v1429_v25  ;;  %4685 = vtanh.f32 %v1596_v58 }
 0x2b1   :  { %v1691_v21 = vmul.f32 0.5, %v1659_v31 }
 0x2b2   :  { %v1533_v28 = vmul.f32 0.044715, %v1501_v18 }
 0x2b3   :  { %v1723_v54 = vmul.f32 %v1691_v21, %v1424_v1 }
 0x2b4   :  { %v1565_v16 = vadd.f32 %v1533_v28, %v1429_v25 }
 0x2b5   :  { %v6400_v3 = vpop.f32.mrf.mxu0  ;;  %v6402_v19 = vpack.c.bf16 %v1723_v54, %v1722_v2 }
 0x2b6   :  { %v1597_v26 = vmul.f32 0.7978846, %v1565_v16  ;;  %v1470_v9 = vmul.f32 %v6400_v3, %v6400_v3  ;;  %v4686_v59 = vpop.eup %4685 }
 0x2b7   :  { %2016 = vmatmul.bf16.gmra.mxu1 %v6402_v19  ;;  %2105 = vmatmul.bf16.gmra.mxu2 %v6402_v19  ;;  %v1660_v1 = vadd.f32 1.0, %v4686_v59 }
 0x2b8   :  { %4687 = vtanh.f32 %v1597_v26  ;;  %v1502_v13 = vmul.f32 %v1470_v9, %v6400_v3  ;;  %2194 = vmatmul.bf16.gmra.mxu3 %v6402_v19  ;;  %2253 = vmatmul.bf16.gmra.mxu0 %v6340_v35  ;;  %v6449_v26 = vpop.f32.mrf.mxu1 }
 0x2b9   :  { %v1692_v50 = vmul.f32 0.5, %v1660_v1 }
 0x2ba   :  { %v1534_v37 = vmul.f32 0.044715, %v1502_v13 }
 0x2bb   :  { %v1724_v12 = vmul.f32 %v1692_v50, %v1427_v49 }
 0x2bc   :  { %v1566_v29 = vadd.f32 %v1534_v37, %v6400_v3 }
 0x2bd   :  { %v1434_v22 = vpop.f32.mrf.mxu0 }
 0x2be   :  { %v4688_v33 = vpop.eup %4687  ;;  %v1598_v53 = vmul.f32 0.7978846, %v1566_v29  ;;  %v1471_v51 = vmul.f32 %v1434_v22, %v1434_v22 }
 0x2bf   :  { %v1661_v48 = vadd.f32 1.0, %v4688_v33  ;;  %v6459_v33 = vpop.f32.mrf.mxu2 }
 0x2c0   :  { %v1503_v15 = vmul.f32 %v1471_v51, %v1434_v22  ;;  %4689 = vtanh.f32 %v1598_v53 }
 0x2c1   :  { %v1693_v20 = vmul.f32 0.5, %v1661_v48 }
 0x2c2   :  { %v1535_v35 = vmul.f32 0.044715, %v1503_v15 }
 0x2c3   :  { %v1725_v4 = vmul.f32 %v1693_v20, %v1429_v25  ;;  %v1778_v25 = vld [vmem:[%s8200_s5] sm:$0xf]  ;;  %v6466_v20 = vpop.f32.mrf.mxu3 }
 0x2c4   :  { %v1567_v0 = vadd.f32 %v1535_v35, %v1434_v22  ;;  %v6438_v31 = vperm.slane %v1778_v25, 1  ;;  %v6440_v28 = vperm.slane %v1778_v25, 0  ;;  %v6457_v29 = vperm.slane %v1778_v25, 2 }
 0x2c5   :  { %v6420_v46 = vpop.f32.mrf.mxu0  ;;  %v6422_v56 = vpack.c.bf16 %v1725_v4, %v1724_v12  ;;  %v6464_v15 = vperm.slane %v1778_v25, 3  ;;  %v3109_v12 = vpop.permute.xlu0 %3108 }
 0x2c6   :  { %v1599_v44 = vmul.f32 0.7978846, %v1567_v0  ;;  %v1472_v58 = vmul.f32 %v6420_v46, %v6420_v46  ;;  %v4690_v41 = vpop.eup %4689  ;;  %v6455_v1 = vadd.f32 %v6364_v62, %v6440_v28  ;;  %v6472_v4 = vadd.f32 %v6370_v6, %v6457_v29 }
 0x2c7   :  { %2021 = vmatmul.bf16.gmra.mxu1 %v6422_v56  ;;  %2110 = vmatmul.bf16.gmra.mxu2 %v6422_v56  ;;  %v1662_v21 = vadd.f32 1.0, %v4690_v41  ;;  %v6476_v0 = vadd.f32 %v6378_v8, %v6438_v31  ;;  %vm3205_vm3 = vcmp.eq.s32.totalorder %v5731_v17, %v3109_v12  ;;  %vm3204_vm2 = vcmp.eq.s32.totalorder %v5379_v40, %v3109_v12 }
 0x2c8   :  { %4691 = vtanh.f32 %v1599_v44  ;;  %v1504_v49 = vmul.f32 %v1472_v58, %v6420_v46  ;;  %2199 = vmatmul.bf16.gmra.mxu3 %v6422_v56  ;;  %2258 = vmatmul.bf16.gmra.mxu0 %v6346_v32  ;;  %v6447_v32 = vadd.f32 %v6366_v34, %v6438_v31  ;;  %v3106_v34 = vpop.permute.xlu2 %3105  ;;  %vm3206_vm9 = vcmp.eq.s32.totalorder %v5736_v38, %v3109_v12 }
 0x2c9   :  { %v1694_v13 = vmul.f32 0.5, %v1662_v21  ;;  %vm3201_vm14 = vcmp.eq.s32.totalorder %v5731_v17, %v3106_v34  ;;  %vm3200_vm6 = vcmp.eq.s32.totalorder %v5379_v40, %v3106_v34  ;;  %v6496_v21 = vpop.f32.mrf.mxu1  ;;  %vm3202_vm12 = vcmp.eq.s32.totalorder %v5736_v38, %v3106_v34 }
 0x2ca   :  { %v1536_v18 = vmul.f32 0.044715, %v1504_v49  ;;  %v2304_v50 = vmax.f32 %v6455_v1, %v6447_v32  ;;  %v3329_v58 = vsel %vm3201_vm14, %v6447_v32, 0.0  ;;  %vm3203_vm15 = vcmp.eq.s32.totalorder %v5739_v39, %v3106_v34 }
 0x2cb   :  { %v1726_v62 = vmul.f32 %v1694_v13, %v6400_v3  ;;  %v6484_v3 = vadd.f32 %v6376_v61, %v6440_v28  ;;  %v3333_v61 = vsel %vm3205_vm3, %v6476_v0, 0.0  ;;  %v6507_v13 = vadd.f32 %v6380_v5, %v6457_v29  ;;  %v6522_v5 = vpop.f32.mrf.mxu3 }
 0x2cc   :  { %v1568_v2 = vadd.f32 %v1536_v18, %v6420_v46  ;;  %v2305_v6 = vmax.f32 %v2304_v50, %v6472_v4  ;;  %v3328_v18 = vsel %vm3200_vm6, %v6455_v1, 0.0  ;;  %v6516_v50 = vadd.f32 %v6388_v52, %v6438_v31 }
 0x2cd   :  { %v6443_v54 = vpop.f32.mrf.mxu0  ;;  %v6528_v52 = vadd.f32 %v6384_v57, %v6440_v28  ;;  %vm3207_vm8 = vcmp.eq.s32.totalorder %v5739_v39, %v3109_v12  ;;  %v6546_v12 = vadd.f32 %v6392_v27, %v6457_v29  ;;  %v6652_v30 = vadd.f32 %v6436_v23, %v6457_v29 }
 0x2ce   :  { %v4692_v16 = vpop.eup %4691  ;;  %v1600_v9 = vmul.f32 0.7978846, %v1568_v2  ;;  %v1473_v59 = vmul.f32 %v6443_v54, %v6443_v54  ;;  %v6667_v23 = vadd.f32 %v6449_v26, %v6440_v28 }
 0x2cf   :  { %v1663_v37 = vadd.f32 1.0, %v4692_v16  ;;  %v3456_v16 = vadd.f32 %v3329_v58, %v3328_v18  ;;  %8430 = vst [vmem:[#allocation45_spill] sm:$0xff] %v6652_v30 }
 0x2d0   :  { %v1505_v53 = vmul.f32 %v1473_v59, %v6443_v54  ;;  %4693 = vtanh.f32 %v1600_v9  ;;  %v6502_v9 = vpop.permute.xlu1 %3111  ;;  %v3332_v59 = vsel %vm3204_vm2, %v6484_v3, 0.0  ;;  %8432 = vst [vmem:[#allocation47_spill] sm:$0xff] %v6667_v23 }
 0x2d1   :  { %v1695_v51 = vmul.f32 0.5, %v1663_v37  ;;  %v6509_v37 = vpop.f32.mrf.mxu2  ;;  %vm3209_vm7 = vcmp.eq.s32.totalorder %v5731_v17, %v6502_v9  ;;  %vm3208_vm10 = vcmp.eq.s32.totalorder %v5379_v40, %v6502_v9  ;;  %vm3210_vm11 = vcmp.eq.s32.totalorder %v5736_v38, %v6502_v9 }
 0x2d2   :  { %v1537_v48 = vmul.f32 0.044715, %v1505_v53  ;;  %v2309_v53 = vmax.f32 %v6484_v3, %v6476_v0  ;;  %vm3211_vm1 = vcmp.eq.s32.totalorder %v5739_v39, %v6502_v9 }
 0x2d3   :  { %v1727_v35 = vmul.f32 %v1695_v51, %v1434_v22  ;;  %v3461_v51 = vadd.f32 %v3333_v61, %v3332_v59  ;;  %v3337_v61 = vsel %vm3209_vm7, %v6516_v50, 0.0 }
 0x2d4   :  { %v1569_v44 = vadd.f32 %v1537_v48, %v6443_v54  ;;  %v3330_v48 = vsel %vm3202_vm12, %v6472_v4, 0.0 }
 0x2d5   :  { %v2224_v41 = vpop.f32.mrf.mxu0  ;;  %v6480_v49 = vpack.c.bf16 %v1727_v35, %v1726_v62 }
 0x2d6   :  { %v1601_v22 = vmul.f32 0.7978846, %v1569_v44  ;;  %v6487_v25 = vadd.f32 %v2224_v41, %v6464_v15  ;;  %v4694_v8 = vpop.eup %4693  ;;  %v3457_v44 = vadd.f32 %v3456_v16, %v3330_v48  ;;  %v2310_v41 = vmax.f32 %v2309_v53, %v6507_v13 }
 0x2d7   :  { %2026 = vmatmul.bf16.gmra.mxu1 %v6480_v49  ;;  %2115 = vmatmul.bf16.gmra.mxu2 %v6480_v49  ;;  %v3336_v53 = vsel %vm3208_vm10, %v6528_v52, 0.0 }
 0x2d8   :  { %4695 = vtanh.f32 %v1601_v22  ;;  %2204 = vmatmul.bf16.gmra.mxu3 %v6480_v49  ;;  %2263 = vmatmul.bf16.gmra.mxu0 %v6352_v43  ;;  %v2306_v2 = vmax.f32 %v2305_v6, %v6487_v25  ;;  %v1664_v43 = vadd.f32 1.0, %v4694_v8  ;;  %v3331_v35 = vsel %vm3203_vm15, %v6487_v25, 0.0 }
 0x2d9   :  { %v3334_v22 = vsel %vm3206_vm9, %v6507_v13, 0.0  ;;  %v3458_v16 = vadd.f32 %v3457_v44, %v3331_v35  ;;  %v3466_v44 = vadd.f32 %v3337_v61, %v3336_v53 }
 0x2da   :  { %2307 = vmax.xlane.f32.xlu2 %v2306_v2  ;;  %v1696_v6 = vmul.f32 0.5, %v1664_v43  ;;  %v3462_v18 = vadd.f32 %v3461_v51, %v3334_v22  ;;  %v2314_v43 = vmax.f32 %v6528_v52, %v6516_v50  ;;  %v6548_v51 = vpop.f32.mrf.mxu1  ;;  %v6556_v22 = vpop.f32.mrf.mxu2 }
 0x2dd   :  { %v2226_v62 = vpop.f32.mrf.mxu0 }
 0x2de   :  { %v4696_v58 = vpop.eup %4695  ;;  %v6531_v34 = vadd.f32 %v2226_v62, %v6464_v15  ;;  %v1728_v62 = vmul.f32 %v1696_v6, %v6420_v46  ;;  %v6564_v46 = vadd.f32 %v6394_v42, %v6440_v28  ;;  %v3338_v6 = vsel %vm3210_vm11, %v6546_v12, 0.0 }
 0x2df   :  { %v1665_v8 = vadd.f32 1.0, %v4696_v58  ;;  %v3115_v58 = vpop.permute.xlu0 %3114  ;;  %v3467_v42 = vadd.f32 %v3466_v44, %v3338_v6 }
 0x2e0   :  { %v2311_v2 = vmax.f32 %v2310_v41, %v6531_v34  ;;  %v3335_v57 = vsel %vm3207_vm8, %v6531_v34, 0.0  ;;  %v6554_v41 = vadd.f32 %v6396_v45, %v6438_v31  ;;  %v2315_v45 = vmax.f32 %v2314_v43, %v6546_v12 }
 0x2e1   :  { %v1697_v59 = vmul.f32 0.5, %v1665_v8  ;;  %v3463_v48 = vadd.f32 %v3462_v18, %v3335_v57  ;;  %vm3213_vm13 = vcmp.eq.s32.totalorder %v5731_v17, %v3115_v58  ;;  %v6572_v18 = vpop.f32.mrf.mxu3  ;;  %vm3212_vm4 = vcmp.eq.s32.totalorder %v5379_v40, %v3115_v58 }
 0x2e2   :  { %2312 = vmax.xlane.f32.xlu0 %v2311_v2  ;;  %3459 = vadd.xlane.f32.xlu2 %v3458_v16  ;;  %v3341_v61 = vsel %vm3213_vm13, %v6554_v41, 0.0  ;;  %v2319_v9 = vmax.f32 %v6564_v46, %v6554_v41  ;;  %v6593_v43 = vadd.f32 %v6413_v36, %v6438_v31  ;;  %vm3214_vm5 = vcmp.eq.s32.totalorder %v5736_v38, %v3115_v58  ;;  %v6602_v44 = vpop.f32.mrf.mxu2 }
 0x2e3   :  { %v1729_v35 = vmul.f32 %v1697_v59, %v6443_v54  ;;  %3464 = vadd.xlane.f32.xlu1 %v3463_v48  ;;  %v3340_v59 = vsel %vm3212_vm4, %v6564_v46, 0.0  ;;  %v6587_v48 = vadd.f32 %v6398_v55, %v6457_v29  ;;  %v6600_v55 = vadd.f32 %v6411_v47, %v6440_v28 }
 0x2e4   :  { %v3471_v53 = vadd.f32 %v3341_v61, %v3340_v59  ;;  %8424 = vst [vmem:[#allocation39_spill] sm:$0xff] %v6593_v43  ;;  %vm3215_vm14 = vcmp.eq.s32.totalorder %v5739_v39, %v3115_v58  ;;  %v6622_v58 = vadd.f32 %v6416_v63, %v6457_v29 }
 0x2e5   :  { %v2229_v8 = vpop.f32.mrf.mxu0  ;;  %v6558_v27 = vpack.c.bf16 %v1729_v35, %v1728_v62  ;;  %v6595_v62 = vpop.f32.mrf.mxu1  ;;  %8425 = vst [vmem:[#allocation40_spill] sm:$0xff] %v6600_v55  ;;  %v2320_v6 = vmax.f32 %v2319_v9, %v6587_v48  ;;  %v2324_v59 = vmax.f32 %v6600_v55, %v6593_v43 }
 0x2e6   :  { %v6567_v54 = vadd.f32 %v2229_v8, %v6464_v15  ;;  %8426 = vst [vmem:[#allocation41_spill] sm:$0xff] %v6622_v58 }
 0x2e7   :  { %2031 = vmatmul.bf16.gmra.mxu1 %v6558_v27  ;;  %2120 = vmatmul.bf16.gmra.mxu2 %v6558_v27 }
 0x2e8   :  { %2209 = vmatmul.bf16.gmra.mxu3 %v6558_v27  ;;  %2268 = vmatmul.bf16.gmra.mxu0 %v6358_v60  ;;  %v3339_v2 = vsel %vm3211_vm1, %v6567_v54, 0.0  ;;  %v2316_v16 = vmax.f32 %v2315_v45, %v6567_v54  ;;  %v3118_v60 = vpop.permute.xlu2 %3117  ;;  %v3342_v45 = vsel %vm3214_vm5, %v6587_v48, 0.0 }
 0x2e9   :  { %v3468_v57 = vadd.f32 %v3467_v42, %v3339_v2  ;;  %vm3217_vm0 = vcmp.eq.s32.totalorder %v5731_v17, %v3118_v60  ;;  %v3472_v36 = vadd.f32 %v3471_v53, %v3342_v45  ;;  %vm3216_vm6 = vcmp.eq.s32.totalorder %v5379_v40, %v3118_v60  ;;  %v6615_v2 = vpop.f32.mrf.mxu3  ;;  %v3121_v53 = vpop.permute.xlu1 %3120 }
 0x2ea   :  { %v3345_v42 = vsel %vm3217_vm0, %v6593_v43, 0.0  ;;  %vm3218_vm3 = vcmp.eq.s32.totalorder %v5736_v38, %v3118_v60  ;;  %v6631_v45 = vadd.f32 %v6418_v10, %v6440_v28  ;;  %vm3221_vm2 = vcmp.eq.s32.totalorder %v5731_v17, %v3121_v53 }
 0x2eb   :  { %3469 = vadd.xlane.f32.xlu0 %v3468_v57  ;;  %2317 = vmax.xlane.f32.xlu1 %v2316_v16  ;;  %v3344_v57 = vsel %vm3216_vm6, %v6600_v55, 0.0  ;;  %vm3219_vm12 = vcmp.eq.s32.totalorder %v5739_v39, %v3118_v60  ;;  %vm3220_vm15 = vcmp.eq.s32.totalorder %v5379_v40, %v3121_v53  ;;  %vm3222_vm7 = vcmp.eq.s32.totalorder %v5736_v38, %v3121_v53 }
 0x2ec   :  { %v3476_v9 = vadd.f32 %v3345_v42, %v3344_v57  ;;  %8428 = vst [vmem:[#allocation43_spill] sm:$0xff] %v6631_v45  ;;  %v3346_v42 = vsel %vm3218_vm3, %v6622_v58, 0.0  ;;  %vm3223_vm8 = vcmp.eq.s32.totalorder %v5739_v39, %v3121_v53  ;;  %v6687_v53 = vadd.f32 %v6466_v20, %v6457_v29 }
 0x2ed   :  { %v2231_v35 = vpop.f32.mrf.mxu0 }
 0x2ee   :  { %v6605_v8 = vadd.f32 %v2231_v35, %v6464_v15  ;;  %v6626_v35 = vadd.f32 %v6424_v11, %v6438_v31  ;;  %v3477_v11 = vadd.f32 %v3476_v9, %v3346_v42  ;;  %v6660_v42 = vadd.f32 %v6459_v33, %v6438_v31  ;;  %8434 = vst [vmem:[#allocation49_spill] sm:$0xff] %v6687_v53 }
 0x2f0   :  { %v2321_v61 = vmax.f32 %v2320_v6, %v6605_v8  ;;  %v3343_v47 = vsel %vm3215_vm14, %v6605_v8, 0.0  ;;  %8427 = vst [vmem:[#allocation42_spill] sm:$0xff] %v6626_v35  ;;  %v2329_v60 = vmax.f32 %v6631_v45, %v6626_v35 }
 0x2f1   :  { %v3473_v16 = vadd.f32 %v3472_v36, %v3343_v47  ;;  %v6633_v36 = vpop.f32.mrf.mxu1  ;;  %v3349_v47 = vsel %vm3221_vm2, %v6626_v35, 0.0  ;;  %v6656_v9 = vpop.f32.mrf.mxu3  ;;  %8431 = vst [vmem:[#allocation46_spill] sm:$0xff] %v6660_v42 }
 0x2f2   :  { %2322 = vmax.xlane.f32.xlu2 %v2321_v61  ;;  %v2325_v61 = vmax.f32 %v2324_v59, %v6622_v58 }
 0x2f3   :  { %3474 = vadd.xlane.f32.xlu1 %v3473_v16  ;;  %v6643_v16 = vpop.f32.mrf.mxu2 }
 0x2f5   :  { %v2234_v6 = vpop.f32.mrf.mxu0 }
 0x2f6   :  { %v6636_v63 = vadd.f32 %v2234_v6, %v6464_v15  ;;  %v3348_v6 = vsel %vm3220_vm15, %v6631_v45, 0.0 }
 0x2f8   :  { %8429 = vst [vmem:[#allocation44_spill] sm:$0xff] %v6636_v63  ;;  %2273 = vmatmul.bf16.gmra.mxu0 %v6368_v7  ;;  %v2326_v10 = vmax.f32 %v2325_v61, %v6636_v63  ;;  %v3347_v57 = vsel %vm3219_vm12, %v6636_v63, 0.0  ;;  %v3481_v7 = vadd.f32 %v3349_v47, %v3348_v6  ;;  %v3124_v61 = vpop.permute.xlu0 %3123  ;;  %v3350_v47 = vsel %vm3222_vm7, %v6652_v30, 0.0  ;;  %v3127_v6 = vpop.permute.xlu2 %3126 }
 0x2f9   :  { %v3478_v59 = vadd.f32 %v3477_v11, %v3347_v57  ;;  %v6663_v57 = vpop.permute.xlu1 %3129  ;;  %vm3225_vm9 = vcmp.eq.s32.totalorder %v5731_v17, %v3124_v61  ;;  %v6677_v35 = vpop.f32.mrf.mxu1  ;;  %vm3224_vm10 = vcmp.eq.s32.totalorder %v5379_v40, %v3124_v61  ;;  %vm3226_vm11 = vcmp.eq.s32.totalorder %v5736_v38, %v3124_v61 }
 0x2fa   :  { %2327 = vmax.xlane.f32.xlu2 %v2326_v10  ;;  %v3482_v33 = vadd.f32 %v3481_v7, %v3350_v47  ;;  %v3353_v24 = vsel %vm3225_vm9, %v6660_v42, 0.0  ;;  %vm3229_vm13 = vcmp.eq.s32.totalorder %v5731_v17, %v3127_v6  ;;  %vm3227_vm1 = vcmp.eq.s32.totalorder %v5739_v39, %v3124_v61 }
 0x2fb   :  { %3479 = vadd.xlane.f32.xlu0 %v3478_v59  ;;  %v2330_v59 = vmax.f32 %v2329_v60, %v6652_v30  ;;  %v3352_v60 = vsel %vm3224_vm10, %v6667_v23, 0.0  ;;  %v2334_v30 = vmax.f32 %v6667_v23, %v6660_v42  ;;  %v6689_v7 = vpop.f32.mrf.mxu2  ;;  %vm3228_vm4 = vcmp.eq.s32.totalorder %v5379_v40, %v3127_v6 }
 0x2fc   :  { %v3486_v47 = vadd.f32 %v3353_v24, %v3352_v60  ;;  %v3354_v24 = vsel %vm3226_vm11, %v6687_v53, 0.0  ;;  %vm3230_vm5 = vcmp.eq.s32.totalorder %v5736_v38, %v3127_v6  ;;  %vm3231_vm0 = vcmp.eq.s32.totalorder %v5739_v39, %v3127_v6 }
 0x2fd   :  { %v2236_v11 = vpop.f32.mrf.mxu0  ;;  %v6764_v6 = vadd.f32 %v6602_v44, %v6438_v31  ;;  %vm3233_vm14 = vcmp.eq.s32.totalorder %v5731_v17, %v6663_v57  ;;  %vm3232_vm6 = vcmp.eq.s32.totalorder %v5379_v40, %v6663_v57  ;;  %vm3234_vm12 = vcmp.eq.s32.totalorder %v5736_v38, %v6663_v57 }
 0x2fe   :  { %v6670_v10 = vadd.f32 %v2236_v11, %v6464_v15  ;;  %vm3235_vm15 = vcmp.eq.s32.totalorder %v5739_v39, %v6663_v57 }
 0x2ff   :  { %8443 = vst [vmem:[#allocation58_spill] sm:$0xff] %v6764_v6 }
 0x300   :  { %8433 = vst [vmem:[#allocation48_spill] sm:$0xff] %v6670_v10  ;;  %v2331_v26 = vmax.f32 %v2330_v59, %v6670_v10  ;;  %v3351_v45 = vsel %vm3223_vm8, %v6670_v10, 0.0  ;;  %v6693_v59 = vadd.f32 %v6509_v37, %v6438_v31  ;;  %v6695_v10 = vpop.f32.mrf.mxu3  ;;  %v3487_v37 = vadd.f32 %v3486_v47, %v3354_v24  ;;  %v6711_v60 = vpop.permute.xlu0 %3132 }
 0x301   :  { %v3483_v11 = vadd.f32 %v3482_v33, %v3351_v45  ;;  %v6700_v33 = vadd.f32 %v6496_v21, %v6440_v28  ;;  %v6723_v47 = vadd.f32 %v6522_v5, %v6457_v29  ;;  %v6725_v24 = vpop.f32.mrf.mxu1  ;;  %vm3237_vm3 = vcmp.eq.s32.totalorder %v5731_v17, %v6711_v60 }
 0x302   :  { %8435 = vst [vmem:[#allocation50_spill] sm:$0xff] %v6693_v59  ;;  %v3357_v42 = vsel %vm3229_vm13, %v6693_v59, 0.0  ;;  %vm3236_vm2 = vcmp.eq.s32.totalorder %v5379_v40, %v6711_v60  ;;  %vm3238_vm7 = vcmp.eq.s32.totalorder %v5736_v38, %v6711_v60  ;;  %vm3239_vm8 = vcmp.eq.s32.totalorder %v5739_v39, %v6711_v60 }
 0x303   :  { %2332 = vmax.xlane.f32.xlu0 %v2331_v26  ;;  %3484 = vadd.xlane.f32.xlu2 %v3483_v11  ;;  %8436 = vst [vmem:[#allocation51_spill] sm:$0xff] %v6700_v33  ;;  %v2335_v26 = vmax.f32 %v2334_v30, %v6687_v53  ;;  %v6709_v11 = vpop.permute.xlu1 %3138  ;;  %v6718_v30 = vpop.permute.xlu2 %3135  ;;  %v3356_v61 = vsel %vm3228_vm4, %v6700_v33, 0.0  ;;  %v6845_v60 = vadd.f32 %v6656_v9, %v6457_v29 }
 0x304   :  { %8438 = vst [vmem:[#allocation53_spill] sm:$0xff] %v6723_v47  ;;  %vm3241_vm9 = vcmp.eq.s32.totalorder %v5731_v17, %v6718_v30  ;;  %vm3240_vm10 = vcmp.eq.s32.totalorder %v5379_v40, %v6718_v30  ;;  %vm3242_vm11 = vcmp.eq.s32.totalorder %v5736_v38, %v6718_v30  ;;  %v6861_v9 = vadd.f32 %v6677_v35, %v6440_v28 }
 0x305   :  { %v2239_v45 = vpop.f32.mrf.mxu0  ;;  %8447 = vst [vmem:[#allocation62_spill] sm:$0xff] %v6845_v60  ;;  %vm3245_vm13 = vcmp.eq.s32.totalorder %v5731_v17, %v6709_v11  ;;  %vm3244_vm4 = vcmp.eq.s32.totalorder %v5379_v40, %v6709_v11 }
 0x306   :  { %v6703_v20 = vadd.f32 %v2239_v45, %v6464_v15  ;;  %8449 = vst [vmem:[#allocation64_spill] sm:$0xff] %v6861_v9 }
 0x308   :  { %8437 = vst [vmem:[#allocation52_spill] sm:$0xff] %v6703_v20  ;;  %2278 = vmatmul.bf16.gmra.mxu0 %v6382_v14  ;;  %v2336_v21 = vmax.f32 %v2335_v26, %v6703_v20  ;;  %v3355_v45 = vsel %vm3227_vm1, %v6703_v20, 0.0  ;;  %v2339_v14 = vmax.f32 %v6700_v33, %v6693_v59  ;;  %v3491_v26 = vadd.f32 %v3357_v42, %v3356_v61  ;;  %v6729_v20 = vpop.f32.mrf.mxu2  ;;  %v6741_v63 = vpop.f32.mrf.mxu3 }
 0x309   :  { %v3488_v53 = vadd.f32 %v3487_v37, %v3355_v45  ;;  %v6734_v37 = vadd.f32 %v6556_v22, %v6438_v31  ;;  %v6752_v33 = vpop.permute.xlu0 %3141  ;;  %vm3243_vm1 = vcmp.eq.s32.totalorder %v5739_v39, %v6718_v30 }
 0x30a   :  { %2337 = vmax.xlane.f32.xlu1 %v2336_v21  ;;  %v2340_v45 = vmax.f32 %v2339_v14, %v6723_v47  ;;  %v3358_v21 = vsel %vm3230_vm5, %v6723_v47, 0.0  ;;  %vm3246_vm5 = vcmp.eq.s32.totalorder %v5736_v38, %v6709_v11 }
 0x30b   :  { %3489 = vadd.xlane.f32.xlu0 %v3488_v53  ;;  %8439 = vst [vmem:[#allocation54_spill] sm:$0xff] %v6734_v37  ;;  %v3492_v42 = vadd.f32 %v3491_v26, %v3358_v21  ;;  %v6746_v53 = vadd.f32 %v6548_v51, %v6440_v28  ;;  %v6756_v47 = vpop.permute.xlu2 %3144  ;;  %v6760_v51 = vadd.f32 %v6572_v18, %v6457_v29  ;;  %v6766_v26 = vpop.f32.mrf.mxu1  ;;  %v3361_v21 = vsel %vm3233_vm14, %v6734_v37, 0.0 }
 0x30c   :  { %vm3247_vm14 = vcmp.eq.s32.totalorder %v5739_v39, %v6709_v11 }
 0x30d   :  { %v2241_v23 = vpop.f32.mrf.mxu0  ;;  %8441 = vst [vmem:[#allocation56_spill] sm:$0xff] %v6746_v53  ;;  %v2344_v14 = vmax.f32 %v6746_v53, %v6734_v37 }
 0x30e   :  { %v6737_v5 = vadd.f32 %v2241_v23, %v6464_v15  ;;  %v6750_v23 = vpop.permute.xlu1 %3147  ;;  %8442 = vst [vmem:[#allocation57_spill] sm:$0xff] %v6760_v51 }
 0x30f   :  { %v2345_v44 = vmax.f32 %v2344_v14, %v6760_v51 }
 0x310   :  { %8440 = vst [vmem:[#allocation55_spill] sm:$0xff] %v6737_v5  ;;  %v2341_v61 = vmax.f32 %v2340_v45, %v6737_v5  ;;  %v3359_v22 = vsel %vm3231_vm0, %v6737_v5, 0.0  ;;  %vm3249_vm0 = vcmp.eq.s32.totalorder %v5731_v17, %v6752_v33 }
 0x311   :  { %v3493_v59 = vadd.f32 %v3492_v42, %v3359_v22  ;;  %v6773_v42 = vadd.f32 %v6595_v62, %v6440_v28  ;;  %v3365_v22 = vsel %vm3237_vm3, %v6764_v6, 0.0  ;;  %v6804_v58 = vpop.permute.xlu0 %3150  ;;  %vm3250_vm3 = vcmp.eq.s32.totalorder %v5736_v38, %v6752_v33 }
 0x312   :  { %2342 = vmax.xlane.f32.xlu2 %v2341_v61  ;;  %v3360_v61 = vsel %vm3232_vm6, %v6746_v53, 0.0  ;;  %v6798_v53 = vadd.f32 %v6615_v2, %v6457_v29  ;;  %vm3248_vm6 = vcmp.eq.s32.totalorder %v5379_v40, %v6752_v33 }
 0x313   :  { %3494 = vadd.xlane.f32.xlu1 %v3493_v59  ;;  %8444 = vst [vmem:[#allocation59_spill] sm:$0xff] %v6773_v42  ;;  %v6775_v59 = vpop.f32.mrf.mxu2  ;;  %v3496_v14 = vadd.f32 %v3361_v21, %v3360_v61  ;;  %v3364_v37 = vsel %vm3236_vm2, %v6773_v42, 0.0  ;;  %v2349_v5 = vmax.f32 %v6773_v42, %v6764_v6  ;;  %v6808_v21 = vadd.f32 %v6643_v16, %v6438_v31  ;;  %v6813_v2 = vpop.permute.xlu2 %3153 }
 0x314   :  { %8446 = vst [vmem:[#allocation61_spill] sm:$0xff] %v6798_v53  ;;  %v3362_v61 = vsel %vm3234_vm12, %v6760_v51, 0.0  ;;  %v6822_v16 = vpop.f32.mrf.mxu1  ;;  %v3366_v51 = vsel %vm3238_vm7, %v6798_v53, 0.0  ;;  %vm3253_vm2 = vcmp.eq.s32.totalorder %v5731_v17, %v6756_v47  ;;  %vm3251_vm12 = vcmp.eq.s32.totalorder %v5739_v39, %v6752_v33 }
 0x315   :  { %v2244_v45 = vpop.f32.mrf.mxu0  ;;  %v3497_v42 = vadd.f32 %v3496_v14, %v3362_v61  ;;  %v2350_v57 = vmax.f32 %v2349_v5, %v6798_v53  ;;  %v3369_v61 = vsel %vm3241_vm9, %v6808_v21, 0.0  ;;  %vm3254_vm7 = vcmp.eq.s32.totalorder %v5736_v38, %v6756_v47 }
 0x316   :  { %v6778_v18 = vadd.f32 %v2244_v45, %v6464_v15  ;;  %v6791_v45 = vpop.f32.mrf.mxu3  ;;  %vm3255_vm9 = vcmp.eq.s32.totalorder %v5739_v39, %v6756_v47 }
 0x318   :  { %8445 = vst [vmem:[#allocation60_spill] sm:$0xff] %v6778_v18  ;;  %2283 = vmatmul.bf16.gmra.mxu0 %v6402_v19  ;;  %v2346_v62 = vmax.f32 %v2345_v44, %v6778_v18  ;;  %v3501_v19 = vadd.f32 %v3365_v22, %v3364_v37  ;;  %v6802_v44 = vpop.permute.xlu1 %3156  ;;  %v3363_v6 = vsel %vm3235_vm15, %v6778_v18, 0.0  ;;  %v6820_v37 = vadd.f32 %v6633_v36, %v6440_v28 }
 0x319   :  { %v3498_v43 = vadd.f32 %v3497_v42, %v3363_v6  ;;  %v6851_v42 = vadd.f32 %v6689_v7, %v6438_v31  ;;  %vm3252_vm15 = vcmp.eq.s32.totalorder %v5379_v40, %v6756_v47 }
 0x31a   :  { %2347 = vmax.xlane.f32.xlu0 %v2346_v62  ;;  %v3502_v14 = vadd.f32 %v3501_v19, %v3366_v51  ;;  %v3368_v53 = vsel %vm3240_vm10, %v6820_v37, 0.0  ;;  %v2354_v55 = vmax.f32 %v6820_v37, %v6808_v21  ;;  %vm3256_vm10 = vcmp.eq.s32.totalorder %v5379_v40, %v6750_v23 }
 0x31b   :  { %v6834_v36 = vpop.f32.mrf.mxu2  ;;  %v3506_v6 = vadd.f32 %v3369_v61, %v3368_v53  ;;  %8448 = vst [vmem:[#allocation63_spill] sm:$0xff] %v6851_v42  ;;  %v3370_v53 = vsel %vm3242_vm11, %v6845_v60, 0.0  ;;  %v2359_v30 = vmax.f32 %v6861_v9, %v6851_v42  ;;  %vm3258_vm11 = vcmp.eq.s32.totalorder %v5736_v38, %v6750_v23 }
 0x31c   :  { %v2355_v7 = vmax.f32 %v2354_v55, %v6845_v60  ;;  %v6875_v35 = vpop.f32.mrf.mxu1  ;;  %v3372_v60 = vsel %vm3244_vm4, %v6861_v9, 0.0  ;;  %vm3261_vm4 = vcmp.eq.s32.totalorder %v5731_v17, %v6804_v58 }
 0x31d   :  { %v2246_v62 = vpop.f32.mrf.mxu0  ;;  %v3507_v61 = vadd.f32 %v3506_v6, %v3370_v53  ;;  %v6887_v6 = vadd.f32 %v6695_v10, %v6457_v29 }
 0x31e   :  { %v6825_v22 = vadd.f32 %v2246_v62, %v6464_v15  ;;  %v6847_v51 = vpop.f32.mrf.mxu3 }
 0x31f   :  { %8451 = vst [vmem:[#allocation66_spill] sm:$0xff] %v6887_v6 }
 0x320   :  { %v2351_v18 = vmax.f32 %v2350_v57, %v6825_v22  ;;  %v3367_v62 = vsel %vm3239_vm8, %v6825_v22, 0.0  ;;  %v6855_v57 = vpop.permute.xlu1 %3165  ;;  %vm3257_vm8 = vcmp.eq.s32.totalorder %v5731_v17, %v6750_v23 }
 0x321   :  { %v3503_v5 = vadd.f32 %v3502_v14, %v3367_v62  ;;  %v6857_v14 = vpop.permute.xlu0 %3159  ;;  %v3373_v62 = vsel %vm3245_vm13, %v6851_v42, 0.0  ;;  %vm3265_vm13 = vcmp.eq.s32.totalorder %v5731_v17, %v6813_v2 }
 0x322   :  { %2352 = vmax.xlane.f32.xlu1 %v2351_v18  ;;  %3499 = vadd.xlane.f32.xlu0 %v3498_v43  ;;  %v6868_v18 = vpop.permute.xlu2 %3162 }
 0x323   :  { %3504 = vadd.xlane.f32.xlu2 %v3503_v5  ;;  %v6889_v53 = vpop.f32.mrf.mxu2 }
 0x325   :  { %v2249_v19 = vpop.f32.mrf.mxu0 }
 0x326   :  { %v6864_v43 = vadd.f32 %v2249_v19, %v6464_v15 }
 0x328   :  { %8450 = vst [vmem:[#allocation65_spill] sm:$0xff] %v6864_v43  ;;  %2288 = vmatmul.bf16.gmra.mxu0 %v6422_v56  ;;  %v3371_v5 = vsel %vm3243_vm1, %v6864_v43, 0.0  ;;  %v2356_v19 = vmax.f32 %v2355_v7, %v6864_v43  ;;  %v3511_v56 = vadd.f32 %v3373_v62, %v3372_v60  ;;  %v6893_v7 = vadd.f32 %v6729_v20, %v6438_v31  ;;  %v6895_v43 = vpop.f32.mrf.mxu3  ;;  %v6912_v62 = vpop.permute.xlu1 %3174 }
 0x329   :  { %v3508_v55 = vadd.f32 %v3507_v61, %v3371_v5  ;;  %v6901_v5 = vadd.f32 %v6725_v24, %v6440_v28  ;;  %v2360_v60 = vmax.f32 %v2359_v30, %v6887_v6  ;;  %8455 = vst [vmem:[#allocation70_spill] sm:$0xff] %v6912_v62  ;;  %v6934_v62 = vadd.f32 %v6775_v59, %v6438_v31 }
 0x32a   :  { %8452 = vst [vmem:[#allocation67_spill] sm:$0xff] %v6893_v7  ;;  %v3377_v24 = vsel %vm3249_vm0, %v6893_v7, 0.0  ;;  %v6919_v9 = vpop.permute.xlu2 %3171  ;;  %vm3260_vm1 = vcmp.eq.s32.totalorder %v5379_v40, %v6804_v58  ;;  %vm3264_vm0 = vcmp.eq.s32.totalorder %v5379_v40, %v6813_v2 }
 0x32b   :  { %3509 = vadd.xlane.f32.xlu0 %v3508_v55  ;;  %2357 = vmax.xlane.f32.xlu2 %v2356_v19  ;;  %8453 = vst [vmem:[#allocation68_spill] sm:$0xff] %v6901_v5  ;;  %v3374_v19 = vsel %vm3246_vm5, %v6887_v6, 0.0  ;;  %v6914_v55 = vpop.permute.xlu0 %3168  ;;  %v3376_v6 = vsel %vm3248_vm6, %v6901_v5, 0.0  ;;  %v2364_v11 = vmax.f32 %v6901_v5, %v6893_v7  ;;  %vm3259_vm5 = vcmp.eq.s32.totalorder %v5739_v39, %v6750_v23 }
 0x32c   :  { %v3512_v20 = vadd.f32 %v3511_v56, %v3374_v19  ;;  %v6928_v56 = vadd.f32 %v6741_v63, %v6457_v29  ;;  %v6930_v19 = vpop.f32.mrf.mxu1  ;;  %8457 = vst [vmem:[#allocation72_spill] sm:$0xff] %v6934_v62  ;;  %vm3267_vm6 = vcmp.eq.s32.totalorder %v5739_v39, %v6813_v2 }
 0x32d   :  { %v2251_v61 = vpop.f32.mrf.mxu0 }
 0x32e   :  { %v6904_v10 = vadd.f32 %v2251_v61, %v6464_v15  ;;  %8456 = vst [vmem:[#allocation71_spill] sm:$0xff] %v6928_v56 }
 0x330   :  { %8454 = vst [vmem:[#allocation69_spill] sm:$0xff] %v6904_v10  ;;  %v3375_v61 = vsel %vm3247_vm14, %v6904_v10, 0.0  ;;  %v2361_v42 = vmax.f32 %v2360_v60, %v6904_v10  ;;  %v3516_v60 = vadd.f32 %v3377_v24, %v3376_v6  ;;  %v6936_v10 = vpop.f32.mrf.mxu2  ;;  %v3378_v6 = vsel %vm3250_vm3, %v6928_v56, 0.0  ;;  %v6951_v59 = vpop.f32.mrf.mxu3 }
 0x331   :  { %v3513_v30 = vadd.f32 %v3512_v20, %v3375_v61  ;;  %v6942_v61 = vadd.f32 %v6766_v26, %v6440_v28  ;;  %vm3266_vm14 = vcmp.eq.s32.totalorder %v5736_v38, %v6813_v2  ;;  %vm3262_vm3 = vcmp.eq.s32.totalorder %v5736_v38, %v6804_v58 }
 0x332   :  { %v3517_v24 = vadd.f32 %v3516_v60, %v3378_v6  ;;  %v6972_v60 = vpop.permute.xlu2 %3183 }
 0x333   :  { %3514 = vadd.xlane.f32.xlu1 %v3513_v30  ;;  %2362 = vmax.xlane.f32.xlu0 %v2361_v42  ;;  %8458 = vst [vmem:[#allocation73_spill] sm:$0xff] %v6942_v61  ;;  %v2365_v42 = vmax.f32 %v2364_v11, %v6928_v56  ;;  %v3381_v30 = vsel %vm3253_vm2, %v6934_v62, 0.0  ;;  %v6961_v56 = vpop.permute.xlu1 %3186  ;;  %v6963_v7 = vpop.permute.xlu0 %3177  ;;  %v3380_v5 = vsel %vm3252_vm15, %v6942_v61, 0.0  ;;  %v2369_v33 = vmax.f32 %v6942_v61, %v6934_v62 }
 0x334   :  { %8459 = vst [vmem:[#allocation74_spill] sm:$0xff] %v6961_v56  ;;  %v6974_v6 = vpop.f32.mrf.mxu1  ;;  %vm3268_vm2 = vcmp.eq.s32.totalorder %v5379_v40, %v6802_v44  ;;  %vm3263_vm15 = vcmp.eq.s32.totalorder %v5739_v39, %v6804_v58 }
 0x335   :  { %v2254_v20 = vpop.f32.mrf.mxu0  ;;  %8460 = vst [vmem:[#allocation75_spill] sm:$0xff] %v6963_v7 }
 0x336   :  { %v6945_v63 = vadd.f32 %v2254_v20, %v6464_v15  ;;  %8462 = vst [vmem:[#allocation77_spill] sm:$0xff] %v6972_v60 }
 0x338   :  { %2293 = vmatmul.bf16.gmra.mxu0 %v6480_v49  ;;  %v2366_v26 = vmax.f32 %v2365_v42, %v6945_v63  ;;  %v3379_v20 = vsel %vm3251_vm12, %v6945_v63, 0.0  ;;  %v6970_v49 = vadd.f32 %v6791_v45, %v6457_v29  ;;  %v3521_v42 = vadd.f32 %v3381_v30, %v3380_v5  ;;  %v6982_v56 = vpop.f32.mrf.mxu2  ;;  %v6997_v7 = vpop.f32.mrf.mxu3 }
 0x339   :  { %v3518_v11 = vadd.f32 %v3517_v24, %v3379_v20  ;;  %v6980_v20 = vadd.f32 %v6834_v36, %v6438_v31  ;;  %v6993_v30 = vadd.f32 %v6822_v16, %v6440_v28  ;;  %v7009_v16 = vadd.f32 %v6847_v51, %v6457_v29 }
 0x33a   :  { %8461 = vst [vmem:[#allocation76_spill] sm:$0xff] %v6970_v49  ;;  %v2370_v60 = vmax.f32 %v2369_v33, %v6970_v49  ;;  %vm3269_vm12 = vcmp.eq.s32.totalorder %v5731_v17, %v6802_v44 }
 0x33b   :  { %2367 = vmax.xlane.f32.xlu1 %v2366_v26  ;;  %3519 = vadd.xlane.f32.xlu0 %v3518_v11  ;;  %8463 = vst [vmem:[#allocation78_spill] sm:$0xff] %v6980_v20  ;;  %v3382_v26 = vsel %vm3254_vm7, %v6970_v49, 0.0  ;;  %v2374_v33 = vmax.f32 %v6993_v30, %v6980_v20  ;;  %v7003_v47 = vpop.permute.xlu1 %3192  ;;  %vm3270_vm7 = vcmp.eq.s32.totalorder %v5736_v38, %v6802_v44 }
 0x33c   :  { %v3522_v5 = vadd.f32 %v3521_v42, %v3382_v26  ;;  %8465 = vst [vmem:[#allocation80_spill] sm:$0xff] %v6993_v30  ;;  %v7005_v42 = vpop.permute.xlu0 %3180  ;;  %v3385_v26 = vsel %vm3257_vm8, %v6980_v20, 0.0  ;;  %vm3276_vm8 = vcmp.eq.s32.totalorder %v5379_v40, %v6868_v18 }
 0x33d   :  { %v2256_v24 = vpop.f32.mrf.mxu0  ;;  %8466 = vst [vmem:[#allocation81_spill] sm:$0xff] %v7003_v47  ;;  %v2375_v51 = vmax.f32 %v2374_v33, %v7009_v16  ;;  %v3384_v47 = vsel %vm3256_vm10, %v6993_v30, 0.0  ;;  %vm3272_vm10 = vcmp.eq.s32.totalorder %v5379_v40, %v6857_v14 }
 0x33e   :  { %v6985_v45 = vadd.f32 %v2256_v24, %v6464_v15  ;;  %8467 = vst [vmem:[#allocation82_spill] sm:$0xff] %v7005_v42  ;;  %v3526_v20 = vadd.f32 %v3385_v26, %v3384_v47  ;;  %v3386_v47 = vsel %vm3258_vm11, %v7009_v16, 0.0  ;;  %vm3273_vm11 = vcmp.eq.s32.totalorder %v5731_v17, %v6857_v14 }
 0x33f   :  { %8468 = vst [vmem:[#allocation83_spill] sm:$0xff] %v7009_v16 }
 0x340   :  { %8464 = vst [vmem:[#allocation79_spill] sm:$0xff] %v6985_v45  ;;  %v2371_v36 = vmax.f32 %v2370_v60, %v6985_v45  ;;  %v3383_v11 = vsel %vm3255_vm9, %v6985_v45, 0.0  ;;  %v7011_v60 = vpop.permute.xlu2 %3198  ;;  %v7031_v42 = vpop.f32.mrf.mxu2  ;;  %v3527_v26 = vadd.f32 %v3526_v20, %v3386_v47  ;;  %vm3271_vm9 = vcmp.eq.s32.totalorder %v5739_v39, %v6802_v44 }
 0x341   :  { %v3523_v24 = vadd.f32 %v3522_v5, %v3383_v11  ;;  %8469 = vst [vmem:[#allocation84_spill] sm:$0xff] %v7011_v60  ;;  %v7016_v5 = vadd.f32 %v6889_v53, %v6438_v31  ;;  %v7020_v11 = vpop.f32.mrf.mxu1  ;;  %v7029_v60 = vadd.f32 %v6875_v35, %v6440_v28  ;;  %v7043_v35 = vadd.f32 %v6895_v43, %v6457_v29  ;;  %v7049_v33 = vpop.f32.mrf.mxu3 }
 0x342   :  { %2372 = vmax.xlane.f32.xlu2 %v2371_v36 }
 0x343   :  { %3524 = vadd.xlane.f32.xlu1 %v3523_v24  ;;  %8470 = vst [vmem:[#allocation85_spill] sm:$0xff] %v7016_v5  ;;  %v2379_v45 = vmax.f32 %v7029_v60, %v7016_v5  ;;  %v3389_v43 = vsel %vm3261_vm4, %v7016_v5, 0.0  ;;  %v7067_v30 = vpop.permute.xlu1 %3195  ;;  %vm3275_vm4 = vcmp.eq.s32.totalorder %v5739_v39, %v6857_v14 }
 0x344   :  { %8472 = vst [vmem:[#allocation87_spill] sm:$0xff] %v7029_v60  ;;  %v7069_v49 = vpop.permute.xlu0 %3189 }
 0x345   :  { %v2259_v36 = vpop.f32.mrf.mxu0  ;;  %8474 = vst [vmem:[#allocation89_spill] sm:$0xff] %v7067_v30 }
 0x346   :  { %v7023_v24 = vadd.f32 %v2259_v36, %v6464_v15  ;;  %8475 = vst [vmem:[#allocation90_spill] sm:$0xff] %v7069_v49 }
 0x348   :  { %8471 = vst [vmem:[#allocation86_spill] sm:$0xff] %v7023_v24  ;;  %2298 = vmatmul.bf16.gmra.mxu0 %v6558_v27  ;;  %v2376_v53 = vmax.f32 %v2375_v51, %v7023_v24  ;;  %v7047_v27 = vadd.f32 %v6936_v10, %v6438_v31  ;;  %v7061_v10 = vadd.f32 %v6930_v19, %v6440_v28  ;;  %v3387_v16 = vsel %vm3259_vm5, %v7023_v24, 0.0 }
 0x349   :  { %v3528_v30 = vadd.f32 %v3527_v26, %v3387_v16  ;;  %vm3278_vm5 = vcmp.eq.s32.totalorder %v5736_v38, %v6868_v18 }
 0x34a   :  { %2377 = vmax.xlane.f32.xlu0 %v2376_v53  ;;  %v2380_v53 = vmax.f32 %v2379_v45, %v7043_v35  ;;  %v3388_v45 = vsel %vm3260_vm1, %v7029_v60, 0.0  ;;  %v3392_v62 = vsel %vm3264_vm0, %v7061_v10, 0.0  ;;  %v2384_v61 = vmax.f32 %v7061_v10, %v7047_v27 }
 0x34b   :  { %v3531_v60 = vadd.f32 %v3389_v43, %v3388_v45  ;;  %vm3274_vm1 = vcmp.eq.s32.totalorder %v5736_v38, %v6857_v14  ;;  %vm3279_vm0 = vcmp.eq.s32.totalorder %v5739_v39, %v6868_v18 }
 0x34d   :  { %v2261_v36 = vpop.f32.mrf.mxu0  ;;  %v7063_v51 = vpop.xlane.xlu2 %2307 }
 0x34e   :  { %8473 = vst [vmem:[#allocation88_spill] sm:$0xff] %v7063_v51  ;;  %v7072_v23 = vadd.f32 %v2261_v36, %v6464_v15  ;;  %v2464_v20 = vsub.f32 %v6455_v1, %v7063_v51  ;;  %v2465_v19 = vsub.f32 %v6447_v32, %v7063_v51  ;;  %v2466_v47 = vsub.f32 %v6472_v4, %v7063_v51  ;;  %v7092_v32 = vpop.f32.mrf.mxu1 }
 0x34f   :  { %v3393_v36 = vsel %vm3265_vm13, %v7047_v27, 0.0  ;;  %v2467_v5 = vsub.f32 %v6487_v25, %v7063_v51  ;;  %v7110_v25 = vadd.f32 %v6982_v56, %v6438_v31  ;;  %vm3277_vm13 = vcmp.eq.s32.totalorder %v5731_v17, %v6868_v18 }
 0x350   :  { %v2592_v1 = vmul.f32 1.442695, %v2464_v20  ;;  %v2594_v4 = vmul.f32 1.442695, %v2465_v19  ;;  %v2381_v49 = vmax.f32 %v2380_v53, %v7072_v23  ;;  %v2596_v24 = vmul.f32 1.442695, %v2466_v47  ;;  %v7106_v19 = vpop.f32.mrf.mxu2 }
 0x351   :  { %v7104_v20 = vadd.f32 %v6951_v59, %v6457_v29  ;;  %v3536_v16 = vadd.f32 %v3393_v36, %v3392_v62  ;;  %v3390_v59 = vsel %vm3262_vm3, %v7043_v35, 0.0  ;;  %v2598_v43 = vmul.f32 1.442695, %v2467_v5 }
 0x352   :  { %4697 = vpow2.f32 %v2592_v1  ;;  %2382 = vmax.xlane.f32.xlu1 %v2381_v49  ;;  %3529 = vadd.xlane.f32.xlu0 %v3528_v30  ;;  %v7121_v49 = vpop.f32.mrf.mxu3  ;;  %v3391_v30 = vsel %vm3263_vm15, %v7072_v23, 0.0  ;;  %v3532_v26 = vadd.f32 %v3531_v60, %v3390_v59  ;;  %v7126_v62 = vadd.f32 %v6974_v6, %v6440_v28 }
 0x353   :  { %8476 = vst [vmem:[#allocation91_spill] sm:$0xff] %v7104_v20  ;;  %4699 = vpow2.f32 %v2594_v4  ;;  %v2385_v45 = vmax.f32 %v2384_v61, %v7104_v20  ;;  %v3397_v60 = vsel %vm3269_vm12, %v7110_v25, 0.0  ;;  %vm3282_vm3 = vcmp.eq.s32.totalorder %v5736_v38, %v6855_v57 }
 0x354   :  { %4701 = vpow2.f32 %v2596_v24  ;;  %v3394_v24 = vsel %vm3266_vm14, %v7104_v20, 0.0  ;;  %v3533_v59 = vadd.f32 %v3532_v26, %v3391_v30  ;;  %vm3280_vm14 = vcmp.eq.s32.totalorder %v5379_v40, %v6855_v57 }
 0x355   :  { %v2264_v56 = vpop.f32.mrf.mxu0  ;;  %v7131_v47 = vpop.xlane.xlu0 %2312  ;;  %v3537_v36 = vadd.f32 %v3536_v16, %v3394_v24  ;;  %4703 = vpow2.f32 %v2598_v43  ;;  %vm3284_vm12 = vcmp.eq.s32.totalorder %v5379_v40, %v6914_v55  ;;  %vm3285_vm15 = vcmp.eq.s32.totalorder %v5731_v17, %v6914_v55 }
 0x356   :  { %v7129_v53 = vadd.f32 %v2264_v56, %v6464_v15  ;;  %8477 = vst [vmem:[#allocation92_spill] sm:$0xff] %v7131_v47  ;;  %v7133_v58 = vpop.xlane.xlu1 %3464  ;;  %v2468_v6 = vsub.f32 %v6484_v3, %v7131_v47  ;;  %v2469_v5 = vsub.f32 %v6476_v0, %v7131_v47  ;;  %v2470_v4 = vsub.f32 %v6507_v13, %v7131_v47  ;;  %v7160_v16 = vpop.f32.mrf.mxu1 }
 0x357   :  { %8478 = vst [vmem:[#allocation93_spill] sm:$0xff] %v7133_v58  ;;  %v3396_v0 = vsel %vm3268_vm2, %v7126_v62, 0.0  ;;  %v7158_v13 = vadd.f32 %v6997_v7, %v6457_v29  ;;  %v2471_v2 = vsub.f32 %v6531_v34, %v7131_v47  ;;  %v2389_v7 = vmax.f32 %v7126_v62, %v7110_v25 }
 0x358   :  { %v4698_v1 = vpop.eup %4697  ;;  %v2386_v61 = vmax.f32 %v2385_v45, %v7129_v53  ;;  %v3395_v56 = vsel %vm3267_vm6, %v7129_v53, 0.0  ;;  %v2600_v51 = vmul.f32 1.442695, %v2468_v6  ;;  %v2602_v20 = vmul.f32 1.442695, %v2469_v5  ;;  %v7164_v45 = vpop.f32.mrf.mxu2 }
 0x359   :  { %v4700_v58 = vpop.eup %4699  ;;  %v3538_v3 = vadd.f32 %v3537_v36, %v3395_v56  ;;  %v3541_v43 = vadd.f32 %v3397_v60, %v3396_v0  ;;  %v2604_v24 = vmul.f32 1.442695, %v2470_v4  ;;  %v7168_v5 = vpop.xlane.xlu2 %3459  ;;  %v7176_v34 = vadd.f32 %v7020_v11, %v6440_v28 }
 0x35a   :  { %2387 = vmax.xlane.f32.xlu2 %v2386_v61  ;;  %3534 = vadd.xlane.f32.xlu1 %v3533_v59  ;;  %v2848_v30 = vadd.f32 %v4700_v58, %v4698_v1  ;;  %v4702_v26 = vpop.eup %4701  ;;  %4705 = vpow2.f32 %v2600_v51  ;;  %v3398_v58 = vsel %vm3270_vm7, %v7158_v13, 0.0  ;;  %v2606_v60 = vmul.f32 1.442695, %v2471_v2  ;;  %v7194_v56 = vpop.f32.mrf.mxu3 }
 0x35b   :  { %3539 = vadd.xlane.f32.xlu0 %v3538_v3  ;;  %4707 = vpow2.f32 %v2602_v20  ;;  %v4704_v1 = vpop.eup %4703  ;;  %v3542_v11 = vadd.f32 %v3541_v43, %v3398_v58  ;;  %v7192_v59 = vadd.f32 %v7031_v42, %v6438_v31  ;;  %v3400_v43 = vsel %vm3272_vm10, %v7176_v34, 0.0 }
 0x35c   :  { %v2849_v6 = vadd.f32 %v4702_v26, %v2848_v30  ;;  %4709 = vpow2.f32 %v2604_v24  ;;  %vm3281_vm6 = vcmp.eq.s32.totalorder %v5731_v17, %v6855_v57  ;;  %vm3283_vm2 = vcmp.eq.s32.totalorder %v5739_v39, %v6855_v57 }
 0x35d   :  { %v2266_v36 = vpop.f32.mrf.mxu0  ;;  %4711 = vpow2.f32 %v2606_v60  ;;  %v3401_v24 = vsel %vm3273_vm11, %v7192_v59, 0.0  ;;  %v2390_v60 = vmax.f32 %v2389_v7, %v7158_v13  ;;  %v7226_v7 = vadd.f32 %v7049_v33, %v6457_v29 }
 0x35e   :  { %v7179_v51 = vadd.f32 %v2266_v36, %v6464_v15  ;;  %v7181_v20 = vpop.xlane.xlu1 %2317  ;;  %v2850_v3 = vadd.f32 %v4704_v1, %v2849_v6  ;;  %vm3288_vm7 = vcmp.eq.s32.totalorder %v5379_v40, %v6919_v9  ;;  %vm3287_vm10 = vcmp.eq.s32.totalorder %v5739_v39, %v6914_v55 }
 0x35f   :  { %8479 = vst [vmem:[#allocation94_spill] sm:$0xff] %v7181_v20  ;;  %v2472_v4 = vsub.f32 %v6528_v52, %v7181_v20  ;;  %v2473_v61 = vsub.f32 %v6516_v50, %v7181_v20  ;;  %v2474_v44 = vsub.f32 %v6546_v12, %v7181_v20  ;;  %v2475_v52 = vsub.f32 %v6567_v54, %v7181_v20  ;;  %v7205_v54 = vpop.f32.mrf.mxu1 }
 0x360   :  { %v3399_v0 = vsel %vm3271_vm9, %v7179_v51, 0.0  ;;  %v4706_v2 = vpop.eup %4705  ;;  %8482 = vst [vmem:[#allocation97_spill] sm:$0xff] %v7226_v7  ;;  %v2391_v33 = vmax.f32 %v2390_v60, %v7179_v51  ;;  %v3402_v60 = vsel %vm3274_vm1, %v7226_v7, 0.0  ;;  %vm3286_vm9 = vcmp.eq.s32.totalorder %v5736_v38, %v6914_v55  ;;  %v8514_v55 = vld [vmem:[#allocation53_spill] sm:$0xff] }
 0x361   :  { %v2608_v30 = vmul.f32 1.442695, %v2472_v4  ;;  %v2610_v50 = vmul.f32 1.442695, %v2473_v61  ;;  %v3543_v26 = vadd.f32 %v3542_v11, %v3399_v0  ;;  %v4708_v36 = vpop.eup %4707  ;;  %v2612_v12 = vmul.f32 1.442695, %v2474_v44  ;;  %v7212_v61 = vpop.f32.mrf.mxu2 }
 0x362   :  { %v2853_v42 = vadd.f32 %v4708_v36, %v4706_v2  ;;  %v2614_v1 = vmul.f32 1.442695, %v2475_v52  ;;  %v4710_v4 = vpop.eup %4709  ;;  %v7214_v44 = vpop.xlane.xlu0 %3469  ;;  %v2394_v2 = vmax.f32 %v7176_v34, %v7192_v59  ;;  %v7230_v52 = vadd.f32 %v7092_v32, %v6440_v28 }
 0x363   :  { %4713 = vpow2.f32 %v2608_v30  ;;  %2851 = vadd.xlane.f32.xlu0 %v2850_v3  ;;  %3544 = vadd.xlane.f32.xlu1 %v3543_v26  ;;  %8481 = vst [vmem:[#allocation96_spill] sm:$0xff] %v7214_v44  ;;  %v7241_v32 = vpop.f32.mrf.mxu3  ;;  %vm3290_vm11 = vcmp.eq.s32.totalorder %v5736_v38, %v6919_v9 }
 0x364   :  { %4715 = vpow2.f32 %v2610_v50  ;;  %8483 = vst [vmem:[#allocation98_spill] sm:$0xff] %v7230_v52  ;;  %v2854_v30 = vadd.f32 %v4710_v4, %v2853_v42  ;;  %v4712_v50 = vpop.eup %4711 }
 0x365   :  { %v2269_v6 = vpop.f32.mrf.mxu0  ;;  %v7209_v58 = vpop.xlane.xlu2 %2322  ;;  %4717 = vpow2.f32 %v2612_v12 }
 0x366   :  { %8480 = vst [vmem:[#allocation95_spill] sm:$0xff] %v7209_v58  ;;  %v2476_v11 = vsub.f32 %v6564_v46, %v7209_v58  ;;  %v2477_v3 = vsub.f32 %v6554_v41, %v7209_v58  ;;  %v2478_v0 = vsub.f32 %v6587_v48, %v7209_v58  ;;  %v7234_v46 = vadd.f32 %v7106_v19, %v6438_v31 }
 0x367   :  { %v3546_v48 = vadd.f32 %v3401_v24, %v3400_v43  ;;  %v2479_v12 = vsub.f32 %v6605_v8, %v7209_v58  ;;  %v2855_v44 = vadd.f32 %v4712_v50, %v2854_v30  ;;  %4719 = vpow2.f32 %v2614_v1  ;;  %v8488_v50 = vld [vmem:[#allocation40_spill] sm:$0xff] }
 0x368   :  { %8484 = vst [vmem:[#allocation99_spill] sm:$0xff] %v7234_v46  ;;  %v2616_v41 = vmul.f32 1.442695, %v2476_v11  ;;  %v2618_v26 = vmul.f32 1.442695, %v2477_v3  ;;  %v7244_v19 = vadd.f32 %v2269_v6, %v6464_v15  ;;  %v3404_v24 = vsel %vm3276_vm8, %v7230_v52, 0.0 }
 0x369   :  { %v4714_v36 = vpop.eup %4713  ;;  %v2620_v42 = vmul.f32 1.442695, %v2478_v0  ;;  %v3405_v6 = vsel %vm3277_vm13, %v7234_v46, 0.0  ;;  %v2395_v1 = vmax.f32 %v2394_v2, %v7226_v7  ;;  %v3547_v3 = vadd.f32 %v3546_v48, %v3402_v60  ;;  %v7277_v48 = vpop.f32.mrf.mxu1 }
 0x36a   :  { %v4716_v20 = vpop.eup %4715  ;;  %8485 = vst [vmem:[#allocation100_spill] sm:$0xff] %v7244_v19  ;;  %4721 = vpow2.f32 %v2616_v41  ;;  %v2622_v0 = vmul.f32 1.442695, %v2479_v12  ;;  %v2399_v30 = vmax.f32 %v7230_v52, %v7234_v46  ;;  %v8490_v12 = vld [vmem:[#allocation39_spill] sm:$0xff]  ;;  %v7287_v14 = vpop.f32.mrf.mxu2  ;;  %vm3289_vm8 = vcmp.eq.s32.totalorder %v5731_v17, %v6919_v9 }
 0x36b   :  { %4723 = vpow2.f32 %v2618_v26  ;;  %2392 = vmax.xlane.f32.xlu0 %v2391_v33  ;;  %2856 = vadd.xlane.f32.xlu1 %v2855_v44  ;;  %v2858_v43 = vadd.f32 %v4716_v20, %v4714_v36  ;;  %v4718_v8 = vpop.eup %4717  ;;  %v7259_v20 = vadd.f32 %v7121_v49, %v6457_v29  ;;  %v3403_v49 = vsel %vm3275_vm4, %v7244_v19, 0.0 }
 0x36c   :  { %4725 = vpow2.f32 %v2620_v42  ;;  %v7275_v36 = vadd.f32 %v7160_v16, %v6440_v28  ;;  %v8491_v42 = vld [vmem:[#allocation41_spill] sm:$0xff]  ;;  %v2396_v16 = vmax.f32 %v2395_v1, %v7244_v19  ;;  %v3548_v47 = vadd.f32 %v3547_v3, %v3403_v49 }
 0x36d   :  { %8486 = vst [vmem:[#allocation101_spill] sm:$0xff] %v7259_v20  ;;  %v2271_v4 = vpop.f32.mrf.mxu0  ;;  %v7261_v44 = vpop.xlane.xlu2 %2327  ;;  %v2859_v11 = vadd.f32 %v4718_v8, %v2858_v43  ;;  %v3551_v8 = vadd.f32 %v3405_v6, %v3404_v24  ;;  %4727 = vpow2.f32 %v2622_v0  ;;  %v8492_v24 = vld [vmem:[#allocation44_spill] sm:$0xff]  ;;  %vm3291_vm13 = vcmp.eq.s32.totalorder %v5739_v39, %v6919_v9 }
 0x36e   :  { %8487 = vst [vmem:[#allocation102_spill] sm:$0xff] %v7261_v44  ;;  %v2480_v41 = vsub.f32 %v8488_v50, %v7261_v44  ;;  %v7267_v26 = vpop.xlane.xlu0 %3479  ;;  %v4720_v2 = vpop.eup %4719  ;;  %v2481_v33 = vsub.f32 %v8490_v12, %v7261_v44  ;;  %v2482_v43 = vsub.f32 %v8491_v42, %v7261_v44  ;;  %v7285_v50 = vadd.f32 %v7164_v45, %v6438_v31 }
 0x36f   :  { %8489 = vst [vmem:[#allocation40_spill] sm:$0xff] %v7267_v26  ;;  %v2860_v58 = vadd.f32 %v4720_v2, %v2859_v11  ;;  %v7291_v52 = vadd.f32 %v2271_v4, %v6464_v15  ;;  %v2483_v6 = vsub.f32 %v8492_v24, %v7261_v44  ;;  %v7303_v4 = vpop.f32.mrf.mxu3  ;;  %v7310_v11 = vpop.xlane.xlu1 %3474  ;;  %v8498_v44 = vld [vmem:[#allocation48_spill] sm:$0xff] }
 0x370   :  { %v4722_v60 = vpop.eup %4721  ;;  %v2624_v26 = vmul.f32 1.442695, %v2480_v41  ;;  %v2626_v12 = vmul.f32 1.442695, %v2481_v33  ;;  %v2628_v42 = vmul.f32 1.442695, %v2482_v43  ;;  %v7318_v43 = vadd.f32 %v7194_v56, %v6457_v29 }
 0x371   :  { %v4724_v46 = vpop.eup %4723  ;;  %2861 = vadd.xlane.f32.xlu2 %v2860_v58  ;;  %v3406_v58 = vsel %vm3278_vm5, %v7259_v20, 0.0  ;;  %8493 = vst [vmem:[#allocation39_spill] sm:$0xff] %v7310_v11  ;;  %v3407_v0 = vsel %vm3279_vm0, %v7291_v52, 0.0  ;;  %v2630_v2 = vmul.f32 1.442695, %v2483_v6  ;;  %v7329_v56 = vpop.f32.mrf.mxu1 }
 0x372   :  { %4729 = vpow2.f32 %v2624_v26  ;;  %v2863_v45 = vadd.f32 %v4724_v46, %v4722_v60  ;;  %v4726_v1 = vpop.eup %4725  ;;  %v3409_v46 = vsel %vm3281_vm6, %v7285_v50, 0.0  ;;  %v2400_v26 = vmax.f32 %v2399_v30, %v7259_v20  ;;  %v8495_v60 = vld [vmem:[#allocation43_spill] sm:$0xff]  ;;  %v7334_v7 = vpop.f32.mrf.mxu2 }
 0x373   :  { %4731 = vpow2.f32 %v2626_v12  ;;  %3549 = vadd.xlane.f32.xlu0 %v3548_v47  ;;  %2397 = vmax.xlane.f32.xlu1 %v2396_v16  ;;  %v3408_v47 = vsel %vm3280_vm14, %v7275_v36, 0.0  ;;  %v3552_v49 = vadd.f32 %v3551_v8, %v3406_v58  ;;  %v4728_v33 = vpop.eup %4727  ;;  %v8496_v12 = vld [vmem:[#allocation42_spill] sm:$0xff] }
 0x374   :  { %v2864_v3 = vadd.f32 %v4726_v1, %v2863_v45  ;;  %4733 = vpow2.f32 %v2628_v42  ;;  %v8497_v45 = vld [vmem:[#allocation45_spill] sm:$0xff]  ;;  %v2401_v8 = vmax.f32 %v2400_v26, %v7291_v52  ;;  %v3556_v58 = vadd.f32 %v3409_v46, %v3408_v47 }
 0x375   :  { %v2274_v18 = vpop.f32.mrf.mxu0  ;;  %v3553_v6 = vadd.f32 %v3552_v49, %v3407_v0  ;;  %4735 = vpow2.f32 %v2630_v2  ;;  %v2404_v47 = vmax.f32 %v7275_v36, %v7285_v50  ;;  %v7344_v46 = vadd.f32 %v7212_v61, %v6438_v31 }
 0x376   :  { %v7313_v41 = vpop.xlane.xlu0 %2332  ;;  %v7332_v20 = vadd.f32 %v2274_v18, %v6464_v15  ;;  %v7356_v61 = vadd.f32 %v7205_v54, %v6440_v28  ;;  %v8504_v54 = vld [vmem:[#allocation49_spill] sm:$0xff] }
 0x377   :  { %8494 = vst [vmem:[#allocation41_spill] sm:$0xff] %v7313_v41  ;;  %v2484_v16 = vsub.f32 %v8495_v60, %v7313_v41  ;;  %v2485_v24 = vsub.f32 %v8496_v12, %v7313_v41  ;;  %v2486_v42 = vsub.f32 %v8497_v45, %v7313_v41  ;;  %v2487_v30 = vsub.f32 %v8498_v44, %v7313_v41 }
 0x378   :  { %v4730_v1 = vpop.eup %4729  ;;  %v2865_v12 = vadd.f32 %v4728_v33, %v2864_v3  ;;  %8499 = vst [vmem:[#allocation44_spill] sm:$0xff] %v7344_v46  ;;  %v7348_v3 = vpop.xlane.xlu2 %3484  ;;  %v3411_v2 = vsel %vm3283_vm2, %v7332_v20, 0.0  ;;  %v3413_v57 = vsel %vm3285_vm15, %v7344_v46, 0.0 }
 0x379   :  { %v4732_v11 = vpop.eup %4731  ;;  %v2632_v60 = vmul.f32 1.442695, %v2484_v16  ;;  %v2634_v19 = vmul.f32 1.442695, %v2485_v24  ;;  %v2636_v45 = vmul.f32 1.442695, %v2486_v42  ;;  %2402 = vmax.xlane.f32.xlu2 %v2401_v8  ;;  %v2409_v8 = vmax.f32 %v7356_v61, %v7344_v46 }
 0x37a   :  { %v2868_v44 = vadd.f32 %v4732_v11, %v4730_v1  ;;  %v4734_v18 = vpop.eup %4733  ;;  %8500 = vst [vmem:[#allocation43_spill] sm:$0xff] %v7348_v3  ;;  %v3410_v11 = vsel %vm3282_vm3, %v7318_v43, 0.0  ;;  %v2638_v0 = vmul.f32 1.442695, %v2487_v30  ;;  %v8502_v16 = vld [vmem:[#allocation47_spill] sm:$0xff]  ;;  %v8503_v42 = vld [vmem:[#allocation46_spill] sm:$0xff] }
 0x37b   :  { %4737 = vpow2.f32 %v2632_v60  ;;  %2866 = vadd.xlane.f32.xlu0 %v2865_v12  ;;  %3554 = vadd.xlane.f32.xlu1 %v3553_v6  ;;  %v3557_v33 = vadd.f32 %v3556_v58, %v3410_v11  ;;  %v7378_v6 = vadd.f32 %v7241_v32, %v6457_v29  ;;  %v7380_v58 = vpop.f32.mrf.mxu3  ;;  %v2405_v60 = vmax.f32 %v2404_v47, %v7318_v43  ;;  %v4736_v12 = vpop.eup %4735 }
 0x37c   :  { %4739 = vpow2.f32 %v2634_v19  ;;  %v2869_v19 = vadd.f32 %v4734_v18, %v2868_v44  ;;  %v3412_v47 = vsel %vm3284_vm12, %v7356_v61, 0.0 }
 0x37d   :  { %v2276_v26 = vpop.f32.mrf.mxu0  ;;  %v7358_v49 = vpop.xlane.xlu1 %2337  ;;  %4741 = vpow2.f32 %v2636_v45  ;;  %8505 = vst [vmem:[#allocation45_spill] sm:$0xff] %v7378_v6  ;;  %v3558_v18 = vadd.f32 %v3557_v33, %v3411_v2 }
 0x37e   :  { %8501 = vst [vmem:[#allocation42_spill] sm:$0xff] %v7358_v49  ;;  %v2488_v24 = vsub.f32 %v8502_v16, %v7358_v49  ;;  %v2489_v1 = vsub.f32 %v8503_v42, %v7358_v49  ;;  %v2490_v30 = vsub.f32 %v8504_v54, %v7358_v49  ;;  %4743 = vpow2.f32 %v2638_v0  ;;  %v8507_v42 = vld [vmem:[#allocation52_spill] sm:$0xff]  ;;  %v7401_v2 = vpop.f32.mrf.mxu1 }
 0x37f   :  { %v7386_v16 = vadd.f32 %v2276_v26, %v6464_v15  ;;  %v2491_v32 = vsub.f32 %v8507_v42, %v7358_v49  ;;  %v2406_v54 = vmax.f32 %v2405_v60, %v7332_v20  ;;  %v2870_v3 = vadd.f32 %v4736_v12, %v2869_v19  ;;  %v7411_v60 = vpop.xlane.xlu0 %3489  ;;  %v8513_v42 = vld [vmem:[#allocation50_spill] sm:$0xff] }
 0x380   :  { %v2640_v45 = vmul.f32 1.442695, %v2488_v24  ;;  %v2642_v44 = vmul.f32 1.442695, %v2489_v1  ;;  %v2644_v0 = vmul.f32 1.442695, %v2490_v30  ;;  %v7399_v26 = vadd.f32 %v7287_v14, %v6438_v31  ;;  %v7409_v30 = vpop.f32.mrf.mxu2 }
 0x381   :  { %v4738_v11 = vpop.eup %4737  ;;  %8506 = vst [vmem:[#allocation48_spill] sm:$0xff] %v7386_v16  ;;  %3559 = vadd.xlane.f32.xlu2 %v3558_v18  ;;  %v3561_v19 = vadd.f32 %v3413_v57, %v3412_v47  ;;  %v7407_v1 = vadd.f32 %v7277_v48, %v6440_v28  ;;  %v3414_v14 = vsel %vm3286_vm9, %v7378_v6, 0.0  ;;  %v3415_v12 = vsel %vm3287_vm10, %v7386_v16, 0.0  ;;  %v8512_v18 = vld [vmem:[#allocation51_spill] sm:$0xff] }
 0x382   :  { %v4740_v41 = vpop.eup %4739  ;;  %4745 = vpow2.f32 %v2640_v45  ;;  %8508 = vst [vmem:[#allocation47_spill] sm:$0xff] %v7399_v26  ;;  %v2410_v45 = vmax.f32 %v2409_v8, %v7378_v6  ;;  %vm8587_vm10 = vcmask 7168  }
 0x383   :  { %4747 = vpow2.f32 %v2642_v44  ;;  %2407 = vmax.xlane.f32.xlu0 %v2406_v54  ;;  %2871 = vadd.xlane.f32.xlu1 %v2870_v3  ;;  %v2873_v33 = vadd.f32 %v4740_v41, %v4738_v11  ;;  %v4742_v24 = vpop.eup %4741  ;;  %8509 = vst [vmem:[#allocation46_spill] sm:$0xff] %v7407_v1  ;;  %v2646_v44 = vmul.f32 1.442695, %v2491_v32  ;;  %v3562_v32 = vadd.f32 %v3561_v19, %v3414_v14  ;;  %v7437_v6 = vpop.f32.mrf.mxu3 }
 0x384   :  { %8510 = vst [vmem:[#allocation49_spill] sm:$0xff] %v7411_v60  ;;  %v4744_v48 = vpop.eup %4743  ;;  %4749 = vpow2.f32 %v2644_v0  ;;  %v2414_v60 = vmax.f32 %v7407_v1, %v7399_v26  ;;  %v3417_v0 = vsel %vm3289_vm8, %v7399_v26, 0.0  ;;  %v2411_v49 = vmax.f32 %v2410_v45, %v7386_v16 }
 0x385   :  { %v2279_v3 = vpop.f32.mrf.mxu0  ;;  %v7416_v41 = vpop.xlane.xlu2 %2342  ;;  %v2874_v57 = vadd.f32 %v4742_v24, %v2873_v33  ;;  %v7430_v33 = vadd.f32 %v7303_v4, %v6457_v29  ;;  %v8517_v4 = vld [vmem:[#allocation55_spill] sm:$0xff]  ;;  %v3563_v19 = vadd.f32 %v3562_v32, %v3415_v12  ;;  %4751 = vpow2.f32 %v2646_v44 }
 0x386   :  { %8511 = vst [vmem:[#allocation52_spill] sm:$0xff] %v7416_v41  ;;  %v2492_v11 = vsub.f32 %v8512_v18, %v7416_v41  ;;  %v2493_v54 = vsub.f32 %v8513_v42, %v7416_v41  ;;  %v2494_v47 = vsub.f32 %v8514_v55, %v7416_v41  ;;  %v7440_v46 = vadd.f32 %v2279_v3, %v6464_v15 }
 0x387   :  { %8515 = vst [vmem:[#allocation51_spill] sm:$0xff] %v7430_v33  ;;  %v2875_v8 = vadd.f32 %v4744_v48, %v2874_v57  ;;  %v2495_v57 = vsub.f32 %v8517_v4, %v7416_v41  ;;  %v3416_v14 = vsel %vm3288_vm7, %v7407_v1, 0.0  ;;  %v3418_v12 = vsel %vm3290_vm11, %v7430_v33, 0.0  ;;  %v8522_v4 = vld [vmem:[#allocation57_spill] sm:$0xff] }
 0x388   :  { %v4746_v24 = vpop.eup %4745  ;;  %v2648_v18 = vmul.f32 1.442695, %v2492_v11  ;;  %v2650_v42 = vmul.f32 1.442695, %v2493_v54  ;;  %8516 = vst [vmem:[#allocation50_spill] sm:$0xff] %v7440_v46  ;;  %v3566_v3 = vadd.f32 %v3417_v0, %v3416_v14  ;;  %v7450_v54 = vpop.xlane.xlu1 %3494  ;;  %v8520_v0 = vld [vmem:[#allocation56_spill] sm:$0xff] }
 0x389   :  { %v4748_v55 = vpop.eup %4747  ;;  %v2652_v48 = vmul.f32 1.442695, %v2494_v47  ;;  %2876 = vadd.xlane.f32.xlu2 %v2875_v8  ;;  %8518 = vst [vmem:[#allocation53_spill] sm:$0xff] %v7450_v54  ;;  %v2415_v47 = vmax.f32 %v2414_v60, %v7430_v33  ;;  %v7469_v60 = vadd.f32 %v7334_v7, %v6438_v31 }
 0x38a   :  { %4753 = vpow2.f32 %v2648_v18  ;;  %v2878_v45 = vadd.f32 %v4748_v55, %v4746_v24  ;;  %v4750_v11 = vpop.eup %4749  ;;  %v2654_v24 = vmul.f32 1.442695, %v2495_v57  ;;  %v7459_v18 = vpop.f32.mrf.mxu2  ;;  %v8521_v55 = vld [vmem:[#allocation54_spill] sm:$0xff]  ;;  %v8523_v57 = vld [vmem:[#allocation60_spill] sm:$0xff] }
 0x38b   :  { %4755 = vpow2.f32 %v2650_v42  ;;  %3564 = vadd.xlane.f32.xlu0 %v3563_v19  ;;  %2412 = vmax.xlane.f32.xlu1 %v2411_v49  ;;  %v3419_v49 = vsel %vm3291_vm13, %v7440_v46, 0.0  ;;  %v4752_v14 = vpop.eup %4751  ;;  %vm8590_vm13 = vmmov %vm8587_vm10 }
 0x38c   :  { %v2879_v8 = vadd.f32 %v4750_v11, %v2878_v45  ;;  %4757 = vpow2.f32 %v2652_v48  ;;  %v7471_v45 = vpop.f32.mrf.mxu1  ;;  %v3567_v48 = vadd.f32 %v3566_v3, %v3418_v12  ;;  %v7482_v12 = vpop.f32.mrf.mxu3 }
 0x38d   :  { %v2281_v44 = vpop.f32.mrf.mxu0  ;;  %v7455_v32 = vpop.xlane.xlu0 %2347  ;;  %4759 = vpow2.f32 %v2654_v24  ;;  %v7495_v24 = vadd.f32 %v7409_v30, %v6438_v31 }
 0x38e   :  { %8519 = vst [vmem:[#allocation55_spill] sm:$0xff] %v7455_v32  ;;  %v2496_v42 = vsub.f32 %v8520_v0, %v7455_v32  ;;  %v2497_v9 = vsub.f32 %v8521_v55, %v7455_v32  ;;  %v2498_v19 = vsub.f32 %v8522_v4, %v7455_v32  ;;  %v2499_v11 = vsub.f32 %v8523_v57, %v7455_v32 }
 0x38f   :  { %v7477_v0 = vadd.f32 %v7329_v56, %v6440_v28  ;;  %v2416_v4 = vmax.f32 %v2415_v47, %v7440_v46  ;;  %v2880_v1 = vadd.f32 %v4752_v14, %v2879_v8  ;;  %v3568_v7 = vadd.f32 %v3567_v48, %v3419_v49  ;;  %8525 = vst [vmem:[#allocation54_spill] sm:$0xff] %v7495_v24 }
 0x390   :  { %v4754_v54 = vpop.eup %4753  ;;  %v2656_v55 = vmul.f32 1.442695, %v2496_v42  ;;  %v2658_v41 = vmul.f32 1.442695, %v2497_v9  ;;  %v2660_v26 = vmul.f32 1.442695, %v2498_v19  ;;  %v7486_v47 = vadd.f32 %v7380_v58, %v6457_v29 }
 0x391   :  { %v4756_v33 = vpop.eup %4755  ;;  %2417 = vmax.xlane.f32.xlu2 %v2416_v4  ;;  %v2419_v3 = vmax.f32 %v7477_v0, %v7469_v60  ;;  %v2662_v56 = vmul.f32 1.442695, %v2499_v11  ;;  %v7489_v8 = vadd.f32 %v2281_v44, %v6464_v15  ;;  %v8527_v9 = vld [vmem:[#allocation58_spill] sm:$0xff]  ;;  %v8528_v58 = vld [vmem:[#allocation61_spill] sm:$0xff]  ;;  %v7512_v48 = vadd.f32 %v7401_v2, %v6440_v28 }
 0x392   :  { %4761 = vpow2.f32 %v2656_v55  ;;  %v2883_v16 = vadd.f32 %v4756_v33, %v4754_v54  ;;  %v4758_v42 = vpop.eup %4757  ;;  %v2111_v55 = vpop.f32.mrf.mxu2 }
 0x393   :  { %4763 = vpow2.f32 %v2658_v41  ;;  %2881 = vadd.xlane.f32.xlu0 %v2880_v1  ;;  %3569 = vadd.xlane.f32.xlu1 %v3568_v7  ;;  %v8526_v1 = vld [vmem:[#allocation59_spill] sm:$0xff]  ;;  %v4760_v57 = vpop.eup %4759  ;;  %v2420_v30 = vmax.f32 %v2419_v3, %v7486_v47 }
 0x394   :  { %4765 = vpow2.f32 %v2660_v26  ;;  %v2884_v54 = vadd.f32 %v4758_v42, %v2883_v16 }
 0x395   :  { %v2284_v49 = vpop.f32.mrf.mxu0  ;;  %v7491_v33 = vpop.xlane.xlu1 %2352  ;;  %4767 = vpow2.f32 %v2662_v56 }
 0x396   :  { %8524 = vst [vmem:[#allocation56_spill] sm:$0xff] %v7491_v33  ;;  %v2500_v41 = vsub.f32 %v8526_v1, %v7491_v33  ;;  %v2501_v19 = vsub.f32 %v8527_v9, %v7491_v33  ;;  %v2502_v14 = vsub.f32 %v8528_v58, %v7491_v33  ;;  %v7503_v44 = vpop.xlane.xlu0 %3499  ;;  %v7505_v26 = vpop.xlane.xlu2 %3504  ;;  %v2503_v16 = vsub.f32 %v6825_v22, %v7491_v33 }
 0x397   :  { %8529 = vst [vmem:[#allocation57_spill] sm:$0xff] %v7503_v44  ;;  %v2022_v1 = vpop.f32.mrf.mxu1  ;;  %v2421_v58 = vmax.f32 %v2420_v30, %v7489_v8  ;;  %v2424_v22 = vmax.f32 %v7512_v48, %v7495_v24  ;;  %v7526_v30 = vadd.f32 %v2284_v49, %v6464_v15 }
 0x398   :  { %8530 = vst [vmem:[#allocation60_spill] sm:$0xff] %v7505_v26  ;;  %v4762_v11 = vpop.eup %4761  ;;  %v2664_v4 = vmul.f32 1.442695, %v2500_v41  ;;  %v2666_v7 = vmul.f32 1.442695, %v2501_v19  ;;  %v2885_v26 = vadd.f32 %v4760_v57, %v2884_v54  ;;  %v7519_v41 = vadd.f32 %v7437_v6, %v6457_v29  ;;  %v2200_v57 = vpop.f32.mrf.mxu3 }
 0x399   :  { %v4764_v42 = vpop.eup %4763  ;;  %v2668_v9 = vmul.f32 1.442695, %v2502_v14  ;;  %v2670_v2 = vmul.f32 1.442695, %v2503_v16  ;;  %v7523_v19 = vadd.f32 %v7459_v18, %v6438_v31  ;;  %v7560_v32 = vadd.f32 %v2022_v1, %v6440_v28 }
 0x39a   :  { %4769 = vpow2.f32 %v2664_v4  ;;  %v2888_v3 = vadd.f32 %v4764_v42, %v4762_v11  ;;  %v4766_v56 = vpop.eup %4765  ;;  %v2425_v18 = vmax.f32 %v2424_v22, %v7519_v41  ;;  %v8533_v42 = vld [vmem:[#allocation62_spill] sm:$0xff] }
 0x39b   :  { %4771 = vpow2.f32 %v2666_v7  ;;  %2422 = vmax.xlane.f32.xlu0 %v2421_v58  ;;  %2886 = vadd.xlane.f32.xlu1 %v2885_v26  ;;  %v4768_v54 = vpop.eup %4767  ;;  %v7530_v26 = vadd.f32 %v7471_v45, %v6440_v28  ;;  %8536 = vst [vmem:[#allocation62_spill] sm:$0xff] %v7560_v32 }
 0x39c   :  { %v2889_v14 = vadd.f32 %v4766_v56, %v2888_v3  ;;  %4773 = vpow2.f32 %v2668_v9  ;;  %v8534_v56 = vld [vmem:[#allocation65_spill] sm:$0xff] }
 0x39d   :  { %v2286_v11 = vpop.f32.mrf.mxu0  ;;  %4775 = vpow2.f32 %v2670_v2  ;;  %v2429_v45 = vmax.f32 %v7530_v26, %v7523_v19 }
 0x39e   :  { %v7532_v16 = vpop.xlane.xlu2 %2357  ;;  %v7534_v6 = vpop.xlane.xlu0 %3509  ;;  %v2890_v4 = vadd.f32 %v4768_v54, %v2889_v14  ;;  %v7553_v2 = vadd.f32 %v2286_v11, %v6464_v15 }
 0x39f   :  { %8531 = vst [vmem:[#allocation59_spill] sm:$0xff] %v7532_v16  ;;  %v2504_v7 = vsub.f32 %v6820_v37, %v7532_v16  ;;  %v2505_v49 = vsub.f32 %v6808_v21, %v7532_v16  ;;  %v2506_v9 = vsub.f32 %v8533_v42, %v7532_v16  ;;  %v2507_v14 = vsub.f32 %v8534_v56, %v7532_v16 }
 0x3a0   :  { %8532 = vst [vmem:[#allocation58_spill] sm:$0xff] %v7534_v6  ;;  %v4770_v58 = vpop.eup %4769  ;;  %2891 = vadd.xlane.f32.xlu2 %v2890_v4  ;;  %v2426_v37 = vmax.f32 %v2425_v18, %v7526_v30  ;;  %v7550_v21 = vadd.f32 %v7482_v12, %v6457_v29  ;;  %v2113_v6 = vpop.f32.mrf.mxu2  ;;  %v7556_v56 = vadd.f32 %v2111_v55, %v6438_v31 }
 0x3a1   :  { %v4772_v3 = vpop.eup %4771  ;;  %v2672_v22 = vmul.f32 1.442695, %v2504_v7  ;;  %v2674_v54 = vmul.f32 1.442695, %v2505_v49  ;;  %v2676_v42 = vmul.f32 1.442695, %v2506_v9  ;;  %v2024_v4 = vpop.f32.mrf.mxu1 }
 0x3a2   :  { %v2893_v33 = vadd.f32 %v4772_v3, %v4770_v58  ;;  %v4774_v44 = vpop.eup %4773  ;;  %8535 = vst [vmem:[#allocation61_spill] sm:$0xff] %v7556_v56  ;;  %v2430_v18 = vmax.f32 %v2429_v45, %v7550_v21  ;;  %v2678_v16 = vmul.f32 1.442695, %v2507_v14  ;;  %v2202_v55 = vpop.f32.mrf.mxu3  ;;  %v8541_v14 = vld [vmem:[#allocation66_spill] sm:$0xff]  ;;  %v2434_v1 = vmax.f32 %v7560_v32, %v7556_v56 }
 0x3a3   :  { %4777 = vpow2.f32 %v2672_v22  ;;  %2427 = vmax.xlane.f32.xlu1 %v2426_v37  ;;  %v4776_v49 = vpop.eup %4775  ;;  %v8539_v22 = vld [vmem:[#allocation64_spill] sm:$0xff]  ;;  %v8542_v37 = vld [vmem:[#allocation69_spill] sm:$0xff] }
 0x3a4   :  { %4779 = vpow2.f32 %v2674_v54  ;;  %v2894_v7 = vadd.f32 %v4774_v44, %v2893_v33  ;;  %v2431_v3 = vmax.f32 %v2430_v18, %v7553_v2  ;;  %v8540_v44 = vld [vmem:[#allocation63_spill] sm:$0xff] }
 0x3a5   :  { %v2289_v12 = vpop.f32.mrf.mxu0  ;;  %4781 = vpow2.f32 %v2676_v42 }
 0x3a6   :  { %v7562_v11 = vpop.xlane.xlu1 %3514  ;;  %v7564_v9 = vpop.xlane.xlu0 %2362  ;;  %v2895_v58 = vadd.f32 %v4776_v49, %v2894_v7  ;;  %4783 = vpow2.f32 %v2678_v16 }
 0x3a7   :  { %8537 = vst [vmem:[#allocation65_spill] sm:$0xff] %v7562_v11  ;;  %v2508_v33 = vsub.f32 %v8539_v22, %v7564_v9  ;;  %v2509_v45 = vsub.f32 %v8540_v44, %v7564_v9  ;;  %v2510_v54 = vsub.f32 %v8541_v14, %v7564_v9  ;;  %v2511_v42 = vsub.f32 %v8542_v37, %v7564_v9 }
 0x3a8   :  { %8538 = vst [vmem:[#allocation103_spill] sm:$0xff] %v7564_v9  ;;  %2896 = vadd.xlane.f32.xlu0 %v2895_v58  ;;  %2432 = vmax.xlane.f32.xlu2 %v2431_v3  ;;  %v7578_v22 = vadd.f32 %v2200_v57, %v6457_v29  ;;  %v7581_v44 = vadd.f32 %v2289_v12, %v6464_v15  ;;  %v2116_v32 = vpop.f32.mrf.mxu2 }
 0x3a9   :  { %v4778_v7 = vpop.eup %4777  ;;  %v2680_v18 = vmul.f32 1.442695, %v2508_v33  ;;  %v2682_v49 = vmul.f32 1.442695, %v2509_v45  ;;  %v2684_v14 = vmul.f32 1.442695, %v2510_v54  ;;  %v7585_v33 = vadd.f32 %v2113_v6, %v6438_v31  ;;  %v2027_v16 = vpop.f32.mrf.mxu1 }
 0x3aa   :  { %v4780_v11 = vpop.eup %4779  ;;  %8543 = vst [vmem:[#allocation64_spill] sm:$0xff] %v7578_v22  ;;  %v2435_v58 = vmax.f32 %v2434_v1, %v7578_v22  ;;  %v2686_v3 = vmul.f32 1.442695, %v2511_v42  ;;  %v8549_v1 = vld [vmem:[#allocation67_spill] sm:$0xff] }
 0x3ab   :  { %8544 = vst [vmem:[#allocation63_spill] sm:$0xff] %v7581_v44  ;;  %4785 = vpow2.f32 %v2680_v18  ;;  %v2898_v46 = vadd.f32 %v4780_v11, %v4778_v7  ;;  %v4782_v56 = vpop.eup %4781  ;;  %v7591_v11 = vadd.f32 %v2024_v4, %v6440_v28  ;;  %v8548_v7 = vld [vmem:[#allocation68_spill] sm:$0xff]  ;;  %v8550_v6 = vld [vmem:[#allocation71_spill] sm:$0xff] }
 0x3ac   :  { %4787 = vpow2.f32 %v2682_v49  ;;  %8545 = vst [vmem:[#allocation66_spill] sm:$0xff] %v7585_v33  ;;  %v2436_v12 = vmax.f32 %v2435_v58, %v7581_v44  ;;  %v4784_v54 = vpop.eup %4783  ;;  %v2205_v58 = vpop.f32.mrf.mxu3 }
 0x3ad   :  { %v2291_v45 = vpop.f32.mrf.mxu0  ;;  %v2899_v37 = vadd.f32 %v4782_v56, %v2898_v46  ;;  %4789 = vpow2.f32 %v2684_v14  ;;  %8547 = vst [vmem:[#allocation104_spill] sm:$0xff] %v7591_v11  ;;  %v2439_v4 = vmax.f32 %v7591_v11, %v7585_v33 }
 0x3ae   :  { %v7587_v57 = vpop.xlane.xlu1 %2367  ;;  %4791 = vpow2.f32 %v2686_v3  ;;  %v7609_v3 = vpop.xlane.xlu0 %3519 }
 0x3af   :  { %8546 = vst [vmem:[#allocation69_spill] sm:$0xff] %v7587_v57  ;;  %v2512_v18 = vsub.f32 %v8548_v7, %v7587_v57  ;;  %v2513_v42 = vsub.f32 %v8549_v1, %v7587_v57  ;;  %v2514_v49 = vsub.f32 %v8550_v6, %v7587_v57  ;;  %v2515_v46 = vsub.f32 %v6945_v63, %v7587_v57 }
 0x3b0   :  { %2437 = vmax.xlane.f32.xlu0 %v2436_v12  ;;  %v2900_v56 = vadd.f32 %v4784_v54, %v2899_v37  ;;  %v7604_v1 = vadd.f32 %v2202_v55, %v6457_v29  ;;  %v7607_v6 = vadd.f32 %v2291_v45, %v6464_v15  ;;  %8553 = vst [vmem:[#allocation71_spill] sm:$0xff] %v7609_v3  ;;  %v2118_v57 = vpop.f32.mrf.mxu2 }
 0x3b1   :  { %v4786_v14 = vpop.eup %4785  ;;  %v2688_v9 = vmul.f32 1.442695, %v2512_v18  ;;  %v2690_v44 = vmul.f32 1.442695, %v2513_v42  ;;  %v2692_v22 = vmul.f32 1.442695, %v2514_v49  ;;  %v7612_v54 = vadd.f32 %v2116_v32, %v6438_v31  ;;  %v2029_v3 = vpop.f32.mrf.mxu1 }
 0x3b2   :  { %v4788_v7 = vpop.eup %4787  ;;  %2901 = vadd.xlane.f32.xlu1 %v2900_v56  ;;  %8551 = vst [vmem:[#allocation68_spill] sm:$0xff] %v7604_v1  ;;  %v2694_v12 = vmul.f32 1.442695, %v2515_v46  ;;  %v2440_v49 = vmax.f32 %v2439_v4, %v7604_v1  ;;  %v8558_v46 = vld [vmem:[#allocation76_spill] sm:$0xff]  ;;  %v7624_v32 = vadd.f32 %v2027_v16, %v6440_v28  ;;  %v7632_v16 = vadd.f32 %v2205_v58, %v6457_v29 }
 0x3b3   :  { %8552 = vst [vmem:[#allocation67_spill] sm:$0xff] %v7607_v6  ;;  %4793 = vpow2.f32 %v2688_v9  ;;  %v2903_v63 = vadd.f32 %v4788_v7, %v4786_v14  ;;  %v4790_v37 = vpop.eup %4789  ;;  %v8556_v9 = vld [vmem:[#allocation73_spill] sm:$0xff] }
 0x3b4   :  { %4795 = vpow2.f32 %v2690_v44  ;;  %8554 = vst [vmem:[#allocation105_spill] sm:$0xff] %v7612_v54  ;;  %v4792_v56 = vpop.eup %4791  ;;  %v8557_v44 = vld [vmem:[#allocation72_spill] sm:$0xff]  ;;  %v2441_v33 = vmax.f32 %v2440_v49, %v7607_v6  ;;  %v2207_v49 = vpop.f32.mrf.mxu3 }
 0x3b5   :  { %v2294_v18 = vpop.f32.mrf.mxu0  ;;  %v7614_v42 = vpop.xlane.xlu2 %2372  ;;  %v2904_v55 = vadd.f32 %v4790_v37, %v2903_v63  ;;  %4797 = vpow2.f32 %v2692_v22  ;;  %8559 = vst [vmem:[#allocation73_spill] sm:$0xff] %v7624_v32  ;;  %v8560_v63 = vld [vmem:[#allocation79_spill] sm:$0xff] }
 0x3b6   :  { %8555 = vst [vmem:[#allocation106_spill] sm:$0xff] %v7614_v42  ;;  %v2516_v45 = vsub.f32 %v8556_v9, %v7614_v42  ;;  %v2517_v14 = vsub.f32 %v8557_v44, %v7614_v42  ;;  %v2518_v7 = vsub.f32 %v8558_v46, %v7614_v42  ;;  %v2519_v37 = vsub.f32 %v8560_v63, %v7614_v42 }
 0x3b7   :  { %v2905_v4 = vadd.f32 %v4792_v56, %v2904_v55  ;;  %4799 = vpow2.f32 %v2694_v12  ;;  %v2444_v44 = vmax.f32 %v7624_v32, %v7612_v54  ;;  %8561 = vst [vmem:[#allocation72_spill] sm:$0xff] %v7632_v16  ;;  %v7635_v55 = vadd.f32 %v2294_v18, %v6464_v15  ;;  %v7637_v12 = vpop.xlane.xlu1 %3524  ;;  %v8566_v18 = vld [vmem:[#allocation80_spill] sm:$0xff] }
 0x3b8   :  { %v2696_v22 = vmul.f32 1.442695, %v2516_v45  ;;  %v2698_v1 = vmul.f32 1.442695, %v2517_v14  ;;  %v2700_v11 = vmul.f32 1.442695, %v2518_v7  ;;  %v7640_v63 = vadd.f32 %v2118_v57, %v6438_v31 }
 0x3b9   :  { %v4794_v9 = vpop.eup %4793  ;;  %2906 = vadd.xlane.f32.xlu2 %v2905_v4  ;;  %8562 = vst [vmem:[#allocation76_spill] sm:$0xff] %v7635_v55  ;;  %v2702_v14 = vmul.f32 1.442695, %v2519_v37  ;;  %v2445_v58 = vmax.f32 %v2444_v44, %v7632_v16  ;;  %v7652_v57 = vadd.f32 %v2029_v3, %v6440_v28  ;;  %v8570_v44 = vld [vmem:[#allocation86_spill] sm:$0xff]  ;;  %v2032_v6 = vpop.f32.mrf.mxu1 }
 0x3ba   :  { %v4796_v46 = vpop.eup %4795  ;;  %4801 = vpow2.f32 %v2696_v22  ;;  %2442 = vmax.xlane.f32.xlu1 %v2441_v33  ;;  %8563 = vst [vmem:[#allocation79_spill] sm:$0xff] %v7637_v12 }
 0x3bb   :  { %4803 = vpow2.f32 %v2698_v1  ;;  %v2908_v56 = vadd.f32 %v4796_v46, %v4794_v9  ;;  %v4798_v45 = vpop.eup %4797  ;;  %8564 = vst [vmem:[#allocation107_spill] sm:$0xff] %v7640_v63  ;;  %v8567_v1 = vld [vmem:[#allocation78_spill] sm:$0xff]  ;;  %v8568_v46 = vld [vmem:[#allocation83_spill] sm:$0xff]  ;;  %v2446_v12 = vmax.f32 %v2445_v58, %v7635_v55  ;;  %v7660_v58 = vadd.f32 %v2207_v49, %v6457_v29 }
 0x3bc   :  { %4805 = vpow2.f32 %v2700_v11  ;;  %8569 = vst [vmem:[#allocation80_spill] sm:$0xff] %v7652_v57 }
 0x3bd   :  { %v2296_v7 = vpop.f32.mrf.mxu0  ;;  %v7642_v4 = vpop.xlane.xlu0 %2377  ;;  %v2909_v33 = vadd.f32 %v4798_v45, %v2908_v56  ;;  %4807 = vpow2.f32 %v2702_v14  ;;  %8571 = vst [vmem:[#allocation78_spill] sm:$0xff] %v7660_v58 }
 0x3be   :  { %8565 = vst [vmem:[#allocation108_spill] sm:$0xff] %v7642_v4  ;;  %v4800_v22 = vpop.eup %4799  ;;  %v2520_v42 = vsub.f32 %v8566_v18, %v7642_v4  ;;  %v2521_v9 = vsub.f32 %v8567_v1, %v7642_v4  ;;  %v2522_v37 = vsub.f32 %v8568_v46, %v7642_v4  ;;  %v2121_v56 = vpop.f32.mrf.mxu2  ;;  %v2523_v45 = vsub.f32 %v8570_v44, %v7642_v4  ;;  %v8573_v44 = vld [vmem:[#allocation87_spill] sm:$0xff] }
 0x3bf   :  { %v2910_v11 = vadd.f32 %v4800_v22, %v2909_v33  ;;  %v2449_v1 = vmax.f32 %v7652_v57, %v7640_v63  ;;  %v7663_v22 = vadd.f32 %v2296_v7, %v6464_v15 }
 0x3c0   :  { %v4802_v54 = vpop.eup %4801  ;;  %v2704_v16 = vmul.f32 1.442695, %v2520_v42  ;;  %v2706_v32 = vmul.f32 1.442695, %v2521_v9  ;;  %v2708_v46 = vmul.f32 1.442695, %v2522_v37 }
 0x3c1   :  { %v4804_v18 = vpop.eup %4803  ;;  %2911 = vadd.xlane.f32.xlu0 %v2910_v11  ;;  %2447 = vmax.xlane.f32.xlu2 %v2446_v12  ;;  %v8572_v42 = vld [vmem:[#allocation75_spill] sm:$0xff]  ;;  %v2710_v9 = vmul.f32 1.442695, %v2523_v45  ;;  %v2450_v7 = vmax.f32 %v2449_v1, %v7660_v58  ;;  %v8574_v45 = vld [vmem:[#allocation85_spill] sm:$0xff] }
 0x3c2   :  { %4809 = vpow2.f32 %v2704_v16  ;;  %v2913_v3 = vadd.f32 %v4804_v18, %v4802_v54  ;;  %v4806_v33 = vpop.eup %4805  ;;  %vm3296_vm1 = vcmp.eq.s32.totalorder %v5379_v40, %v8572_v42  ;;  %vm3297_vm4 = vcmp.eq.s32.totalorder %v5731_v17, %v8572_v42  ;;  %v2210_v16 = vpop.f32.mrf.mxu3 }
 0x3c3   :  { %4811 = vpow2.f32 %v2706_v32  ;;  %v3425_v12 = vsel %vm3297_vm4, %v7495_v24, 0.0  ;;  %v7671_v54 = vadd.f32 %v2121_v56, %v6438_v31  ;;  %v4808_v32 = vpop.eup %4807  ;;  %v3424_v37 = vsel %vm3296_vm1, %v7512_v48, 0.0  ;;  %vm8598_vm4 = vmmov %vm8587_vm10 }
 0x3c4   :  { %v2914_v14 = vadd.f32 %v4806_v33, %v2913_v3  ;;  %4813 = vpow2.f32 %v2708_v46  ;;  %v7686_v46 = vadd.f32 %v2032_v6, %v6440_v28  ;;  %v2451_v58 = vmax.f32 %v2450_v7, %v7663_v22 }
 0x3c5   :  { %v7673_v49 = vpop.xlane.xlu1 %2382  ;;  %v2299_v11 = vpop.f32.mrf.mxu0  ;;  %4815 = vpow2.f32 %v2710_v9  ;;  %v3576_v55 = vadd.f32 %v3425_v12, %v3424_v37  ;;  %vm3298_vm5 = vcmp.eq.s32.totalorder %v5736_v38, %v8572_v42  ;;  %vm3299_vm0 = vcmp.eq.s32.totalorder %v5739_v39, %v8572_v42 }
 0x3c6   :  { %v2524_v18 = vsub.f32 %v8573_v44, %v7673_v49  ;;  %v2525_v3 = vsub.f32 %v8574_v45, %v7673_v49  ;;  %v2526_v56 = vsub.f32 %v7043_v35, %v7673_v49  ;;  %v7683_v33 = vpop.xlane.xlu0 %3529  ;;  %v2527_v1 = vsub.f32 %v7072_v23, %v7673_v49  ;;  %v8575_v23 = vld [vmem:[#allocation82_spill] sm:$0xff]  ;;  %v2123_v6 = vpop.f32.mrf.mxu2 }
 0x3c7   :  { %v2915_v4 = vadd.f32 %v4808_v32, %v2914_v14  ;;  %v2454_v35 = vmax.f32 %v7686_v46, %v7671_v54  ;;  %vm3301_vm14 = vcmp.eq.s32.totalorder %v5731_v17, %v8575_v23  ;;  %v3426_v9 = vsel %vm3298_vm5, %v7519_v41, 0.0 }
 0x3c8   :  { %v4810_v63 = vpop.eup %4809  ;;  %v2712_v57 = vmul.f32 1.442695, %v2524_v18  ;;  %v2714_v44 = vmul.f32 1.442695, %v2525_v3  ;;  %v2716_v24 = vmul.f32 1.442695, %v2526_v56  ;;  %v7701_v7 = vadd.f32 %v2210_v16, %v6457_v29 }
 0x3c9   :  { %v4812_v45 = vpop.eup %4811  ;;  %2916 = vadd.xlane.f32.xlu1 %v2915_v4  ;;  %2452 = vmax.xlane.f32.xlu0 %v2451_v58  ;;  %v2034_v4 = vpop.f32.mrf.mxu1  ;;  %v7704_v58 = vadd.f32 %v2299_v11, %v6464_v15  ;;  %v2718_v32 = vmul.f32 1.442695, %v2527_v1  ;;  %vm3300_vm6 = vcmp.eq.s32.totalorder %v5379_v40, %v8575_v23  ;;  %v3429_v37 = vsel %vm3301_vm14, %v7523_v19, 0.0 }
 0x3ca   :  { %4817 = vpow2.f32 %v2712_v57  ;;  %v2918_v14 = vadd.f32 %v4812_v45, %v4810_v63  ;;  %v4814_v12 = vpop.eup %4813  ;;  %v3577_v57 = vadd.f32 %v3576_v55, %v3426_v9  ;;  %v7710_v63 = vadd.f32 %v2123_v6, %v6438_v31 }
 0x3cb   :  { %4819 = vpow2.f32 %v2714_v44  ;;  %v2455_v16 = vmax.f32 %v2454_v35, %v7701_v7  ;;  %v3427_v11 = vsel %vm3299_vm0, %v7526_v30, 0.0  ;;  %v4816_v56 = vpop.eup %4815  ;;  %v7720_v1 = vadd.f32 %v2034_v4, %v6440_v28  ;;  %vm8603_vm0 = vmmov %vm8598_vm4 }
 0x3cc   :  { %v2919_v18 = vadd.f32 %v4814_v12, %v2918_v14  ;;  %4821 = vpow2.f32 %v2716_v24  ;;  %v8576_v24 = vld [vmem:[#allocation91_spill] sm:$0xff]  ;;  %vm3302_vm3 = vcmp.eq.s32.totalorder %v5736_v38, %v8575_v23  ;;  %vm3303_vm2 = vcmp.eq.s32.totalorder %v5739_v39, %v8575_v23 }
 0x3cd   :  { %v7712_v3 = vpop.xlane.xlu2 %2387  ;;  %v7728_v45 = vpop.xlane.xlu1 %3534  ;;  %v2456_v6 = vmax.f32 %v2455_v16, %v7704_v58  ;;  %4823 = vpow2.f32 %v2718_v32 }
 0x3ce   :  { %v2528_v55 = vsub.f32 %v7061_v10, %v7712_v3  ;;  %v2529_v31 = vsub.f32 %v7047_v27, %v7712_v3  ;;  %v2530_v44 = vsub.f32 %v8576_v24, %v7712_v3  ;;  %8577 = vst [vmem:[#allocation83_spill] sm:$0xff] %v7728_v45  ;;  %v7730_v35 = vpop.xlane.xlu0 %3539  ;;  %v2531_v42 = vsub.f32 %v7129_v53, %v7712_v3  ;;  %v2212_v10 = vpop.f32.mrf.mxu3 }
 0x3cf   :  { %8578 = vst [vmem:[#allocation86_spill] sm:$0xff] %v7730_v35  ;;  %v2920_v28 = vadd.f32 %v4816_v56, %v2919_v18  ;;  %v3428_v27 = vsel %vm3300_vm6, %v7530_v26, 0.0  ;;  %v2301_v9 = vpop.f32.mrf.mxu0  ;;  %v3578_v24 = vadd.f32 %v3577_v57, %v3427_v11  ;;  %v2459_v35 = vmax.f32 %v7720_v1, %v7710_v63  ;;  %v8579_v11 = vld [vmem:[#allocation70_spill] sm:$0xff]  ;;  %vm8613_vm6 = vmmov %vm8603_vm0 }
 0x3d0   :  { %v4818_v14 = vpop.eup %4817  ;;  %v2720_v12 = vmul.f32 1.442695, %v2528_v55  ;;  %v2722_v4 = vmul.f32 1.442695, %v2529_v31  ;;  %v2724_v53 = vmul.f32 1.442695, %v2530_v44  ;;  %v3581_v18 = vadd.f32 %v3429_v37, %v3428_v27 }
 0x3d1   :  { %v4820_v45 = vpop.eup %4819  ;;  %2457 = vmax.xlane.f32.xlu1 %v2456_v6  ;;  %2921 = vadd.xlane.f32.xlu2 %v2920_v28  ;;  %v2726_v16 = vmul.f32 1.442695, %v2531_v42  ;;  %v7744_v55 = vadd.f32 %v2212_v10, %v6457_v29  ;;  %v7747_v57 = vadd.f32 %v2301_v9, %v6464_v15  ;;  %vm3293_vm12 = vcmp.eq.s32.totalorder %v5731_v17, %v8579_v11 }
 0x3d2   :  { %4825 = vpow2.f32 %v2720_v12  ;;  %3579 = vadd.xlane.f32.xlu0 %v3578_v24  ;;  %v2923_v32 = vadd.f32 %v4820_v45, %v4818_v14  ;;  %v4822_v56 = vpop.eup %4821  ;;  %v3430_v37 = vsel %vm3302_vm3, %v7550_v21, 0.0  ;;  %v3431_v31 = vsel %vm3303_vm2, %v7553_v2, 0.0  ;;  %vm8624_vm2 = vmmov %vm8603_vm0 }
 0x3d3   :  { %4827 = vpow2.f32 %v2722_v4  ;;  %v4824_v45 = vpop.eup %4823  ;;  %v3421_v42 = vsel %vm3293_vm12, %v7469_v60, 0.0  ;;  %v3582_v29 = vadd.f32 %v3581_v18, %v3430_v37  ;;  %v2460_v15 = vmax.f32 %v2459_v35, %v7744_v55 }
 0x3d4   :  { %v2924_v44 = vadd.f32 %v4822_v56, %v2923_v32  ;;  %4829 = vpow2.f32 %v2724_v53  ;;  %vm3292_vm15 = vcmp.eq.s32.totalorder %v5379_v40, %v8579_v11  ;;  %vm3294_vm7 = vcmp.eq.s32.totalorder %v5736_v38, %v8579_v11 }
 0x3d5   :  { %4831 = vpow2.f32 %v2726_v16  ;;  %v3420_v14 = vsel %vm3292_vm15, %v7477_v0, 0.0  ;;  %v3583_v27 = vadd.f32 %v3582_v29, %v3431_v31  ;;  %v2461_v10 = vmax.f32 %v2460_v15, %v7747_v57  ;;  %vm8630_vm15 = vmmov %vm8603_vm0 }
 0x3d6   :  { %v7759_v6 = vpop.xlane.xlu1 %3544  ;;  %v2852_v23 = vpop.xlane.xlu0 %2851  ;;  %v2925_v28 = vadd.f32 %v4824_v45, %v2924_v44  ;;  %v3571_v12 = vadd.f32 %v3421_v42, %v3420_v14  ;;  %vm3295_vm9 = vcmp.eq.s32.totalorder %v5739_v39, %v8579_v11  ;;  %v3422_v53 = vsel %vm3294_vm7, %v7486_v47, 0.0 }
 0x3d7   :  { %4833 = vlog2.f32 %v2852_v23  ;;  %v3423_v18 = vsel %vm3295_vm9, %v7489_v8, 0.0  ;;  %vm8638_vm9 = vmmov %vm8603_vm0 }
 0x3d8   :  { %v4826_v9 = vpop.eup %4825  ;;  %v3572_v56 = vadd.f32 %v3571_v12, %v3422_v53 }
 0x3d9   :  { %v4828_v4 = vpop.eup %4827  ;;  %3584 = vadd.xlane.f32.xlu1 %v3583_v27  ;;  %2462 = vmax.xlane.f32.xlu2 %v2461_v10 }
 0x3da   :  { %2926 = vadd.xlane.f32.xlu0 %v2925_v28  ;;  %v2928_v35 = vadd.f32 %v4828_v4, %v4826_v9  ;;  %v4830_v24 = vpop.eup %4829  ;;  %v3573_v29 = vadd.f32 %v3572_v56, %v3423_v18  ;;  %v8580_v28 = vld [vmem:[#allocation88_spill] sm:$0xff] }
 0x3db   :  { %v4832_v32 = vpop.eup %4831 }
 0x3dc   :  { %v2929_v16 = vadd.f32 %v4830_v24, %v2928_v35 }
 0x3dd   :  { %v4834_v37 = vpop.eup %4833 }
 0x3de   :  { %v3009_v31 = vmul.f32 0.6931472, %v4834_v37  ;;  %v2857_v44 = vpop.xlane.xlu1 %2856  ;;  %v7769_v45 = vpop.xlane.xlu0 %2392  ;;  %v2930_v42 = vadd.f32 %v4832_v32, %v2929_v16  ;;  %v8583_v16 = vld [vmem:[#allocation97_spill] sm:$0xff]  ;;  %v8584_v37 = vld [vmem:[#allocation92_spill] sm:$0xff] }
 0x3df   :  { %4835 = vlog2.f32 %v2857_v44  ;;  %v2532_v15 = vsub.f32 %v7126_v62, %v7769_v45  ;;  %v2533_v11 = vsub.f32 %v7110_v25, %v7769_v45  ;;  %v2534_v23 = vsub.f32 %v7158_v13, %v7769_v45  ;;  %v8581_v62 = vld [vmem:[#allocation8_spill] sm:$0xff] }
 0x3e0   :  { %v3072_v14 = vadd.f32 %v3009_v31, %v8580_v28  ;;  %v2535_v27 = vsub.f32 %v7179_v51, %v7769_v45  ;;  %vm8582_vm8 = vcmp.ge.s32.totalorder %v8581_v62, 0  ;;  %v8586_v28 = vld [vmem:[#allocation93_spill] sm:$0xff] }
 0x3e1   :  { %v2728_v10 = vmul.f32 1.442695, %v2532_v15  ;;  %v2730_v9 = vmul.f32 1.442695, %v2533_v11  ;;  %v2732_v12 = vmul.f32 1.442695, %v2534_v23  ;;  %2931 = vadd.xlane.f32.xlu1 %v2930_v42  ;;  %3574 = vadd.xlane.f32.xlu2 %v3573_v29 }
 0x3e2   :  { %v3648_v4 = vsub.f32 %v3072_v14, %v7168_v5  ;;  %v2734_v24 = vmul.f32 1.442695, %v2535_v27  ;;  %v8585_v42 = vld [vmem:[#allocation100_spill] sm:$0xff] }
 0x3e3   :  { %4837 = vpow2.f32 %v2728_v10 }
 0x3e4   :  { %v3680_v35 = vsel %vm8582_vm8, %v3648_v4, 0.0  ;;  %4839 = vpow2.f32 %v2730_v9  ;;  %v2862_v13 = vpop.xlane.xlu2 %2861 }
 0x3e5   :  { %v4836_v25 = vpop.eup %4835  ;;  %4841 = vpow2.f32 %v2732_v12  ;;  %v3714_v9 = vsel %vm8587_vm10, %v3680_v35, 0.0  ;;  %v8588_v12 = vld [vmem:[#allocation9_spill] sm:$0xff]  ;;  %vm8644_vm10 = vmmov %vm8603_vm0 }
 0x3e6   :  { %v3011_v53 = vmul.f32 0.6931472, %v4836_v25  ;;  %4843 = vlog2.f32 %v2862_v13  ;;  %v7783_v18 = vpop.xlane.xlu1 %2397  ;;  %v7785_v51 = vpop.xlane.xlu0 %3549  ;;  %vm8589_vm11 = vcmp.ge.s32.totalorder %v8588_v12, 0 }
 0x3e7   :  { %v2536_v32 = vsub.f32 %v7176_v34, %v7783_v18  ;;  %v2537_v5 = vsub.f32 %v7192_v59, %v7783_v18  ;;  %v2538_v56 = vsub.f32 %v8583_v16, %v7783_v18  ;;  %v2539_v29 = vsub.f32 %v8585_v42, %v7783_v18  ;;  %v8593_v42 = vld [vmem:[#allocation94_spill] sm:$0xff] }
 0x3e8   :  { %v3073_v31 = vadd.f32 %v3011_v53, %v8584_v37  ;;  %4845 = vpow2.f32 %v2734_v24 }
 0x3e9   :  { %v4838_v44 = vpop.eup %4837  ;;  %v2736_v15 = vmul.f32 1.442695, %v2536_v32  ;;  %v2738_v11 = vmul.f32 1.442695, %v2537_v5  ;;  %v2740_v27 = vmul.f32 1.442695, %v2538_v56 }
 0x3ea   :  { %v4840_v23 = vpop.eup %4839  ;;  %v3649_v14 = vsub.f32 %v3073_v31, %v8586_v28  ;;  %v2742_v13 = vmul.f32 1.442695, %v2539_v29  ;;  %v8591_v5 = vld [vmem:[#allocation98_spill] sm:$0xff]  ;;  %v8592_v56 = vld [vmem:[#allocation99_spill] sm:$0xff] }
 0x3eb   :  { %v4842_v34 = vpop.eup %4841  ;;  %4847 = vpow2.f32 %v2736_v15  ;;  %v2933_v10 = vadd.f32 %v4840_v23, %v4838_v44 }
 0x3ec   :  { %v4844_v59 = vpop.eup %4843  ;;  %v3681_v4 = vsel %vm8589_vm11, %v3649_v14, 0.0  ;;  %4849 = vpow2.f32 %v2738_v11  ;;  %v7801_v53 = vpop.xlane.xlu2 %2402  ;;  %v8594_v11 = vld [vmem:[#allocation101_spill] sm:$0xff] }
 0x3ed   :  { %v3715_v62 = vsel %vm8590_vm13, %v3681_v4, 0.0  ;;  %v3013_v25 = vmul.f32 0.6931472, %v4844_v59  ;;  %v2934_v24 = vadd.f32 %v4842_v34, %v2933_v10  ;;  %4851 = vpow2.f32 %v2740_v27  ;;  %v8595_v10 = vld [vmem:[#allocation96_spill] sm:$0xff]  ;;  %vm8653_vm13 = vmmov %vm8603_vm0 }
 0x3ee   :  { %v3716_v32 = vadd.f32 %v3715_v62, %v3714_v9  ;;  %v2540_v16 = vsub.f32 %v8591_v5, %v7801_v53  ;;  %v2541_v37 = vsub.f32 %v8592_v56, %v7801_v53  ;;  %v7807_v35 = vpop.xlane.xlu1 %3554  ;;  %v2867_v31 = vpop.xlane.xlu0 %2866  ;;  %v2542_v29 = vsub.f32 %v8594_v11, %v7801_v53  ;;  %v8596_v62 = vld [vmem:[#allocation10_spill] sm:$0xff] }
 0x3ef   :  { %v4846_v44 = vpop.eup %4845  ;;  %v3074_v15 = vadd.f32 %v3013_v25, %v8593_v42  ;;  %v2543_v23 = vsub.f32 %v7291_v52, %v7801_v53  ;;  %4853 = vlog2.f32 %v2867_v31  ;;  %vm8597_vm1 = vcmp.ge.s32.totalorder %v8596_v62, 0 }
 0x3f0   :  { %v2744_v28 = vmul.f32 1.442695, %v2540_v16  ;;  %v2746_v14 = vmul.f32 1.442695, %v2541_v37  ;;  %v2935_v27 = vadd.f32 %v4846_v44, %v2934_v24  ;;  %4855 = vpow2.f32 %v2742_v13 }
 0x3f1   :  { %v4848_v34 = vpop.eup %4847  ;;  %v3650_v59 = vsub.f32 %v3074_v15, %v8595_v10  ;;  %v2748_v9 = vmul.f32 1.442695, %v2542_v29  ;;  %v2750_v4 = vmul.f32 1.442695, %v2543_v23 }
 0x3f2   :  { %v4850_v12 = vpop.eup %4849  ;;  %4857 = vpow2.f32 %v2744_v28  ;;  %2936 = vadd.xlane.f32.xlu2 %v2935_v27  ;;  %v8599_v28 = vld [vmem:[#allocation95_spill] sm:$0xff] }
 0x3f3   :  { %v3682_v25 = vsel %vm8597_vm1, %v3650_v59, 0.0  ;;  %4859 = vpow2.f32 %v2746_v14  ;;  %v2938_v5 = vadd.f32 %v4850_v12, %v4848_v34  ;;  %v4852_v56 = vpop.eup %4851 }
 0x3f4   :  { %v3717_v52 = vsel %vm8598_vm4, %v3682_v25, 0.0  ;;  %4861 = vpow2.f32 %v2748_v9  ;;  %v7818_v24 = vpop.xlane.xlu2 %3559  ;;  %vm8663_vm4 = vmmov %vm8603_vm0 }
 0x3f5   :  { %v4854_v16 = vpop.eup %4853  ;;  %v3718_v37 = vadd.f32 %v3717_v52, %v3716_v32  ;;  %v2939_v31 = vadd.f32 %v4852_v56, %v2938_v5  ;;  %4863 = vpow2.f32 %v2750_v4  ;;  %v8600_v4 = vld [vmem:[#allocation39_spill] sm:$0xff]  ;;  %v8601_v5 = vld [vmem:[#allocation12_spill] sm:$0xff] }
 0x3f6   :  { %v3015_v13 = vmul.f32 0.6931472, %v4854_v16  ;;  %v2872_v44 = vpop.xlane.xlu1 %2871  ;;  %v7820_v42 = vpop.xlane.xlu0 %2407  ;;  %vm8602_vm5 = vcmp.ge.s32.totalorder %v8601_v5, 0 }
 0x3f7   :  { %v4856_v15 = vpop.eup %4855  ;;  %4865 = vlog2.f32 %v2872_v44  ;;  %v2544_v11 = vsub.f32 %v7275_v36, %v7820_v42  ;;  %v2545_v29 = vsub.f32 %v7285_v50, %v7820_v42  ;;  %v2546_v32 = vsub.f32 %v7318_v43, %v7820_v42 }
 0x3f8   :  { %v4858_v23 = vpop.eup %4857  ;;  %v3075_v14 = vadd.f32 %v3015_v13, %v8599_v28  ;;  %v2940_v27 = vadd.f32 %v4856_v15, %v2939_v31  ;;  %v2547_v10 = vsub.f32 %v7332_v20, %v7820_v42 }
 0x3f9   :  { %v4860_v34 = vpop.eup %4859  ;;  %v2752_v59 = vmul.f32 1.442695, %v2544_v11  ;;  %v2754_v9 = vmul.f32 1.442695, %v2545_v29  ;;  %v2756_v12 = vmul.f32 1.442695, %v2546_v32 }
 0x3fa   :  { %v3651_v62 = vsub.f32 %v3075_v14, %v8600_v4  ;;  %2941 = vadd.xlane.f32.xlu0 %v2940_v27  ;;  %v2943_v36 = vadd.f32 %v4860_v34, %v4858_v23  ;;  %v4862_v25 = vpop.eup %4861  ;;  %v2758_v31 = vmul.f32 1.442695, %v2547_v10  ;;  %v8606_v23 = vld [vmem:[#allocation44_spill] sm:$0xff]  ;;  %v8607_v14 = vld [vmem:[#allocation45_spill] sm:$0xff]  ;;  %v8608_v34 = vld [vmem:[#allocation102_spill] sm:$0xff] }
 0x3fb   :  { %4867 = vpow2.f32 %v2752_v59  ;;  %v4864_v50 = vpop.eup %4863  ;;  %v8609_v10 = vld [vmem:[#allocation48_spill] sm:$0xff] }
 0x3fc   :  { %v3683_v43 = vsel %vm8602_vm5, %v3651_v62, 0.0  ;;  %4869 = vpow2.f32 %v2754_v9  ;;  %v2944_v56 = vadd.f32 %v4862_v25, %v2943_v36  ;;  %v2877_v20 = vpop.xlane.xlu2 %2876  ;;  %v8610_v36 = vld [vmem:[#allocation40_spill] sm:$0xff] }
 0x3fd   :  { %v4866_v52 = vpop.eup %4865  ;;  %v3719_v16 = vsel %vm8603_vm0, %v3683_v43, 0.0  ;;  %4871 = vpow2.f32 %v2756_v12 }
 0x3fe   :  { %v3720_v13 = vadd.f32 %v3719_v16, %v3718_v37  ;;  %v3017_v44 = vmul.f32 0.6931472, %v4866_v52  ;;  %4873 = vlog2.f32 %v2877_v20  ;;  %v2945_v15 = vadd.f32 %v4864_v50, %v2944_v56  ;;  %v7835_v11 = vpop.xlane.xlu1 %2412  ;;  %v7837_v29 = vpop.xlane.xlu0 %3564  ;;  %v8611_v56 = vld [vmem:[#allocation11_spill] sm:$0xff] }
 0x3ff   :  { %8604 = vst [vmem:[#allocation75_spill] sm:$0xff] %v7835_v11  ;;  %v2548_v32 = vsub.f32 %v7356_v61, %v7835_v11  ;;  %v2549_v28 = vsub.f32 %v8606_v23, %v7835_v11  ;;  %v2550_v27 = vsub.f32 %v8607_v14, %v7835_v11  ;;  %v2551_v9 = vsub.f32 %v8609_v10, %v7835_v11  ;;  %v8615_v23 = vld [vmem:[#allocation46_spill] sm:$0xff]  ;;  %v8616_v14 = vld [vmem:[#allocation47_spill] sm:$0xff]  ;;  %v8618_v10 = vld [vmem:[#allocation41_spill] sm:$0xff] }
 0x400   :  { %8605 = vst [vmem:[#allocation87_spill] sm:$0xff] %v7837_v29  ;;  %v3076_v59 = vadd.f32 %v3017_v44, %v8608_v34  ;;  %2946 = vadd.xlane.f32.xlu1 %v2945_v15  ;;  %4875 = vpow2.f32 %v2758_v31  ;;  %vm8612_vm14 = vcmp.ge.s32.totalorder %v8611_v56, 0  ;;  %v8685_v11 = vld [vmem:[#allocation77_spill] sm:$0xff] }
 0x401   :  { %v4868_v37 = vpop.eup %4867  ;;  %v2760_v12 = vmul.f32 1.442695, %v2548_v32  ;;  %v2762_v4 = vmul.f32 1.442695, %v2549_v28  ;;  %v2764_v61 = vmul.f32 1.442695, %v2550_v27 }
 0x402   :  { %v4870_v62 = vpop.eup %4869  ;;  %v3652_v25 = vsub.f32 %v3076_v59, %v8610_v36  ;;  %v2766_v44 = vmul.f32 1.442695, %v2551_v9 }
 0x403   :  { %v4872_v50 = vpop.eup %4871  ;;  %4877 = vpow2.f32 %v2760_v12  ;;  %v2948_v5 = vadd.f32 %v4870_v62, %v4868_v37  ;;  %v8620_v62 = vld [vmem:[#allocation50_spill] sm:$0xff] }
 0x404   :  { %v4874_v43 = vpop.eup %4873  ;;  %v3684_v52 = vsel %vm8612_vm14, %v3652_v25, 0.0  ;;  %4879 = vpow2.f32 %v2762_v4  ;;  %v7852_v15 = vpop.xlane.xlu2 %2417  ;;  %v8619_v4 = vld [vmem:[#allocation51_spill] sm:$0xff] }
 0x405   :  { %v3721_v16 = vsel %vm8613_vm6, %v3684_v52, 0.0  ;;  %v3019_v20 = vmul.f32 0.6931472, %v4874_v43  ;;  %8614 = vst [vmem:[#allocation85_spill] sm:$0xff] %v7852_v15  ;;  %v2949_v32 = vadd.f32 %v4872_v50, %v2948_v5  ;;  %4881 = vpow2.f32 %v2764_v61  ;;  %v8621_v5 = vld [vmem:[#allocation43_spill] sm:$0xff]  ;;  %vm8681_vm6 = vmmov %vm8603_vm0 }
 0x406   :  { %v3722_v31 = vadd.f32 %v3721_v16, %v3720_v13  ;;  %v2552_v28 = vsub.f32 %v8615_v23, %v7852_v15  ;;  %v2553_v27 = vsub.f32 %v8616_v14, %v7852_v15  ;;  %v7858_v34 = vpop.xlane.xlu1 %3569  ;;  %v2882_v59 = vpop.xlane.xlu0 %2881  ;;  %v2554_v9 = vsub.f32 %v8619_v4, %v7852_v15 }
 0x407   :  { %8617 = vst [vmem:[#allocation82_spill] sm:$0xff] %v7858_v34  ;;  %v4876_v37 = vpop.eup %4875  ;;  %v3077_v12 = vadd.f32 %v3019_v20, %v8618_v10  ;;  %v2555_v36 = vsub.f32 %v8620_v62, %v7852_v15  ;;  %4883 = vlog2.f32 %v2882_v59  ;;  %v8622_v20 = vld [vmem:[#allocation13_spill] sm:$0xff] }
 0x408   :  { %v2768_v13 = vmul.f32 1.442695, %v2552_v28  ;;  %v2770_v25 = vmul.f32 1.442695, %v2553_v27  ;;  %v2950_v61 = vadd.f32 %v4876_v37, %v2949_v32  ;;  %4885 = vpow2.f32 %v2766_v44  ;;  %v8679_v15 = vld [vmem:[#allocation21_spill] sm:$0xff] }
 0x409   :  { %v4878_v50 = vpop.eup %4877  ;;  %v3653_v43 = vsub.f32 %v3077_v12, %v8621_v5  ;;  %v2772_v56 = vmul.f32 1.442695, %v2554_v9  ;;  %v2774_v16 = vmul.f32 1.442695, %v2555_v36  ;;  %vm8623_vm3 = vcmp.ge.s32.totalorder %v8622_v20, 0 }
 0x40a   :  { %v4880_v52 = vpop.eup %4879  ;;  %4887 = vpow2.f32 %v2768_v13  ;;  %2951 = vadd.xlane.f32.xlu2 %v2950_v61  ;;  %v8626_v13 = vld [vmem:[#allocation42_spill] sm:$0xff]  ;;  %vm8680_vm14 = vcmp.ge.s32.totalorder %v8679_v15, 0 }
 0x40b   :  { %v3685_v23 = vsel %vm8623_vm3, %v3653_v43, 0.0  ;;  %4889 = vpow2.f32 %v2770_v25  ;;  %v2953_v14 = vadd.f32 %v4880_v52, %v4878_v50  ;;  %v4882_v10 = vpop.eup %4881  ;;  %v8627_v52 = vld [vmem:[#allocation49_spill] sm:$0xff]  ;;  %vm3304_vm3 = vcmp.eq.s32.totalorder %v5379_v40, %v8685_v11 }
 0x40c   :  { %v3723_v59 = vsel %vm8624_vm2, %v3685_v23, 0.0  ;;  %4891 = vpow2.f32 %v2772_v56 }
 0x40d   :  { %v4884_v28 = vpop.eup %4883  ;;  %v3724_v27 = vadd.f32 %v3723_v59, %v3722_v31  ;;  %v2954_v32 = vadd.f32 %v4882_v10, %v2953_v14  ;;  %4893 = vpow2.f32 %v2774_v16  ;;  %v8628_v14 = vld [vmem:[#allocation15_spill] sm:$0xff] }
 0x40e   :  { %v3021_v37 = vmul.f32 0.6931472, %v4884_v28  ;;  %v2887_v44 = vpop.xlane.xlu1 %2886  ;;  %v7869_v12 = vpop.xlane.xlu0 %2422  ;;  %vm8629_vm12 = vcmp.ge.s32.totalorder %v8628_v14, 0 }
 0x40f   :  { %8625 = vst [vmem:[#allocation91_spill] sm:$0xff] %v7869_v12  ;;  %v4886_v4 = vpop.eup %4885  ;;  %4895 = vlog2.f32 %v2887_v44  ;;  %v2556_v9 = vsub.f32 %v7477_v0, %v7869_v12  ;;  %v2557_v62 = vsub.f32 %v7469_v60, %v7869_v12  ;;  %v2558_v50 = vsub.f32 %v7486_v47, %v7869_v12 }
 0x410   :  { %v4888_v36 = vpop.eup %4887  ;;  %v3078_v25 = vadd.f32 %v3021_v37, %v8626_v13  ;;  %v2955_v61 = vadd.f32 %v4886_v4, %v2954_v32  ;;  %v2559_v5 = vsub.f32 %v7489_v8, %v7869_v12 }
 0x411   :  { %v4890_v31 = vpop.eup %4889  ;;  %v2776_v43 = vmul.f32 1.442695, %v2556_v9  ;;  %v2778_v56 = vmul.f32 1.442695, %v2557_v62  ;;  %v2780_v32 = vmul.f32 1.442695, %v2558_v50 }
 0x412   :  { %v3654_v16 = vsub.f32 %v3078_v25, %v8627_v52  ;;  %2956 = vadd.xlane.f32.xlu0 %v2955_v61  ;;  %v2958_v0 = vadd.f32 %v4890_v31, %v4888_v36  ;;  %v4892_v20 = vpop.eup %4891  ;;  %v2782_v8 = vmul.f32 1.442695, %v2559_v5  ;;  %v8632_v36 = vld [vmem:[#allocation54_spill] sm:$0xff]  ;;  %v8633_v31 = vld [vmem:[#allocation52_spill] sm:$0xff] }
 0x413   :  { %4897 = vpow2.f32 %v2776_v43  ;;  %v2892_v60 = vpop.xlane.xlu2 %2891  ;;  %v4894_v23 = vpop.eup %4893 }
 0x414   :  { %v3686_v10 = vsel %vm8629_vm12, %v3654_v16, 0.0  ;;  %4899 = vpow2.f32 %v2778_v56  ;;  %v2959_v59 = vadd.f32 %v4892_v20, %v2958_v0  ;;  %v8634_v16 = vld [vmem:[#allocation53_spill] sm:$0xff]  ;;  %vm3305_vm12 = vcmp.eq.s32.totalorder %v5731_v17, %v8685_v11 }
 0x415   :  { %v4896_v28 = vpop.eup %4895  ;;  %v3725_v47 = vsel %vm8630_vm15, %v3686_v10, 0.0  ;;  %4901 = vlog2.f32 %v2892_v60  ;;  %vm8688_vm15 = vmmov %vm8603_vm0 }
 0x416   :  { %v3726_v37 = vadd.f32 %v3725_v47, %v3724_v27  ;;  %v3023_v44 = vmul.f32 0.6931472, %v4896_v28  ;;  %v2960_v4 = vadd.f32 %v4894_v23, %v2959_v59  ;;  %v7884_v9 = vpop.xlane.xlu1 %2427  ;;  %4903 = vpow2.f32 %v2780_v32 }
 0x417   :  { %8631 = vst [vmem:[#allocation70_spill] sm:$0xff] %v7884_v9  ;;  %v2560_v62 = vsub.f32 %v7512_v48, %v7884_v9  ;;  %v2561_v13 = vsub.f32 %v8632_v36, %v7884_v9  ;;  %v2562_v25 = vsub.f32 %v7519_v41, %v7884_v9  ;;  %v2563_v61 = vsub.f32 %v7526_v30, %v7884_v9  ;;  %v8636_v30 = vld [vmem:[#allocation14_spill] sm:$0xff]  ;;  %v8639_v36 = vld [vmem:[#allocation55_spill] sm:$0xff] }
 0x418   :  { %v3079_v50 = vadd.f32 %v3023_v44, %v8633_v31  ;;  %2961 = vadd.xlane.f32.xlu1 %v2960_v4  ;;  %4905 = vpow2.f32 %v2782_v8  ;;  %vm8637_vm7 = vcmp.ge.s32.totalorder %v8636_v30, 0 }
 0x419   :  { %v4898_v27 = vpop.eup %4897  ;;  %v2784_v5 = vmul.f32 1.442695, %v2560_v62  ;;  %v2786_v43 = vmul.f32 1.442695, %v2561_v13  ;;  %v2788_v56 = vmul.f32 1.442695, %v2562_v25 }
 0x41a   :  { %v4900_v52 = vpop.eup %4899  ;;  %v3655_v48 = vsub.f32 %v3079_v50, %v8634_v16  ;;  %v2790_v0 = vmul.f32 1.442695, %v2563_v61  ;;  %v8640_v50 = vld [vmem:[#allocation57_spill] sm:$0xff] }
 0x41b   :  { %4907 = vpow2.f32 %v2784_v5  ;;  %v7896_v20 = vpop.xlane.xlu2 %2432  ;;  %v2897_v41 = vpop.xlane.xlu0 %2896  ;;  %v2963_v60 = vadd.f32 %v4900_v52, %v4898_v27 }
 0x41c   :  { %8635 = vst [vmem:[#allocation88_spill] sm:$0xff] %v7896_v20  ;;  %v4902_v23 = vpop.eup %4901  ;;  %v3687_v14 = vsel %vm8637_vm7, %v3655_v48, 0.0  ;;  %4909 = vpow2.f32 %v2786_v43  ;;  %v2564_v10 = vsub.f32 %v7530_v26, %v7896_v20  ;;  %v2565_v59 = vsub.f32 %v7523_v19, %v7896_v20 }
 0x41d   :  { %v3727_v28 = vsel %vm8638_vm9, %v3687_v14, 0.0  ;;  %v3025_v47 = vmul.f32 0.6931472, %v4902_v23  ;;  %4911 = vpow2.f32 %v2788_v56  ;;  %v2566_v32 = vsub.f32 %v7550_v21, %v7896_v20  ;;  %v4904_v62 = vpop.eup %4903  ;;  %v8641_v56 = vld [vmem:[#allocation16_spill] sm:$0xff]  ;;  %v8646_v23 = vld [vmem:[#allocation61_spill] sm:$0xff] }
 0x41e   :  { %v3728_v8 = vadd.f32 %v3727_v28, %v3726_v37  ;;  %4913 = vpow2.f32 %v2790_v0  ;;  %v2567_v44 = vsub.f32 %v7553_v2, %v7896_v20  ;;  %v2792_v4 = vmul.f32 1.442695, %v2564_v10  ;;  %v4906_v19 = vpop.eup %4905  ;;  %v8647_v14 = vld [vmem:[#allocation64_spill] sm:$0xff] }
 0x41f   :  { %v3080_v13 = vadd.f32 %v3025_v47, %v8639_v36  ;;  %v2794_v26 = vmul.f32 1.442695, %v2565_v59  ;;  %v2796_v25 = vmul.f32 1.442695, %v2566_v32  ;;  %4915 = vlog2.f32 %v2897_v41  ;;  %v8645_v41 = vld [vmem:[#allocation62_spill] sm:$0xff]  ;;  %v8648_v47 = vld [vmem:[#allocation63_spill] sm:$0xff] }
 0x420   :  { %4917 = vpow2.f32 %v2792_v4  ;;  %v2964_v61 = vadd.f32 %v4904_v62, %v2963_v60  ;;  %v2798_v21 = vmul.f32 1.442695, %v2567_v44  ;;  %vm8642_vm8 = vcmp.ge.s32.totalorder %v8641_v56, 0 }
 0x421   :  { %v4908_v31 = vpop.eup %4907  ;;  %v3656_v27 = vsub.f32 %v3080_v13, %v8640_v50  ;;  %4919 = vpow2.f32 %v2794_v26  ;;  %vm3306_vm7 = vcmp.eq.s32.totalorder %v5736_v38, %v8685_v11  ;;  %vm3307_vm9 = vcmp.eq.s32.totalorder %v5739_v39, %v8685_v11 }
 0x422   :  { %v4910_v37 = vpop.eup %4909  ;;  %v2965_v5 = vadd.f32 %v4906_v19, %v2964_v61  ;;  %4921 = vpow2.f32 %v2796_v25 }
 0x423   :  { %v4912_v43 = vpop.eup %4911  ;;  %v3688_v2 = vsel %vm8642_vm8, %v3656_v27, 0.0  ;;  %v7913_v52 = vpop.xlane.xlu0 %2437  ;;  %v2968_v16 = vadd.f32 %v4910_v37, %v4908_v31  ;;  %4923 = vpow2.f32 %v2798_v21  ;;  %v8649_v31 = vld [vmem:[#allocation56_spill] sm:$0xff] }
 0x424   :  { %8643 = vst [vmem:[#allocation8_spill] sm:$0xff] %v7913_v52  ;;  %v4914_v48 = vpop.eup %4913  ;;  %v3729_v0 = vsel %vm8644_vm10, %v3688_v2, 0.0  ;;  %2966 = vadd.xlane.f32.xlu2 %v2965_v5  ;;  %v2568_v60 = vsub.f32 %v8645_v41, %v7913_v52  ;;  %v2569_v30 = vsub.f32 %v8646_v23, %v7913_v52  ;;  %v2570_v10 = vsub.f32 %v8647_v14, %v7913_v52  ;;  %v8650_v21 = vld [vmem:[#allocation60_spill] sm:$0xff] }
 0x425   :  { %v4916_v59 = vpop.eup %4915  ;;  %v3730_v28 = vadd.f32 %v3729_v0, %v3728_v8  ;;  %v2571_v32 = vsub.f32 %v8648_v47, %v7913_v52  ;;  %v2902_v44 = vpop.xlane.xlu1 %2901  ;;  %v2969_v4 = vadd.f32 %v4912_v43, %v2968_v16  ;;  %v8651_v16 = vld [vmem:[#allocation18_spill] sm:$0xff] }
 0x426   :  { %v4918_v62 = vpop.eup %4917  ;;  %v3027_v36 = vmul.f32 0.6931472, %v4916_v59  ;;  %v2800_v13 = vmul.f32 1.442695, %v2568_v60  ;;  %v2802_v26 = vmul.f32 1.442695, %v2569_v30  ;;  %4925 = vlog2.f32 %v2902_v44 }
 0x427   :  { %v4920_v25 = vpop.eup %4919  ;;  %v2804_v19 = vmul.f32 1.442695, %v2570_v10  ;;  %v2970_v61 = vadd.f32 %v4914_v48, %v2969_v4  ;;  %v2806_v37 = vmul.f32 1.442695, %v2571_v32  ;;  %vm8652_vm11 = vcmp.ge.s32.totalorder %v8651_v16, 0  ;;  %v8655_v4 = vld [vmem:[#allocation104_spill] sm:$0xff] }
 0x428   :  { %v3081_v50 = vadd.f32 %v3027_v36, %v8649_v31  ;;  %4927 = vpow2.f32 %v2800_v13  ;;  %v2973_v27 = vadd.f32 %v4920_v25, %v4918_v62  ;;  %v4922_v8 = vpop.eup %4921  ;;  %v8656_v36 = vld [vmem:[#allocation66_spill] sm:$0xff] }
 0x429   :  { %4929 = vpow2.f32 %v2802_v26  ;;  %2971 = vadd.xlane.f32.xlu0 %v2970_v61  ;;  %v4924_v43 = vpop.eup %4923  ;;  %v8657_v26 = vld [vmem:[#allocation68_spill] sm:$0xff]  ;;  %v8658_v61 = vld [vmem:[#allocation59_spill] sm:$0xff] }
 0x42a   :  { %v3657_v5 = vsub.f32 %v3081_v50, %v8650_v21  ;;  %v2974_v56 = vadd.f32 %v4922_v8, %v2973_v27  ;;  %4931 = vpow2.f32 %v2804_v19  ;;  %v8659_v50 = vld [vmem:[#allocation67_spill] sm:$0xff] }
 0x42b   :  { %4933 = vpow2.f32 %v2806_v37 }
 0x42c   :  { %v4926_v2 = vpop.eup %4925  ;;  %v3689_v0 = vsel %vm8652_vm11, %v3657_v5, 0.0  ;;  %v2907_v60 = vpop.xlane.xlu2 %2906  ;;  %v2975_v30 = vadd.f32 %v4924_v43, %v2974_v56  ;;  %v8660_v5 = vld [vmem:[#allocation58_spill] sm:$0xff] }
 0x42d   :  { %v3731_v48 = vsel %vm8653_vm13, %v3689_v0, 0.0  ;;  %v3029_v10 = vmul.f32 0.6931472, %v4926_v2  ;;  %v7929_v59 = vpop.xlane.xlu1 %2442  ;;  %4935 = vlog2.f32 %v2907_v60  ;;  %v8661_v60 = vld [vmem:[#allocation17_spill] sm:$0xff] }
 0x42e   :  { %8654 = vst [vmem:[#allocation97_spill] sm:$0xff] %v7929_v59  ;;  %v4928_v32 = vpop.eup %4927  ;;  %v3732_v44 = vadd.f32 %v3731_v48, %v3730_v28  ;;  %v2572_v62 = vsub.f32 %v8655_v4, %v7929_v59  ;;  %v2573_v13 = vsub.f32 %v8656_v36, %v7929_v59  ;;  %v2574_v25 = vsub.f32 %v8657_v26, %v7929_v59 }
 0x42f   :  { %2976 = vadd.xlane.f32.xlu1 %v2975_v30  ;;  %v4930_v19 = vpop.eup %4929  ;;  %v3082_v31 = vadd.f32 %v3029_v10, %v8658_v61  ;;  %v2575_v27 = vsub.f32 %v8659_v50, %v7929_v59  ;;  %vm8662_vm1 = vcmp.ge.s32.totalorder %v8661_v60, 0 }
 0x430   :  { %v2808_v37 = vmul.f32 1.442695, %v2572_v62  ;;  %v2810_v8 = vmul.f32 1.442695, %v2573_v13  ;;  %v2978_v21 = vadd.f32 %v4930_v19, %v4928_v32  ;;  %v4932_v28 = vpop.eup %4931  ;;  %v2812_v43 = vmul.f32 1.442695, %v2574_v25 }
 0x431   :  { %v3658_v56 = vsub.f32 %v3082_v31, %v8660_v5  ;;  %v4934_v2 = vpop.eup %4933  ;;  %v2814_v48 = vmul.f32 1.442695, %v2575_v27  ;;  %v8665_v25 = vld [vmem:[#allocation73_spill] sm:$0xff]  ;;  %v8669_v5 = vld [vmem:[#allocation76_spill] sm:$0xff] }
 0x432   :  { %4937 = vpow2.f32 %v2808_v37  ;;  %v2979_v16 = vadd.f32 %v4932_v28, %v2978_v21  ;;  %v8666_v31 = vld [vmem:[#allocation105_spill] sm:$0xff]  ;;  %v8667_v21 = vld [vmem:[#allocation103_spill] sm:$0xff] }
 0x433   :  { %v4936_v0 = vpop.eup %4935  ;;  %v3690_v30 = vsel %vm8662_vm1, %v3658_v56, 0.0  ;;  %4939 = vpow2.f32 %v2810_v8  ;;  %v8668_v8 = vld [vmem:[#allocation72_spill] sm:$0xff]  ;;  %vm8694_vm1 = vmmov %vm8603_vm0 }
 0x434   :  { %v3733_v10 = vsel %vm8663_vm4, %v3690_v30, 0.0  ;;  %v3031_v61 = vmul.f32 0.6931472, %v4936_v0  ;;  %v7944_v59 = vpop.xlane.xlu2 %2447  ;;  %v2912_v62 = vpop.xlane.xlu0 %2911  ;;  %v2980_v32 = vadd.f32 %v4934_v2, %v2979_v16  ;;  %4941 = vpow2.f32 %v2812_v43  ;;  %v8670_v16 = vld [vmem:[#allocation65_spill] sm:$0xff] }
 0x435   :  { %8664 = vst [vmem:[#allocation92_spill] sm:$0xff] %v7944_v59  ;;  %v3734_v13 = vadd.f32 %v3733_v10, %v3732_v44  ;;  %v2576_v19 = vsub.f32 %v8665_v25, %v7944_v59  ;;  %v2577_v37 = vsub.f32 %v8666_v31, %v7944_v59  ;;  %v2578_v27 = vsub.f32 %v8668_v8, %v7944_v59  ;;  %v8671_v10 = vld [vmem:[#allocation19_spill] sm:$0xff] }
 0x436   :  { %v3083_v28 = vadd.f32 %v3031_v61, %v8667_v21  ;;  %v2579_v56 = vsub.f32 %v8669_v5, %v7944_v59  ;;  %4943 = vlog2.f32 %v2912_v62  ;;  %2981 = vadd.xlane.f32.xlu2 %v2980_v32  ;;  %vm8672_vm5 = vcmp.ge.s32.totalorder %v8671_v10, 0 }
 0x437   :  { %4945 = vpow2.f32 %v2814_v48  ;;  %v2816_v2 = vmul.f32 1.442695, %v2576_v19  ;;  %v2818_v44 = vmul.f32 1.442695, %v2577_v37  ;;  %v2820_v60 = vmul.f32 1.442695, %v2578_v27 }
 0x438   :  { %v4938_v43 = vpop.eup %4937  ;;  %v3659_v0 = vsub.f32 %v3083_v28, %v8670_v16  ;;  %v2822_v21 = vmul.f32 1.442695, %v2579_v56 }
 0x439   :  { %v4940_v30 = vpop.eup %4939  ;;  %4947 = vpow2.f32 %v2816_v2  ;;  %v8674_v2 = vld [vmem:[#allocation80_spill] sm:$0xff] }
 0x43a   :  { %v3691_v61 = vsel %vm8672_vm5, %v3659_v0, 0.0  ;;  %4949 = vpow2.f32 %v2818_v44  ;;  %v2983_v52 = vadd.f32 %v4940_v30, %v4938_v43  ;;  %v4942_v20 = vpop.eup %4941  ;;  %v8675_v44 = vld [vmem:[#allocation107_spill] sm:$0xff]  ;;  %v8676_v43 = vld [vmem:[#allocation78_spill] sm:$0xff] }
 0x43b   :  { %v3735_v59 = vsel %vm8603_vm0, %v3691_v61, 0.0  ;;  %4951 = vpow2.f32 %v2820_v60 }
 0x43c   :  { %v4944_v62 = vpop.eup %4943  ;;  %v3736_v32 = vadd.f32 %v3735_v59, %v3734_v13  ;;  %v2917_v48 = vpop.xlane.xlu1 %2916  ;;  %v2984_v37 = vadd.f32 %v4942_v20, %v2983_v52  ;;  %v8677_v13 = vld [vmem:[#allocation69_spill] sm:$0xff] }
 0x43d   :  { %v7959_v19 = vpop.xlane.xlu0 %2452  ;;  %v4946_v28 = vpop.eup %4945  ;;  %v3033_v27 = vmul.f32 0.6931472, %v4944_v62  ;;  %4953 = vlog2.f32 %v2917_v48  ;;  %v8678_v48 = vld [vmem:[#allocation71_spill] sm:$0xff] }
 0x43e   :  { %8673 = vst [vmem:[#allocation100_spill] sm:$0xff] %v7959_v19  ;;  %v2580_v16 = vsub.f32 %v8674_v2, %v7959_v19  ;;  %v2581_v56 = vsub.f32 %v8675_v44, %v7959_v19  ;;  %4955 = vpow2.f32 %v2822_v21  ;;  %v2582_v0 = vsub.f32 %v8676_v43, %v7959_v19 }
 0x43f   :  { %v2985_v30 = vadd.f32 %v4946_v28, %v2984_v37  ;;  %v4948_v59 = vpop.eup %4947  ;;  %v3084_v60 = vadd.f32 %v3033_v27, %v8677_v13  ;;  %v2583_v20 = vsub.f32 %v7663_v22, %v7959_v19 }
 0x440   :  { %v2824_v52 = vmul.f32 1.442695, %v2580_v16  ;;  %v2826_v10 = vmul.f32 1.442695, %v2581_v56  ;;  %v4950_v61 = vpop.eup %4949  ;;  %v2828_v62 = vmul.f32 1.442695, %v2582_v0 }
 0x441   :  { %2986 = vadd.xlane.f32.xlu0 %v2985_v30  ;;  %v3660_v9 = vsub.f32 %v3084_v60, %v8678_v48  ;;  %v2988_v12 = vadd.f32 %v4950_v61, %v4948_v59  ;;  %v4952_v21 = vpop.eup %4951  ;;  %v2830_v27 = vmul.f32 1.442695, %v2583_v20  ;;  %v8684_v48 = vld [vmem:[#allocation79_spill] sm:$0xff] }
 0x442   :  { %4957 = vpow2.f32 %v2824_v52 }
 0x443   :  { %4959 = vpow2.f32 %v2826_v10  ;;  %v4954_v34 = vpop.eup %4953  ;;  %v3692_v37 = vsel %vm8680_vm14, %v3660_v9, 0.0  ;;  %v2989_v28 = vadd.f32 %v4952_v21, %v2988_v12  ;;  %v8683_v9 = vld [vmem:[#allocation106_spill] sm:$0xff] }
 0x444   :  { %v4956_v13 = vpop.eup %4955  ;;  %v3737_v19 = vsel %vm8681_vm6, %v3692_v37, 0.0  ;;  %v3035_v16 = vmul.f32 0.6931472, %v4954_v34  ;;  %4961 = vpow2.f32 %v2828_v62  ;;  %v7974_v56 = vpop.xlane.xlu1 %2457 }
 0x445   :  { %v2922_v0 = vpop.xlane.xlu2 %2921  ;;  %v3738_v30 = vadd.f32 %v3737_v19, %v3736_v32  ;;  %v2584_v59 = vsub.f32 %v7686_v46, %v7974_v56  ;;  %v2585_v60 = vsub.f32 %v7671_v54, %v7974_v56  ;;  %v2586_v15 = vsub.f32 %v7701_v7, %v7974_v56  ;;  %v7982_v12 = vpop.xlane.xlu0 %3579 }
 0x446   :  { %8682 = vst [vmem:[#allocation93_spill] sm:$0xff] %v7982_v12  ;;  %v3085_v20 = vadd.f32 %v3035_v16, %v8683_v9  ;;  %v2587_v34 = vsub.f32 %v7704_v58, %v7974_v56  ;;  %4963 = vlog2.f32 %v2922_v0  ;;  %v2990_v52 = vadd.f32 %v4956_v13, %v2989_v28  ;;  %v8686_v16 = vld [vmem:[#allocation20_spill] sm:$0xff] }
 0x447   :  { %v2832_v32 = vmul.f32 1.442695, %v2584_v59  ;;  %v2834_v19 = vmul.f32 1.442695, %v2585_v60  ;;  %v2836_v61 = vmul.f32 1.442695, %v2586_v15  ;;  %4965 = vpow2.f32 %v2830_v27 }
 0x448   :  { %v4958_v10 = vpop.eup %4957  ;;  %v3661_v21 = vsub.f32 %v3085_v20, %v8684_v48  ;;  %v2838_v37 = vmul.f32 1.442695, %v2587_v34  ;;  %2991 = vadd.xlane.f32.xlu1 %v2990_v52  ;;  %vm8687_vm2 = vcmp.ge.s32.totalorder %v8686_v16, 0  ;;  %v3433_v59 = vsel %vm3305_vm12, %v8646_v23, 0.0  ;;  %v8690_v16 = vld [vmem:[#allocation74_spill] sm:$0xff] }
 0x449   :  { %v4960_v62 = vpop.eup %4959  ;;  %4967 = vpow2.f32 %v2832_v32  ;;  %vm3308_vm8 = vcmp.eq.s32.totalorder %v5379_v40, %v8690_v16  ;;  %vm3309_vm10 = vcmp.eq.s32.totalorder %v5731_v17, %v8690_v16  ;;  %vm3310_vm5 = vcmp.eq.s32.totalorder %v5736_v38, %v8690_v16 }
 0x44a   :  { %v2993_v29 = vadd.f32 %v4960_v62, %v4958_v10  ;;  %v4962_v12 = vpop.eup %4961  ;;  %v3693_v0 = vsel %vm8687_vm2, %v3661_v21, 0.0  ;;  %4969 = vpow2.f32 %v2834_v19  ;;  %v3432_v19 = vsel %vm3304_vm3, %v8645_v41, 0.0 }
 0x44b   :  { %v3739_v28 = vsel %vm8688_vm15, %v3693_v0, 0.0  ;;  %4971 = vpow2.f32 %v2836_v61  ;;  %v8689_v61 = vld [vmem:[#allocation108_spill] sm:$0xff]  ;;  %vm3311_vm0 = vcmp.eq.s32.totalorder %v5739_v39, %v8690_v16 }
 0x44c   :  { %v2994_v27 = vadd.f32 %v4962_v12, %v2993_v29  ;;  %v4964_v13 = vpop.eup %4963  ;;  %v3740_v60 = vadd.f32 %v3739_v28, %v3738_v30  ;;  %4973 = vpow2.f32 %v2838_v37  ;;  %v7996_v15 = vpop.xlane.xlu1 %3584  ;;  %v3586_v28 = vadd.f32 %v3433_v59, %v3432_v19 }
 0x44d   :  { %v7998_v9 = vpop.xlane.xlu2 %2462  ;;  %v4966_v20 = vpop.eup %4965  ;;  %v3037_v34 = vmul.f32 0.6931472, %v4964_v13  ;;  %v8691_v13 = vld [vmem:[#allocation81_spill] sm:$0xff]  ;;  %v3437_v59 = vsel %vm3309_vm10, %v8656_v36, 0.0 }
 0x44e   :  { %v2588_v52 = vsub.f32 %v7720_v1, %v7998_v9  ;;  %v2589_v29 = vsub.f32 %v7710_v63, %v7998_v9  ;;  %v2590_v23 = vsub.f32 %v7744_v55, %v7998_v9  ;;  %v2927_v30 = vpop.xlane.xlu0 %2926  ;;  %v2591_v12 = vsub.f32 %v7747_v57, %v7998_v9 }
 0x44f   :  { %4975 = vlog2.f32 %v2927_v30  ;;  %v2995_v10 = vadd.f32 %v4966_v20, %v2994_v27  ;;  %v4968_v32 = vpop.eup %4967  ;;  %v3086_v62 = vadd.f32 %v3037_v34, %v8689_v61  ;;  %vm3317_vm11 = vcmp.eq.s32.totalorder %v5731_v17, %v8691_v13  ;;  %v8692_v30 = vld [vmem:[#allocation22_spill] sm:$0xff] }
 0x450   :  { %v2840_v48 = vmul.f32 1.442695, %v2588_v52  ;;  %v2842_v21 = vmul.f32 1.442695, %v2589_v29  ;;  %v4970_v37 = vpop.eup %4969  ;;  %v2844_v0 = vmul.f32 1.442695, %v2590_v23  ;;  %vm3316_vm4 = vcmp.eq.s32.totalorder %v5379_v40, %v8691_v13 }
 0x451   :  { %2996 = vadd.xlane.f32.xlu2 %v2995_v10  ;;  %v4972_v27 = vpop.eup %4971  ;;  %v3662_v41 = vsub.f32 %v3086_v62, %v7683_v33  ;;  %v2998_v20 = vadd.f32 %v4970_v37, %v4968_v32  ;;  %v3436_v52 = vsel %vm3308_vm8, %v8655_v4, 0.0  ;;  %v2846_v29 = vmul.f32 1.442695, %v2591_v12 }
 0x452   :  { %4977 = vpow2.f32 %v2840_v48  ;;  %v4974_v34 = vpop.eup %4973  ;;  %v3434_v23 = vsel %vm3306_vm7, %v8647_v14, 0.0  ;;  %vm8693_vm13 = vcmp.ge.s32.totalorder %v8692_v30, 0  ;;  %v3435_v33 = vsel %vm3307_vm9, %v8648_v47, 0.0  ;;  %vm8700_vm7 = vmmov %vm8694_vm1 }
 0x453   :  { %4979 = vpow2.f32 %v2842_v21  ;;  %v3694_v10 = vsel %vm8693_vm13, %v3662_v41, 0.0  ;;  %v2999_v19 = vadd.f32 %v4972_v27, %v2998_v20  ;;  %v3445_v4 = vsel %vm3317_vm11, %v8675_v44, 0.0  ;;  %v8696_v27 = vld [vmem:[#allocation90_spill] sm:$0xff]  ;;  %v8697_v41 = vld [vmem:[#allocation83_spill] sm:$0xff] }
 0x454   :  { %v3741_v12 = vsel %vm8694_vm1, %v3694_v10, 0.0  ;;  %4981 = vpow2.f32 %v2844_v0  ;;  %v2932_v61 = vpop.xlane.xlu1 %2931  ;;  %v3587_v62 = vadd.f32 %v3586_v28, %v3434_v23  ;;  %v3591_v21 = vadd.f32 %v3437_v59, %v3436_v52  ;;  %v8695_v0 = vld [vmem:[#allocation89_spill] sm:$0xff]  ;;  %v8698_v59 = vld [vmem:[#allocation24_spill] sm:$0xff] }
 0x455   :  { %v4976_v32 = vpop.eup %4975  ;;  %v3742_v14 = vadd.f32 %v3741_v12, %v3740_v60  ;;  %4983 = vlog2.f32 %v2932_v61  ;;  %v3000_v36 = vadd.f32 %v4974_v34, %v2999_v19  ;;  %v3444_v47 = vsel %vm3316_vm4, %v8674_v2, 0.0  ;;  %v8071_v16 = vpop.xlane.xlu2 %3574 }
 0x456   :  { %v3039_v48 = vmul.f32 0.6931472, %v4976_v32  ;;  %4985 = vpow2.f32 %v2846_v29  ;;  %v3588_v37 = vadd.f32 %v3587_v62, %v3435_v33  ;;  %vm3320_vm14 = vcmp.eq.s32.totalorder %v5379_v40, %v8695_v0 }
 0x457   :  { %3001 = vadd.xlane.f32.xlu0 %v3000_v36  ;;  %vm3318_vm6 = vcmp.eq.s32.totalorder %v5736_v38, %v8691_v13  ;;  %vm3319_vm3 = vcmp.eq.s32.totalorder %v5739_v39, %v8691_v13  ;;  %v3601_v28 = vadd.f32 %v3445_v4, %v3444_v47  ;;  %vm3313_vm2 = vcmp.eq.s32.totalorder %v5731_v17, %v8696_v27 }
 0x458   :  { %v4978_v11 = vpop.eup %4977  ;;  %v3087_v44 = vadd.f32 %v3039_v48, %v7673_v49  ;;  %v3438_v2 = vsel %vm3310_vm5, %v8657_v26, 0.0  ;;  %vm3321_vm12 = vcmp.eq.s32.totalorder %v5731_v17, %v8695_v0  ;;  %v3441_v52 = vsel %vm3313_vm2, %v8666_v31, 0.0  ;;  %vm8705_vm5 = vmmov %vm8700_vm7 }
 0x459   :  { %v4980_v60 = vpop.eup %4979  ;;  %3589 = vadd.xlane.f32.xlu2 %v3588_v37  ;;  %v3439_v13 = vsel %vm3311_vm0, %v8659_v50, 0.0  ;;  %v3592_v29 = vadd.f32 %v3591_v21, %v3438_v2  ;;  %vm8699_vm15 = vcmp.ge.s32.totalorder %v8698_v59, 0  ;;  %v3446_v10 = vsel %vm3318_vm6, %v8676_v43, 0.0  ;;  %vm8708_vm2 = vmmov %vm8705_vm5 }
 0x45a   :  { %v3663_v49 = vsub.f32 %v3087_v44, %v8697_v41  ;;  %v3003_v20 = vadd.f32 %v4980_v60, %v4978_v11  ;;  %v4982_v34 = vpop.eup %4981  ;;  %v3447_v19 = vsel %vm3319_vm3, %v7663_v22, 0.0  ;;  %v3449_v32 = vsel %vm3321_vm12, %v7671_v54, 0.0  ;;  %v8704_v60 = vld [vmem:[#allocation84_spill] sm:$0xff] }
 0x45b   :  { %v4984_v23 = vpop.eup %4983  ;;  %v3602_v12 = vadd.f32 %v3601_v28, %v3446_v10  ;;  %vm3312_vm9 = vcmp.eq.s32.totalorder %v5379_v40, %v8696_v27  ;;  %v3593_v61 = vadd.f32 %v3592_v29, %v3439_v13  ;;  %v3448_v22 = vsel %vm3320_vm14, %v7686_v46, 0.0 }
 0x45c   :  { %v3695_v30 = vsel %vm8699_vm15, %v3663_v49, 0.0  ;;  %v3004_v26 = vadd.f32 %v4982_v34, %v3003_v20  ;;  %v4986_v33 = vpop.eup %4985  ;;  %v3041_v4 = vmul.f32 0.6931472, %v4984_v23  ;;  %v3440_v48 = vsel %vm3312_vm9, %v8665_v25, 0.0  ;;  %v8702_v25 = vld [vmem:[#allocation23_spill] sm:$0xff]  ;;  %v8706_v23 = vld [vmem:[#allocation25_spill] sm:$0xff]  ;;  %vm8711_vm15 = vmmov %vm8708_vm2 }
 0x45d   :  { %v3743_v31 = vsel %vm8700_vm7, %v3695_v30, 0.0  ;;  %v3603_v43 = vadd.f32 %v3602_v12, %v3447_v19  ;;  %v3596_v36 = vadd.f32 %v3441_v52, %v3440_v48  ;;  %v3606_v21 = vadd.f32 %v3449_v32, %v3448_v22  ;;  %vm8714_vm9 = vmmov %vm8708_vm2 }
 0x45e   :  { %v3744_v50 = vadd.f32 %v3743_v31, %v3742_v14  ;;  %v3005_v62 = vadd.f32 %v4986_v33, %v3004_v26  ;;  %v3088_v54 = vadd.f32 %v3041_v4, %v7712_v3  ;;  %vm3314_vm8 = vcmp.eq.s32.totalorder %v5736_v38, %v8696_v27  ;;  %v8701_v14 = vld [vmem:[#allocation86_spill] sm:$0xff]  ;;  %v8709_v33 = vld [vmem:[#allocation27_spill] sm:$0xff] }
 0x45f   :  { %3594 = vadd.xlane.f32.xlu0 %v3593_v61  ;;  %vm3322_vm10 = vcmp.eq.s32.totalorder %v5736_v38, %v8695_v0  ;;  %vm3323_vm11 = vcmp.eq.s32.totalorder %v5739_v39, %v8695_v0  ;;  %vm3315_vm13 = vcmp.eq.s32.totalorder %v5739_v39, %v8696_v27  ;;  %v3442_v46 = vsel %vm3314_vm8, %v8668_v8, 0.0  ;;  %v8712_v61 = vld [vmem:[#allocation26_spill] sm:$0xff] }
 0x460   :  { %3006 = vadd.xlane.f32.xlu1 %v3005_v62  ;;  %v3664_v37 = vsub.f32 %v3088_v54, %v8701_v14  ;;  %v3450_v3 = vsel %vm3322_vm10, %v7701_v7, 0.0  ;;  %vm8703_vm1 = vcmp.ge.s32.totalorder %v8702_v25, 0  ;;  %v3451_v47 = vsel %vm3323_vm11, %v7704_v58, 0.0  ;;  %vm8717_vm10 = vmmov %vm8708_vm2  ;;  %v8718_v25 = vld [vmem:[#allocation75_spill] sm:$0xff] }
 0x461   :  { %3604 = vadd.xlane.f32.xlu2 %v3603_v43  ;;  %v3443_v44 = vsel %vm3315_vm13, %v8669_v5, 0.0  ;;  %vm3325_vm4 = vcmp.eq.s32.totalorder %v5731_v17, %v8704_v60  ;;  %v3607_v0 = vadd.f32 %v3606_v21, %v3450_v3  ;;  %v3597_v2 = vadd.f32 %v3596_v36, %v3442_v46  ;;  %v8715_v21 = vld [vmem:[#allocation28_spill] sm:$0xff]  ;;  %vm8722_vm13 = vmmov %vm8708_vm2 }
 0x462   :  { %v3696_v11 = vsel %vm8703_vm1, %v3664_v37, 0.0  ;;  %v3453_v27 = vsel %vm3325_vm4, %v7710_v63, 0.0  ;;  %vm3324_vm0 = vcmp.eq.s32.totalorder %v5379_v40, %v8704_v60  ;;  %vm3326_vm14 = vcmp.eq.s32.totalorder %v5736_v38, %v8704_v60  ;;  %vm8727_vm4 = vmmov %vm8708_vm2 }
 0x463   :  { %v3745_v28 = vsel %vm8705_vm5, %v3696_v11, 0.0  ;;  %v3608_v8 = vadd.f32 %v3607_v0, %v3451_v47  ;;  %v3598_v49 = vadd.f32 %v3597_v2, %v3443_v44  ;;  %v3452_v58 = vsel %vm3324_vm0, %v7720_v1, 0.0  ;;  %v8719_v47 = vld [vmem:[#allocation87_spill] sm:$0xff]  ;;  %vm8731_vm0 = vmmov %vm8708_vm2 }
 0x464   :  { %v3746_v41 = vadd.f32 %v3745_v28, %v3744_v50  ;;  %v3611_v5 = vadd.f32 %v3453_v27, %v3452_v58  ;;  %vm3327_vm6 = vcmp.eq.s32.totalorder %v5739_v39, %v8704_v60  ;;  %v3454_v17 = vsel %vm3326_vm14, %v7744_v55, 0.0  ;;  %v8720_v28 = vld [vmem:[#allocation30_spill] sm:$0xff]  ;;  %v8723_v27 = vld [vmem:[#allocation85_spill] sm:$0xff] }
 0x465   :  { %v2937_v7 = vpop.xlane.xlu2 %2936  ;;  %v3455_v63 = vsel %vm3327_vm6, %v7747_v57, 0.0  ;;  %vm8707_vm3 = vcmp.ge.s32.totalorder %v8706_v23, 0  ;;  %vm8710_vm12 = vcmp.ge.s32.totalorder %v8709_v33, 0  ;;  %vm8713_vm7 = vcmp.ge.s32.totalorder %v8712_v61, 0  ;;  %v8725_v58 = vld [vmem:[#allocation29_spill] sm:$0xff]  ;;  %vm8736_vm6 = vmmov %vm8731_vm0  ;;  %v8738_v61 = vld [vmem:[#allocation35_spill] sm:$0xff] }
 0x466   :  { %4987 = vlog2.f32 %v2937_v7  ;;  %v3612_v40 = vadd.f32 %v3611_v5, %v3454_v17  ;;  %vm8716_vm8 = vcmp.ge.s32.totalorder %v8715_v21, 0  ;;  %vm8721_vm11 = vcmp.ge.s32.totalorder %v8720_v28, 0  ;;  %v8724_v7 = vld [vmem:[#allocation82_spill] sm:$0xff]  ;;  %v8745_v28 = vld [vmem:[#allocation8_spill] sm:$0xff] }
 0x467   :  { %3609 = vadd.xlane.f32.xlu0 %v3608_v8  ;;  %vm8726_vm1 = vcmp.ge.s32.totalorder %v8725_v58, 0 }
 0x468   :  { %3599 = vadd.xlane.f32.xlu1 %v3598_v49  ;;  %v3613_v13 = vadd.f32 %v3612_v40, %v3455_v63 }
 0x46c   :  { %v4988_v20 = vpop.eup %4987 }
 0x46d   :  { %v3043_v34 = vmul.f32 0.6931472, %v4988_v20  ;;  %v2942_v52 = vpop.xlane.xlu0 %2941 }
 0x46e   :  { %4989 = vlog2.f32 %v2942_v52  ;;  %v8728_v52 = vld [vmem:[#allocation91_spill] sm:$0xff] }
 0x46f   :  { %v3089_v1 = vadd.f32 %v3043_v34, %v7769_v45 }
 0x470   :  { %3614 = vadd.xlane.f32.xlu1 %v3613_v13 }
 0x471   :  { %v3665_v29 = vsub.f32 %v3089_v1, %v7759_v6 }
 0x473   :  { %v3697_v38 = vsel %vm8707_vm3, %v3665_v29, 0.0  ;;  %v2947_v59 = vpop.xlane.xlu1 %2946  ;;  %vm8739_vm3 = vcmp.ge.s32.totalorder %v8738_v61, 0 }
 0x474   :  { %v4990_v39 = vpop.eup %4989  ;;  %v3747_v55 = vsel %vm8708_vm2, %v3697_v38, 0.0  ;;  %4991 = vlog2.f32 %v2947_v59  ;;  %v8729_v59 = vld [vmem:[#allocation31_spill] sm:$0xff]  ;;  %vm8740_vm2 = vmmov %vm8731_vm0 }
 0x475   :  { %v3748_v57 = vadd.f32 %v3747_v55, %v3746_v41  ;;  %v3045_v30 = vmul.f32 0.6931472, %v4990_v39  ;;  %vm8730_vm5 = vcmp.ge.s32.totalorder %v8729_v59, 0 }
 0x477   :  { %v3090_v26 = vadd.f32 %v3045_v30, %v7783_v18 }
 0x479   :  { %v3666_v10 = vsub.f32 %v3090_v26, %v7785_v51 }
 0x47a   :  { %v4992_v19 = vpop.eup %4991 }
 0x47b   :  { %v3698_v45 = vsel %vm8710_vm12, %v3666_v10, 0.0  ;;  %v3047_v32 = vmul.f32 0.6931472, %v4992_v19  ;;  %v8733_v19 = vld [vmem:[#allocation93_spill] sm:$0xff] }
 0x47c   :  { %v3749_v6 = vsel %vm8711_vm15, %v3698_v45, 0.0 }
 0x47d   :  { %v3750_v31 = vadd.f32 %v3749_v6, %v3748_v57  ;;  %v3091_v4 = vadd.f32 %v3047_v32, %v7801_v53  ;;  %v2952_v12 = vpop.xlane.xlu2 %2951  ;;  %v8732_v57 = vld [vmem:[#allocation70_spill] sm:$0xff]  ;;  %v8734_v32 = vld [vmem:[#allocation32_spill] sm:$0xff] }
 0x47e   :  { %4993 = vlog2.f32 %v2952_v12  ;;  %vm8735_vm14 = vcmp.ge.s32.totalorder %v8734_v32, 0 }
 0x47f   :  { %v3667_v50 = vsub.f32 %v3091_v4, %v7807_v35  ;;  %v8737_v4 = vld [vmem:[#allocation88_spill] sm:$0xff] }
 0x481   :  { %v3699_v62 = vsel %vm8713_vm7, %v3667_v50, 0.0  ;;  %vm8742_vm7 = vmmov %vm8731_vm0 }
 0x482   :  { %v3751_v18 = vsel %vm8714_vm9, %v3699_v62, 0.0  ;;  %vm8743_vm9 = vmmov %vm8731_vm0 }
 0x483   :  { %v3752_v51 = vadd.f32 %v3751_v18, %v3750_v31 }
 0x484   :  { %v4994_v48 = vpop.eup %4993 }
 0x485   :  { %v3049_v22 = vmul.f32 0.6931472, %v4994_v48  ;;  %v2957_v54 = vpop.xlane.xlu0 %2956 }
 0x486   :  { %4995 = vlog2.f32 %v2957_v54  ;;  %v8158_v54 = vld [vmem:[%s8196_s1 + $0xf8] sm:$0xff] }
 0x487   :  { %v3092_v43 = vadd.f32 %v3049_v22, %v7820_v42  ;;  %v5017_v22 = vld [vmem:[%s8196_s1 + $0xf0] sm:$0xff]  ;;  %vm3647_vm15 = vcmp.ge.s32.totalorder %v8158_v54, 0 }
 0x488   :  { %vm3646_vm12 = vcmp.ge.s32.totalorder %v5017_v22, 0 }
 0x489   :  { %v3668_v36 = vsub.f32 %v3092_v43, %v7818_v24 }
 0x48b   :  { %v3700_v53 = vsel %vm8716_vm8, %v3668_v36, 0.0  ;;  %v2962_v14 = vpop.xlane.xlu1 %2961 }
 0x48c   :  { %v4996_v37 = vpop.eup %4995  ;;  %v3753_v35 = vsel %vm8717_vm10, %v3700_v53, 0.0  ;;  %4997 = vlog2.f32 %v2962_v14  ;;  %vm8748_vm10 = vmmov %vm8731_vm0 }
 0x48d   :  { %v3754_v46 = vadd.f32 %v3753_v35, %v3752_v51  ;;  %v3051_v3 = vmul.f32 0.6931472, %v4996_v37 }
 0x48f   :  { %v3093_v11 = vadd.f32 %v3051_v3, %v8718_v25  ;;  %v8744_v3 = vld [vmem:[#allocation38_spill] sm:$0xff] }
 0x491   :  { %v3669_v44 = vsub.f32 %v3093_v11, %v8719_v47 }
 0x492   :  { %v4998_v60 = vpop.eup %4997 }
 0x493   :  { %v3701_v42 = vsel %vm8721_vm11, %v3669_v44, 0.0  ;;  %v3053_v0 = vmul.f32 0.6931472, %v4998_v60 }
 0x494   :  { %v3755_v24 = vsel %vm8722_vm13, %v3701_v42, 0.0  ;;  %vm8752_vm13 = vmmov %vm8731_vm0 }
 0x495   :  { %v3756_v2 = vadd.f32 %v3755_v24, %v3754_v46  ;;  %v3094_v41 = vadd.f32 %v3053_v0, %v8723_v27  ;;  %v8746_v27 = vld [vmem:[#allocation33_spill] sm:$0xff] }
 0x496   :  { %vm8747_vm8 = vcmp.ge.s32.totalorder %v8746_v27, 0 }
 0x497   :  { %v3670_v8 = vsub.f32 %v3094_v41, %v8724_v7  ;;  %v2967_v49 = vpop.xlane.xlu2 %2966 }
 0x498   :  { %4999 = vlog2.f32 %v2967_v49 }
 0x499   :  { %v3702_v5 = vsel %vm8726_vm1, %v3670_v8, 0.0 }
 0x49a   :  { %v3757_v17 = vsel %vm8727_vm4, %v3702_v5, 0.0  ;;  %v8749_v5 = vld [vmem:[#allocation97_spill] sm:$0xff] }
 0x49b   :  { %v3758_v63 = vadd.f32 %v3757_v17, %v3756_v2 }
 0x49c   :  { %v2972_v40 = vpop.xlane.xlu0 %2971 }
 0x49d   :  { %5001 = vlog2.f32 %v2972_v40 }
 0x49e   :  { %v5000_v20 = vpop.eup %4999 }
 0x49f   :  { %v3055_v34 = vmul.f32 0.6931472, %v5000_v20 }
 0x4a1   :  { %v3095_v13 = vadd.f32 %v3055_v34, %v8728_v52 }
 0x4a2   :  { %v2977_v1 = vpop.xlane.xlu1 %2976 }
 0x4a3   :  { %5003 = vlog2.f32 %v2977_v1  ;;  %v5002_v29 = vpop.eup %5001  ;;  %v3671_v23 = vsub.f32 %v3095_v13, %v8071_v16 }
 0x4a4   :  { %v3057_v38 = vmul.f32 0.6931472, %v5002_v29  ;;  %v8750_v29 = vld [vmem:[#allocation34_spill] sm:$0xff] }
 0x4a5   :  { %v3703_v39 = vsel %vm8730_vm5, %v3671_v23, 0.0  ;;  %vm8751_vm11 = vcmp.ge.s32.totalorder %v8750_v29, 0  ;;  %vm8759_vm5 = vmmov %vm8731_vm0 }
 0x4a6   :  { %v3759_v55 = vsel %vm8731_vm0, %v3703_v39, 0.0  ;;  %v3096_v30 = vadd.f32 %v3057_v38, %v8732_v57 }
 0x4a7   :  { %v3760_v26 = vadd.f32 %v3759_v55, %v3758_v63  ;;  %v8753_v55 = vld [vmem:[#allocation100_spill] sm:$0xff] }
 0x4a8   :  { %v3672_v33 = vsub.f32 %v3096_v30, %v8733_v19 }
 0x4a9   :  { %v5004_v10 = vpop.eup %5003  ;;  %v2982_v48 = vpop.xlane.xlu2 %2981 }
 0x4aa   :  { %v3059_v45 = vmul.f32 0.6931472, %v5004_v10  ;;  %v3704_v6 = vsel %vm8735_vm14, %v3672_v33, 0.0  ;;  %5005 = vlog2.f32 %v2982_v48  ;;  %vm8760_vm14 = vmmov %vm8731_vm0 }
 0x4ab   :  { %v3761_v31 = vsel %vm8736_vm6, %v3704_v6, 0.0  ;;  %vm8761_vm6 = vmmov %vm8731_vm0 }
 0x4ac   :  { %v3097_v16 = vadd.f32 %v3059_v45, %v8737_v4  ;;  %v3762_v12 = vadd.f32 %v3761_v31, %v3760_v26  ;;  %v8754_v26 = vld [vmem:[#allocation92_spill] sm:$0xff] }
 0x4ae   :  { %v3673_v50 = vsub.f32 %v3097_v16, %v7996_v15  ;;  %v8741_v15 = vmov 0.0   ;;  %v8755_v16 = vld [vmem:[#allocation36_spill] sm:$0xff] }
 0x4af   :  { %v4520_v43 = vsel %vm3646_vm12, 1.0, %v8741_v15  ;;  %v4521_v21 = vsel %vm3647_vm15, 1.0, %v8741_v15  ;;  %vm8756_vm1 = vcmp.ge.s32.totalorder %v8755_v16, 0 }
 0x4b0   :  { %v3705_v62 = vsel %vm8739_vm3, %v3673_v50, 0.0  ;;  %v5006_v53 = vpop.eup %5005  ;;  %v3913_v14 = vsel %vm8742_vm7, %v4520_v43, 0.0  ;;  %v3915_v35 = vsel %vm8743_vm9, %v4521_v21, 0.0  ;;  %v8757_v50 = vld [vmem:[#allocation37_spill] sm:$0xff] }
 0x4b1   :  { %v3763_v18 = vsel %vm8740_vm2, %v3705_v62, 0.0  ;;  %v3061_v46 = vmul.f32 0.6931472, %v5006_v53  ;;  %v3914_v25 = vadd.f32 %v3913_v14, %v8744_v3  ;;  %vm8758_vm4 = vcmp.ge.s32.totalorder %v8757_v50, 0 }
 0x4b2   :  { %v3764_v51 = vadd.f32 %v3763_v18, %v3762_v12 }
 0x4b3   :  { %v3916_v47 = vadd.f32 %v3915_v35, %v3914_v25  ;;  %v3098_v42 = vadd.f32 %v3061_v46, %v8745_v28 }
 0x4b4   :  { %v2987_v36 = vpop.xlane.xlu0 %2986 }
 0x4b5   :  { %5007 = vlog2.f32 %v2987_v36  ;;  %3917 = vadd.xlane.f32.xlu0 %v3916_v47 }
 0x4bb   :  { %v2992_v11 = vpop.xlane.xlu1 %2991  ;;  %v5008_v44 = vpop.eup %5007 }
 0x4bc   :  { %v3063_v2 = vmul.f32 0.6931472, %v5008_v44 }
 0x4be   :  { %v3099_v17 = vadd.f32 %v3063_v2, %v8749_v5 }
 0x4c4   :  { %v2997_v37 = vpop.xlane.xlu2 %2996 }
 0x4c5   :  { %5009 = vlog2.f32 %v2997_v37 }
 0x4c6   :  { %5011 = vlog2.f32 %v2992_v11 }
 0x4ca   :  { %v3002_v60 = vpop.xlane.xlu0 %3001 }
 0x4cb   :  { %5013 = vlog2.f32 %v3002_v60  ;;  %v5010_v8 = vpop.eup %5009 }
 0x4cc   :  { %v3590_v0 = vpop.xlane.xlu2 %3589  ;;  %v5012_v58 = vpop.eup %5011  ;;  %v3067_v34 = vmul.f32 0.6931472, %v5010_v8 }
 0x4cd   :  { %v3674_v24 = vsub.f32 %v3098_v42, %v3590_v0  ;;  %v3065_v13 = vmul.f32 0.6931472, %v5012_v58 }
 0x4ce   :  { %v3101_v57 = vadd.f32 %v3067_v34, %v8753_v55 }
 0x4cf   :  { %v3706_v41 = vsel %vm8747_vm8, %v3674_v24, 0.0  ;;  %v3100_v10 = vadd.f32 %v3065_v13, %v8754_v26 }
 0x4d0   :  { %v3765_v7 = vsel %vm8748_vm10, %v3706_v41, 0.0 }
 0x4d1   :  { %v3766_v49 = vadd.f32 %v3765_v7, %v3764_v51  ;;  %v5014_v63 = vpop.eup %5013 }
 0x4d2   :  { %v3595_v20 = vpop.xlane.xlu0 %3594  ;;  %v3069_v1 = vmul.f32 0.6931472, %v5014_v63 }
 0x4d3   :  { %v3007_v40 = vpop.xlane.xlu1 %3006  ;;  %v3675_v52 = vsub.f32 %v3099_v17, %v3595_v20 }
 0x4d4   :  { %5015 = vlog2.f32 %v3007_v40  ;;  %v3605_v59 = vpop.xlane.xlu2 %3604  ;;  %v3102_v19 = vadd.f32 %v3069_v1, %v7974_v56 }
 0x4d5   :  { %v3707_v23 = vsel %vm8751_vm11, %v3675_v52, 0.0  ;;  %v3677_v30 = vsub.f32 %v3101_v57, %v3605_v59 }
 0x4d6   :  { %v3767_v38 = vsel %vm8752_vm13, %v3707_v23, 0.0 }
 0x4d7   :  { %v3768_v39 = vadd.f32 %v3767_v38, %v3766_v49  ;;  %v3709_v12 = vsel %vm8756_vm1, %v3677_v30, 0.0 }
 0x4d8   :  { %v3771_v48 = vsel %vm8731_vm0, %v3709_v12, 0.0 }
 0x4da   :  { %v5016_v33 = vpop.eup %5015  ;;  %v3610_v32 = vpop.xlane.xlu0 %3609 }
 0x4db   :  { %v3600_v45 = vpop.xlane.xlu1 %3599  ;;  %v3678_v31 = vsub.f32 %v3102_v19, %v3610_v32  ;;  %v3071_v4 = vmul.f32 0.6931472, %v5016_v33 }
 0x4dc   :  { %v3676_v6 = vsub.f32 %v3100_v10, %v3600_v45 }
 0x4dd   :  { %v3710_v51 = vsel %vm3646_vm12, %v3678_v31, 0.0  ;;  %v3103_v15 = vadd.f32 %v3071_v4, %v7998_v9 }
 0x4de   :  { %v3708_v61 = vsel %vm8758_vm4, %v3676_v6, 0.0  ;;  %v3773_v43 = vsel %vm8760_vm14, %v3710_v51, 0.0 }
 0x4df   :  { %v3769_v62 = vsel %vm8759_vm5, %v3708_v61, 0.0 }
 0x4e0   :  { %v3770_v18 = vadd.f32 %v3769_v62, %v3768_v39 }
 0x4e2   :  { %v3772_v56 = vadd.f32 %v3771_v48, %v3770_v18 }
 0x4e3   :  { %v3615_v36 = vpop.xlane.xlu1 %3614 }
 0x4e4   :  { %v3774_v21 = vadd.f32 %v3773_v43, %v3772_v56  ;;  %v3679_v53 = vsub.f32 %v3103_v15, %v3615_v36 }
 0x4e6   :  { %v3711_v14 = vsel %vm3647_vm15, %v3679_v53, 0.0 }
 0x4e7   :  { %v3775_v37 = vsel %vm8761_vm6, %v3711_v14, 0.0 }
 0x4e8   :  { %v3776_v35 = vadd.f32 %v3775_v37, %v3774_v21 }
 0x4ea   :  { %3777 = vadd.xlane.f32.xlu2 %v3776_v35 }
 0x528   :  { %v3918_v46 = vpop.xlane.xlu0 %3917 }
 0x529   :  { %v3919_v22 = vrot.slane %v3918_v46, 4 }
 0x52b   :  { %v3920_v3 = vadd.f32 %v3919_v22, %v3918_v46 }
 0x52d   :  { %v3921_v25 = vrot.slane %v3920_v3, 2 }
 0x52f   :  { %v3922_v9 = vadd.f32 %v3921_v25, %v3920_v3 }
 0x531   :  { %v3923_v42 = vrot.slane %v3922_v9, 1 }
 0x533   :  { %v3924_v2 = vadd.f32 %v3923_v42, %v3922_v9 }
 0x55d   :  { %v3778_v11 = vpop.xlane.xlu2 %3777 }
 0x55e   :  { %v3779_v47 = vrot.slane %v3778_v11, 4 }
 0x560   :  { %v3780_v44 = vadd.f32 %v3779_v47, %v3778_v11 }
 0x562   :  { %v3781_v60 = vrot.slane %v3780_v44, 2 }
 0x564   :  { %v3782_v28 = vadd.f32 %v3781_v60, %v3780_v44 }
 0x566   :  { %v3783_v0 = vrot.slane %v3782_v28, 1 }
 0x568   :  { %v3784_v24 = vadd.f32 %v3783_v0, %v3782_v28 }
 0x56a   :  { %4618 = vpush %v3784_v24 }
 0x56b   :  { %4620 = vpush %v3924_v2 }
 0x59b   :  { %s4619_s14 = spop %4618 }
 0x59c   :  { %s4621_s15 = spop %4620  ;;  %3788 = sst [smem:[#allocation5]] %s4619_s14 }
 0x59d   :  { %3928 = sst [smem:[#allocation5 + $0x1]] %s4621_s15 }
 0x59e   :  { %3937 = dma.smem_to_vmem %s5065_s16, 16, %s3935_s2, [#allocation4]  }
 0x59f   :  { %5057 = dma.done.wait [#allocation4], 16  }
 0x5a0   :  { %5058 = vsyncadd [#allocation4], 4294967280 }
 0x5a1   :  { %3942 = sfence }
 0x5a2   :  { %3943 = vsyncpa [#allocation3], 1 }
 0x5a3   :  { %3944 = vsyncpa [#allocation4], 1 }

</bundles_post_ra>
